<compile_context>
chip_gen: v7x
topology: tpu7x:2x2x1
jax: 0.10.0
libtpu: 0.0.40
codegen_flags: <defaults>
</compile_context>

<pallas_src>
import functools

import jax
import jax.numpy as jnp
import numpy as np
from jax.experimental import pallas as pl
from jax.experimental.pallas import tpu as pltpu

# ----------------- synthetic SiglipVisionConfig (small) -----------------
IMAGE_SIZE = 16
PATCH_SIZE = 8
CHANNELS = 3
HIDDEN = 32            # hidden_size
HEADS = 4
HEAD_DIM = HIDDEN // HEADS
INTERMEDIATE = 64      # intermediate_size
NUM_LAYERS = 3         # num_hidden_layers
SELECT_LAYER = -2      # args.mm_vision_select_layer (typical LLaVA value)
LN_EPS = 1e-6
NUM_PATCHES = (IMAGE_SIZE // PATCH_SIZE) ** 2   # 4
PATCH_K = CHANNELS * PATCH_SIZE * PATCH_SIZE    # 192
LANES = NUM_PATCHES * HIDDEN                    # 128  (lane-dense activation row)
CHUNK_SIZE = 256       # batch chunking from SiglipVisionTower.forward


# ----------------- math helpers (reference / in-kernel) -----------------
def _layernorm(x, gamma, beta, eps=LN_EPS):
    mean = jnp.mean(x, axis=-1, keepdims=True)
    var = jnp.mean(jnp.square(x - mean), axis=-1, keepdims=True)
    return (x - mean) * jax.lax.rsqrt(var + eps) * gamma + beta


def _gelu_tanh(x):
    # gelu_pytorch_tanh
    c = jnp.sqrt(2.0 / jnp.pi).astype(x.dtype)
    return 0.5 * x * (1.0 + jnp.tanh(c * (x + 0.044715 * x * x * x)))


# ----------------- fused tower Pallas kernel -----------------
def fused_tower_kernel(patches_ref, pw_ref, posb_ref,
                       mean_ref, rep_ref, red_ref, exp_ref,
                       ln1g_ref, ln1b_ref,
                       wq_ref, bq_ref, wk_ref, bk_ref, wv_ref, bv_ref,
                       wo_ref, bo_ref,
                       ln2g_ref, ln2b_ref,
                       w1_ref, b1_ref, w2_ref, b2_ref,
                       out_ref):
    """One block of TM images.  Activation layout: (TM, P*D) = (TM, 128).

    patches_ref: (TM, P*K)          pw_ref: (P*K, P*D)   posb_ref: (1, P*D)
    mean_ref:    (P*D, P*D)  per-patch group-mean broadcast matrix
    rep_ref:     (P, P*D, P*D)      rep[j] copies key-patch j's features to every
                                    query-patch lane slot
    red_ref:     (P*D, P*HEADS)     sums each head's HEAD_DIM lane group
    exp_ref:     (P*HEADS, P*D)     broadcasts a per-(patch,head) scalar back to lanes
    weights:     stacked over layers, block-diagonal kron(I_P, W); biases tiled.
    """
    f32 = jnp.float32
    n_layers = wq_ref.shape[0]
    n_keys = rep_ref.shape[0]
    scale = 1.0 / np.sqrt(HEAD_DIM)

    mean_mat = mean_ref[...]
    red = red_ref[...]
    exp_mat = exp_ref[...]

    def group_ln(x, gamma, beta):
        mu = jnp.dot(x, mean_mat, preferred_element_type=f32)
        d = x - mu
        var = jnp.dot(d * d, mean_mat, preferred_element_type=f32)
        return d * jax.lax.rsqrt(var + LN_EPS) * gamma + beta

    # ---- patch embedding (+ position embedding, bias folded in) ----
    x = jnp.dot(patches_ref[...], pw_ref[...], preferred_element_type=f32) + posb_ref[...]

    # ---- encoder layers (static unrolled loop over the needed layers) ----
    for li in range(n_layers):
        # self-attention block
        h = group_ln(x, ln1g_ref[li], ln1b_ref[li])
        q = jnp.dot(h, wq_ref[li], preferred_element_type=f32) + bq_ref[li]
        k = jnp.dot(h, wk_ref[li], preferred_element_type=f32) + bk_ref[li]
        v = jnp.dot(h, wv_ref[li], preferred_element_type=f32) + bv_ref[li]

        # scores for all TM images x all heads x all query patches at once,
        # looping only over the P=4 key patches.
        s_list, v_rep_list = [], []
        for j in range(n_keys):
            rep_j = rep_ref[j]                                              # (128,128)
            k_rep = jnp.dot(k, rep_j, preferred_element_type=f32)           # key j -> all slots
            v_rep_list.append(jnp.dot(v, rep_j, preferred_element_type=f32))
            s_list.append(jnp.dot(q * k_rep, red, preferred_element_type=f32) * scale)  # (TM,16)

        m = s_list[0]
        for j in range(1, n_keys):
            m = jnp.maximum(m, s_list[j])
        e_list = [jnp.exp(s - m) for s in s_list]
        denom = e_list[0]
        for j in range(1, n_keys):
            denom = denom + e_list[j]
        inv = 1.0 / denom

        ctx = jnp.zeros_like(x)
        for j in range(n_keys):
            p_full = jnp.dot(e_list[j] * inv, exp_mat, preferred_element_type=f32)  # (TM,128)
            ctx = ctx + p_full * v_rep_list[j]

        x = x + jnp.dot(ctx, wo_ref[li], preferred_element_type=f32) + bo_ref[li]

        # MLP block
        h2 = group_ln(x, ln2g_ref[li], ln2b_ref[li])
        mlp = jnp.dot(h2, w1_ref[li], preferred_element_type=f32) + b1_ref[li]
        mlp = _gelu_tanh(mlp)
        x = x + jnp.dot(mlp, w2_ref[li], preferred_element_type=f32) + b2_ref[li]

    out_ref[...] = x                                     # lane-dense (TM, 128) store


# ----------------- pallas_call wrapper -----------------
def _full_spec(arr):
    zeros = (0,) * arr.ndim
    return pl.BlockSpec(arr.shape, lambda i: zeros)


_WEIGHT_ORDER = ["ln1_g", "ln1_b", "wq", "bq", "wk", "bk", "wv", "bv",
                 "wo", "bo", "ln2_g", "ln2_b", "w1", "b1", "w2", "b2"]


def _fused_tower(patches128, packed, consts, *, tm):
    b_pad = patches128.shape[0]
    assert b_pad % tm == 0
    grid = (b_pad // tm,)
    mean_m, rep_m, red_m, exp_m = consts
    w_arrs = [packed[k] for k in _WEIGHT_ORDER]

    in_specs = [pl.BlockSpec((tm, NUM_PATCHES * PATCH_K), lambda i: (i, 0)),
                _full_spec(packed["pw_bd"]), _full_spec(packed["posb"]),
                _full_spec(mean_m), _full_spec(rep_m),
                _full_spec(red_m), _full_spec(exp_m)]
    in_specs += [_full_spec(a) for a in w_arrs]

    return pl.pallas_call(
        fused_tower_kernel,
        out_shape=jax.ShapeDtypeStruct((b_pad, LANES), jnp.float32),
        grid_spec=pltpu.PrefetchScalarGridSpec(
            num_scalar_prefetch=0,
            grid=grid,
            in_specs=in_specs,
            out_specs=pl.BlockSpec((tm, LANES), lambda i: (i, 0))),
        compiler_params=pltpu.CompilerParams(
            dimension_semantics=("parallel",),
            vmem_limit_bytes=32 * 1024 * 1024),
    )(patches128, packed["pw_bd"], packed["posb"], mean_m, rep_m, red_m, exp_m, *w_arrs)


# ----------------- host-side packing of params / routing constants -----------------
def _patchify(images):
    # images: (B, C, H, W) NCHW -> (B, P, C*ph*pw), row-major over patch grid.
    B, C, H, W = images.shape
    ph = pw = PATCH_SIZE
    x = images.reshape(B, C, H // ph, ph, W // pw, pw)
    x = jnp.transpose(x, (0, 2, 4, 1, 3, 5))          # (B, H', W', C, ph, pw)
    return x.reshape(B, (H // ph) * (W // pw), C * ph * pw)


def _routing_constants():
    P, D, HD = NUM_PATCHES, HIDDEN, HEAD_DIM
    L = P * D
    lane = np.arange(L)
    mean_m = (lane[:, None] // D == lane[None, :] // D).astype(np.float32) / D
    rep = np.zeros((P, L, L), np.float32)
    c = np.arange(L)
    for j in range(P):
        rep[j, j * D + (c % D), c] = 1.0
    n_grp = L // HD                                    # 16 = P*HEADS groups
    red = (lane[:, None] // HD == np.arange(n_grp)[None, :]).astype(np.float32)  # (L,16)
    expd = np.ascontiguousarray(red.T)                                            # (16,L)
    return (jnp.asarray(mean_m), jnp.asarray(rep), jnp.asarray(red), jnp.asarray(expd))


def _pack_params(params, n_layers):
    P = NUM_PATCHES
    eye = jnp.eye(P, dtype=jnp.float32)
    bd = lambda w: jnp.kron(eye, w.astype(jnp.float32))
    tile_row = lambda v: jnp.tile(v.astype(jnp.float32).reshape(1, -1), (1, P))
    layers = params["layers"][:n_layers]
    packed = {
        "pw_bd": bd(params["patch_w"]),                                   # (P*K, P*D)
        "posb": (params["pos_emb"] + params["patch_b"]).astype(jnp.float32).reshape(1, LANES),
    }
    for k in ["wq", "wk", "wv", "wo", "w1", "w2"]:
        packed[k] = jnp.stack([bd(lp[k]) for lp in layers], axis=0)
    for k in ["ln1_g", "ln1_b", "bq", "bk", "bv", "bo", "ln2_g", "ln2_b", "b1", "b2"]:
        packed[k] = jnp.stack([tile_row(lp[k]) for lp in layers], axis=0)
    return packed


def _layers_needed(select_layer):
    # hidden_states = [embeddings, layer1, ..., layerN]; index k == after k layers.
    return select_layer % (NUM_LAYERS + 1)


def _pick_tm(nb):
    if nb >= 128:
        return 64                      # >=2 grid blocks -> both v7x TensorCores busy
    return max(8, min(64, -(-nb // 8) * 8))


@functools.partial(jax.jit, static_argnames=("tm",))
def _tower_chunk(images_chunk, packed, consts, *, tm):
    nb = images_chunk.shape[0]
    b_pad = -(-nb // tm) * tm
    imgs = images_chunk.astype(jnp.float32)
    if b_pad != nb:
        imgs = jnp.pad(imgs, ((0, b_pad - nb), (0, 0), (0, 0), (0, 0)))
    patches = _patchify(imgs).reshape(b_pad, NUM_PATCHES * PATCH_K)   # lane-dense (B,768)
    feats = _fused_tower(patches, packed, consts, tm=tm)              # (B, 128)
    return feats.reshape(b_pad, NUM_PATCHES, HIDDEN)


# ----------------- SiglipVisionTower.forward equivalent -----------------
def siglip_vision_tower_forward(images, params,
                                select_layer=SELECT_LAYER, select_feature="patch"):
    """Mirrors SiglipVisionTower.forward for a batched tensor input."""
    if select_feature != "patch":
        # TODO(synk): 'list' select_feature (hidden_states[::7]) not implemented.
        raise ValueError(f"Unexpected select feature: {select_feature}")
    # TODO(synk): list-of-images input branch of forward() not exercised here.
    out_dtype = images.dtype
    n_layers = _layers_needed(select_layer)          # only compute layers actually used
    packed = _pack_params(params, n_layers)
    consts = _routing_constants()

    batch_size = images.shape[0]
    feats = []
    for i in range(0, batch_size, CHUNK_SIZE):
        chunk = images[i:i + CHUNK_SIZE]
        tm = _pick_tm(chunk.shape[0])
        f = _tower_chunk(chunk, packed, consts, tm=tm)
        feats.append(f[:chunk.shape[0]].astype(out_dtype))
    return jnp.concatenate(feats, axis=0)


# ----------------- pure-JAX reference (full model, for sanity) -----------------
def _reference_forward(images, params, select_layer=SELECT_LAYER):
    patches = _patchify(images.astype(jnp.float32))
    h = patches @ params["patch_w"] + params["patch_b"] + params["pos_emb"]
    hs = [h]
    for lp in params["layers"]:
        x = h
        n = _layernorm(x, lp["ln1_g"], lp["ln1_b"])
        q = n @ lp["wq"] + lp["bq"]
        k = n @ lp["wk"] + lp["bk"]
        v = n @ lp["wv"] + lp["bv"]
        B, P, D = q.shape
        qh = q.reshape(B, P, HEADS, HEAD_DIM).transpose(0, 2, 1, 3)
        kh = k.reshape(B, P, HEADS, HEAD_DIM).transpose(0, 2, 1, 3)
        vh = v.reshape(B, P, HEADS, HEAD_DIM).transpose(0, 2, 1, 3)
        s = jnp.einsum("bhqd,bhkd->bhqk", qh, kh) / np.sqrt(HEAD_DIM)
        p = jax.nn.softmax(s, axis=-1)
        ctx = jnp.einsum("bhqk,bhkd->bhqd", p, vh).transpose(0, 2, 1, 3).reshape(B, P, D)
        x = x + (ctx @ lp["wo"] + lp["bo"])
        n2 = _layernorm(x, lp["ln2_g"], lp["ln2_b"])
        m = _gelu_tanh(n2 @ lp["w1"] + lp["b1"]) @ lp["w2"] + lp["b2"]
        h = x + m
        hs.append(h)
    return hs[select_layer].astype(images.dtype)


# ----------------- deterministic parameter init -----------------
def make_params(key):
    def norm(k, shape, scale=0.02):
        return scale * jax.random.normal(k, shape, dtype=jnp.float32)

    keys = jax.random.split(key, 4 + NUM_LAYERS)
    params = {
        "patch_w": norm(keys[0], (PATCH_K, HIDDEN)),     # conv weight (D,C,ph,pw) flattened+T
        "patch_b": norm(keys[1], (1, HIDDEN)),
        "pos_emb": norm(keys[2], (NUM_PATCHES, HIDDEN)),
        "layers": [],
    }
    for li in range(NUM_LAYERS):
        lk = jax.random.split(keys[4 + li], 8)
        params["layers"].append({
            "ln1_g": jnp.ones((1, HIDDEN), jnp.float32),
            "ln1_b": jnp.zeros((1, HIDDEN), jnp.float32),
            "wq": norm(lk[0], (HIDDEN, HIDDEN)), "bq": norm(lk[1], (1, HIDDEN)),
            "wk": norm(lk[2], (HIDDEN, HIDDEN)), "bk": jnp.zeros((1, HIDDEN), jnp.float32),
            "wv": norm(lk[3], (HIDDEN, HIDDEN)), "bv": jnp.zeros((1, HIDDEN), jnp.float32),
            "wo": norm(lk[4], (HIDDEN, HIDDEN)), "bo": jnp.zeros((1, HIDDEN), jnp.float32),
            "ln2_g": jnp.ones((1, HIDDEN), jnp.float32),
            "ln2_b": jnp.zeros((1, HIDDEN), jnp.float32),
            "w1": norm(lk[5], (HIDDEN, INTERMEDIATE)), "b1": norm(lk[6], (1, INTERMEDIATE)),
            "w2": norm(lk[7], (INTERMEDIATE, HIDDEN)), "b2": jnp.zeros((1, HIDDEN), jnp.float32),
        })
    return params


# ----------------- main -----------------
if __name__ == "__main__":
    key = jax.random.PRNGKey(0)
    k_img, k_par = jax.random.split(key)

    B = 2
    images = jax.random.normal(k_img, (B, CHANNELS, IMAGE_SIZE, IMAGE_SIZE),
                               dtype=jnp.float32)          # NCHW, like PyTorch
    params = make_params(k_par)

    feats = jax.block_until_ready(siglip_vision_tower_forward(images, params))
    assert feats.shape == (B, NUM_PATCHES, HIDDEN), feats.shape
    assert feats.dtype == images.dtype

    ref = jax.block_until_ready(_reference_forward(images, params))
    np.testing.assert_allclose(np.asarray(feats), np.asarray(ref), rtol=1e-3, atol=1e-3)

    # ragged batch: exercises padding to a multiple of the image-block size
    B2 = 10
    images2 = jax.random.normal(jax.random.PRNGKey(1),
                                (B2, CHANNELS, IMAGE_SIZE, IMAGE_SIZE), dtype=jnp.float32)
    feats2 = jax.block_until_ready(siglip_vision_tower_forward(images2, params))
    ref2 = jax.block_until_ready(_reference_forward(images2, params))
    np.testing.assert_allclose(np.asarray(feats2), np.asarray(ref2), rtol=1e-3, atol=1e-3)

    print("KERNEL_OK")
</pallas_src>

<mosaic_0001>
module attributes {stable_mosaic.version = 11 : i64} {
  func.func @fused_tower_kernel(%arg0: i32, %arg1: memref<8x768xf32, #tpu.memory_space<vmem>>, %arg2: memref<768x128xf32, #tpu.memory_space<vmem>>, %arg3: memref<1x128xf32, #tpu.memory_space<vmem>>, %arg4: memref<128x128xf32, #tpu.memory_space<vmem>>, %arg5: memref<4x128x128xf32, #tpu.memory_space<vmem>>, %arg6: memref<128x16xf32, #tpu.memory_space<vmem>>, %arg7: memref<16x128xf32, #tpu.memory_space<vmem>>, %arg8: memref<2x1x128xf32, #tpu.memory_space<vmem>>, %arg9: memref<2x1x128xf32, #tpu.memory_space<vmem>>, %arg10: memref<2x128x128xf32, #tpu.memory_space<vmem>>, %arg11: memref<2x1x128xf32, #tpu.memory_space<vmem>>, %arg12: memref<2x128x128xf32, #tpu.memory_space<vmem>>, %arg13: memref<2x1x128xf32, #tpu.memory_space<vmem>>, %arg14: memref<2x128x128xf32, #tpu.memory_space<vmem>>, %arg15: memref<2x1x128xf32, #tpu.memory_space<vmem>>, %arg16: memref<2x128x128xf32, #tpu.memory_space<vmem>>, %arg17: memref<2x1x128xf32, #tpu.memory_space<vmem>>, %arg18: memref<2x1x128xf32, #tpu.memory_space<vmem>>, %arg19: memref<2x1x128xf32, #tpu.memory_space<vmem>>, %arg20: memref<2x128x256xf32, #tpu.memory_space<vmem>>, %arg21: memref<2x1x256xf32, #tpu.memory_space<vmem>>, %arg22: memref<2x256x128xf32, #tpu.memory_space<vmem>>, %arg23: memref<2x1x128xf32, #tpu.memory_space<vmem>>, %arg24: memref<8x128xf32, #tpu.memory_space<vmem>>) attributes {dimension_semantics = [#tpu.dimension_semantics<parallel>], iteration_bounds = array<i64: 1>, scalar_prefetch = 0 : i64, scratch_operands = 0 : i64, tpu.core_type = #tpu.core_type<tc>, window_params = [{transform_indices = @transform_0, window_bounds = array<i64: 8, 768>}, {pipeline_mode = #tpu.pipeline_mode<synchronous>, transform_indices = @transform_1, window_bounds = array<i64: 768, 128>}, {pipeline_mode = #tpu.pipeline_mode<synchronous>, transform_indices = @transform_2, window_bounds = array<i64: 1, 128>}, {pipeline_mode = #tpu.pipeline_mode<synchronous>, transform_indices = @transform_3, window_bounds = array<i64: 128, 128>}, {pipeline_mode = #tpu.pipeline_mode<synchronous>, transform_indices = @transform_4, window_bounds = array<i64: 4, 128, 128>}, {pipeline_mode = #tpu.pipeline_mode<synchronous>, transform_indices = @transform_5, window_bounds = array<i64: 128, 16>}, {pipeline_mode = #tpu.pipeline_mode<synchronous>, transform_indices = @transform_6, window_bounds = array<i64: 16, 128>}, {pipeline_mode = #tpu.pipeline_mode<synchronous>, transform_indices = @transform_7, window_bounds = array<i64: 2, 1, 128>}, {pipeline_mode = #tpu.pipeline_mode<synchronous>, transform_indices = @transform_8, window_bounds = array<i64: 2, 1, 128>}, {pipeline_mode = #tpu.pipeline_mode<synchronous>, transform_indices = @transform_9, window_bounds = array<i64: 2, 128, 128>}, {pipeline_mode = #tpu.pipeline_mode<synchronous>, transform_indices = @transform_10, window_bounds = array<i64: 2, 1, 128>}, {pipeline_mode = #tpu.pipeline_mode<synchronous>, transform_indices = @transform_11, window_bounds = array<i64: 2, 128, 128>}, {pipeline_mode = #tpu.pipeline_mode<synchronous>, transform_indices = @transform_12, window_bounds = array<i64: 2, 1, 128>}, {pipeline_mode = #tpu.pipeline_mode<synchronous>, transform_indices = @transform_13, window_bounds = array<i64: 2, 128, 128>}, {pipeline_mode = #tpu.pipeline_mode<synchronous>, transform_indices = @transform_14, window_bounds = array<i64: 2, 1, 128>}, {pipeline_mode = #tpu.pipeline_mode<synchronous>, transform_indices = @transform_15, window_bounds = array<i64: 2, 128, 128>}, {pipeline_mode = #tpu.pipeline_mode<synchronous>, transform_indices = @transform_16, window_bounds = array<i64: 2, 1, 128>}, {pipeline_mode = #tpu.pipeline_mode<synchronous>, transform_indices = @transform_17, window_bounds = array<i64: 2, 1, 128>}, {pipeline_mode = #tpu.pipeline_mode<synchronous>, transform_indices = @transform_18, window_bounds = array<i64: 2, 1, 128>}, {pipeline_mode = #tpu.pipeline_mode<synchronous>, transform_indices = @transform_19, window_bounds = array<i64: 2, 128, 256>}, {pipeline_mode = #tpu.pipeline_mode<synchronous>, transform_indices = @transform_20, window_bounds = array<i64: 2, 1, 256>}, {pipeline_mode = #tpu.pipeline_mode<synchronous>, transform_indices = @transform_21, window_bounds = array<i64: 2, 256, 128>}, {pipeline_mode = #tpu.pipeline_mode<synchronous>, transform_indices = @transform_22, window_bounds = array<i64: 2, 1, 128>}, {transform_indices = @transform_23, window_bounds = array<i64: 8, 128>}]} {
    %c0 = arith.constant 0 : index
    %c0_0 = arith.constant 0 : index
    %0 = vector.load %arg4[%c0, %c0_0] : memref<128x128xf32, #tpu.memory_space<vmem>>, vector<128x128xf32>
    %c0_1 = arith.constant 0 : index
    %c0_2 = arith.constant 0 : index
    %1 = vector.load %arg6[%c0_1, %c0_2] : memref<128x16xf32, #tpu.memory_space<vmem>>, vector<128x16xf32>
    %c0_3 = arith.constant 0 : index
    %c0_4 = arith.constant 0 : index
    %2 = vector.load %arg7[%c0_3, %c0_4] : memref<16x128xf32, #tpu.memory_space<vmem>>, vector<16x128xf32>
    %c0_5 = arith.constant 0 : index
    %c0_6 = arith.constant 0 : index
    %3 = vector.load %arg1[%c0_5, %c0_6] : memref<8x768xf32, #tpu.memory_space<vmem>>, vector<8x768xf32>
    %c0_7 = arith.constant 0 : index
    %c0_8 = arith.constant 0 : index
    %4 = vector.load %arg2[%c0_7, %c0_8] : memref<768x128xf32, #tpu.memory_space<vmem>>, vector<768x128xf32>
    %cst = arith.constant dense<0.000000e+00> : vector<8x128xf32>
    %5 = tpu.matmul %3, %4, %cst {dimension_numbers = #tpu.dot_dimension_numbers<[1], [0], [0], [1], [0, 0, 1, 1], [], []>} : vector<8x768xf32>, vector<768x128xf32>, vector<8x128xf32> -> vector<8x128xf32>
    %c0_9 = arith.constant 0 : index
    %c0_10 = arith.constant 0 : index
    %6 = vector.load %arg3[%c0_9, %c0_10] : memref<1x128xf32, #tpu.memory_space<vmem>>, vector<1x128xf32>
    %7 = vector.broadcast %6 : vector<1x128xf32> to vector<8x128xf32>
    %8 = arith.addf %5, %7 : vector<8x128xf32>
    %c0_11 = arith.constant 0 : index
    %c0_12 = arith.constant 0 : index
    %c0_13 = arith.constant 0 : index
    %9 = vector.load %arg8[%c0_11, %c0_12, %c0_13] : memref<2x1x128xf32, #tpu.memory_space<vmem>>, vector<1x1x128xf32>
    %10 = vector.shape_cast %9 : vector<1x1x128xf32> to vector<1x128xf32>
    %c0_14 = arith.constant 0 : index
    %c0_15 = arith.constant 0 : index
    %c0_16 = arith.constant 0 : index
    %11 = vector.load %arg9[%c0_14, %c0_15, %c0_16] : memref<2x1x128xf32, #tpu.memory_space<vmem>>, vector<1x1x128xf32>
    %12 = vector.shape_cast %11 : vector<1x1x128xf32> to vector<1x128xf32>
    %cst_17 = arith.constant dense<0.000000e+00> : vector<8x128xf32>
    %13 = tpu.matmul %8, %0, %cst_17 {dimension_numbers = #tpu.dot_dimension_numbers<[1], [0], [0], [1], [0, 0, 1, 1], [], []>} : vector<8x128xf32>, vector<128x128xf32>, vector<8x128xf32> -> vector<8x128xf32>
    %14 = arith.subf %8, %13 : vector<8x128xf32>
    %15 = arith.mulf %14, %14 : vector<8x128xf32>
    %cst_18 = arith.constant dense<0.000000e+00> : vector<8x128xf32>
    %16 = tpu.matmul %15, %0, %cst_18 {dimension_numbers = #tpu.dot_dimension_numbers<[1], [0], [0], [1], [0, 0, 1, 1], [], []>} : vector<8x128xf32>, vector<128x128xf32>, vector<8x128xf32> -> vector<8x128xf32>
    %cst_19 = arith.constant 9.99999997E-7 : f32
    %17 = vector.broadcast %cst_19 : f32 to vector<8x128xf32>
    %18 = arith.addf %16, %17 : vector<8x128xf32>
    %19 = math.rsqrt %18 : vector<8x128xf32>
    %20 = arith.mulf %14, %19 : vector<8x128xf32>
    %21 = vector.broadcast %10 : vector<1x128xf32> to vector<8x128xf32>
    %22 = arith.mulf %20, %21 : vector<8x128xf32>
    %23 = vector.broadcast %12 : vector<1x128xf32> to vector<8x128xf32>
    %24 = arith.addf %22, %23 : vector<8x128xf32>
    %c0_20 = arith.constant 0 : index
    %c0_21 = arith.constant 0 : index
    %c0_22 = arith.constant 0 : index
    %25 = vector.load %arg10[%c0_20, %c0_21, %c0_22] : memref<2x128x128xf32, #tpu.memory_space<vmem>>, vector<1x128x128xf32>
    %26 = vector.shape_cast %25 : vector<1x128x128xf32> to vector<128x128xf32>
    %cst_23 = arith.constant dense<0.000000e+00> : vector<8x128xf32>
    %27 = tpu.matmul %24, %26, %cst_23 {dimension_numbers = #tpu.dot_dimension_numbers<[1], [0], [0], [1], [0, 0, 1, 1], [], []>} : vector<8x128xf32>, vector<128x128xf32>, vector<8x128xf32> -> vector<8x128xf32>
    %c0_24 = arith.constant 0 : index
    %c0_25 = arith.constant 0 : index
    %c0_26 = arith.constant 0 : index
    %28 = vector.load %arg11[%c0_24, %c0_25, %c0_26] : memref<2x1x128xf32, #tpu.memory_space<vmem>>, vector<1x1x128xf32>
    %29 = vector.shape_cast %28 : vector<1x1x128xf32> to vector<1x128xf32>
    %30 = vector.broadcast %29 : vector<1x128xf32> to vector<8x128xf32>
    %31 = arith.addf %27, %30 : vector<8x128xf32>
    %c0_27 = arith.constant 0 : index
    %c0_28 = arith.constant 0 : index
    %c0_29 = arith.constant 0 : index
    %32 = vector.load %arg12[%c0_27, %c0_28, %c0_29] : memref<2x128x128xf32, #tpu.memory_space<vmem>>, vector<1x128x128xf32>
    %33 = vector.shape_cast %32 : vector<1x128x128xf32> to vector<128x128xf32>
    %cst_30 = arith.constant dense<0.000000e+00> : vector<8x128xf32>
    %34 = tpu.matmul %24, %33, %cst_30 {dimension_numbers = #tpu.dot_dimension_numbers<[1], [0], [0], [1], [0, 0, 1, 1], [], []>} : vector<8x128xf32>, vector<128x128xf32>, vector<8x128xf32> -> vector<8x128xf32>
    %c0_31 = arith.constant 0 : index
    %c0_32 = arith.constant 0 : index
    %c0_33 = arith.constant 0 : index
    %35 = vector.load %arg13[%c0_31, %c0_32, %c0_33] : memref<2x1x128xf32, #tpu.memory_space<vmem>>, vector<1x1x128xf32>
    %36 = vector.shape_cast %35 : vector<1x1x128xf32> to vector<1x128xf32>
    %37 = vector.broadcast %36 : vector<1x128xf32> to vector<8x128xf32>
    %38 = arith.addf %34, %37 : vector<8x128xf32>
    %c0_34 = arith.constant 0 : index
    %c0_35 = arith.constant 0 : index
    %c0_36 = arith.constant 0 : index
    %39 = vector.load %arg14[%c0_34, %c0_35, %c0_36] : memref<2x128x128xf32, #tpu.memory_space<vmem>>, vector<1x128x128xf32>
    %40 = vector.shape_cast %39 : vector<1x128x128xf32> to vector<128x128xf32>
    %cst_37 = arith.constant dense<0.000000e+00> : vector<8x128xf32>
    %41 = tpu.matmul %24, %40, %cst_37 {dimension_numbers = #tpu.dot_dimension_numbers<[1], [0], [0], [1], [0, 0, 1, 1], [], []>} : vector<8x128xf32>, vector<128x128xf32>, vector<8x128xf32> -> vector<8x128xf32>
    %c0_38 = arith.constant 0 : index
    %c0_39 = arith.constant 0 : index
    %c0_40 = arith.constant 0 : index
    %42 = vector.load %arg15[%c0_38, %c0_39, %c0_40] : memref<2x1x128xf32, #tpu.memory_space<vmem>>, vector<1x1x128xf32>
    %43 = vector.shape_cast %42 : vector<1x1x128xf32> to vector<1x128xf32>
    %44 = vector.broadcast %43 : vector<1x128xf32> to vector<8x128xf32>
    %45 = arith.addf %41, %44 : vector<8x128xf32>
    %c0_41 = arith.constant 0 : index
    %c0_42 = arith.constant 0 : index
    %c0_43 = arith.constant 0 : index
    %46 = vector.load %arg5[%c0_41, %c0_42, %c0_43] : memref<4x128x128xf32, #tpu.memory_space<vmem>>, vector<1x128x128xf32>
    %47 = vector.shape_cast %46 : vector<1x128x128xf32> to vector<128x128xf32>
    %cst_44 = arith.constant dense<0.000000e+00> : vector<8x128xf32>
    %48 = tpu.matmul %38, %47, %cst_44 {dimension_numbers = #tpu.dot_dimension_numbers<[1], [0], [0], [1], [0, 0, 1, 1], [], []>} : vector<8x128xf32>, vector<128x128xf32>, vector<8x128xf32> -> vector<8x128xf32>
    %cst_45 = arith.constant dense<0.000000e+00> : vector<8x128xf32>
    %49 = tpu.matmul %45, %47, %cst_45 {dimension_numbers = #tpu.dot_dimension_numbers<[1], [0], [0], [1], [0, 0, 1, 1], [], []>} : vector<8x128xf32>, vector<128x128xf32>, vector<8x128xf32> -> vector<8x128xf32>
    %50 = arith.mulf %31, %48 : vector<8x128xf32>
    %cst_46 = arith.constant dense<0.000000e+00> : vector<8x16xf32>
    %51 = tpu.matmul %50, %1, %cst_46 {dimension_numbers = #tpu.dot_dimension_numbers<[1], [0], [0], [1], [0, 0, 1, 1], [], []>} : vector<8x128xf32>, vector<128x16xf32>, vector<8x16xf32> -> vector<8x16xf32>
    %cst_47 = arith.constant 0.353553385 : f32
    %52 = vector.broadcast %cst_47 : f32 to vector<8x16xf32>
    %53 = arith.mulf %51, %52 : vector<8x16xf32>
    %c1 = arith.constant 1 : index
    %c0_48 = arith.constant 0 : index
    %c0_49 = arith.constant 0 : index
    %54 = vector.load %arg5[%c1, %c0_48, %c0_49] : memref<4x128x128xf32, #tpu.memory_space<vmem>>, vector<1x128x128xf32>
    %55 = vector.shape_cast %54 : vector<1x128x128xf32> to vector<128x128xf32>
    %cst_50 = arith.constant dense<0.000000e+00> : vector<8x128xf32>
    %56 = tpu.matmul %38, %55, %cst_50 {dimension_numbers = #tpu.dot_dimension_numbers<[1], [0], [0], [1], [0, 0, 1, 1], [], []>} : vector<8x128xf32>, vector<128x128xf32>, vector<8x128xf32> -> vector<8x128xf32>
    %cst_51 = arith.constant dense<0.000000e+00> : vector<8x128xf32>
    %57 = tpu.matmul %45, %55, %cst_51 {dimension_numbers = #tpu.dot_dimension_numbers<[1], [0], [0], [1], [0, 0, 1, 1], [], []>} : vector<8x128xf32>, vector<128x128xf32>, vector<8x128xf32> -> vector<8x128xf32>
    %58 = arith.mulf %31, %56 : vector<8x128xf32>
    %cst_52 = arith.constant dense<0.000000e+00> : vector<8x16xf32>
    %59 = tpu.matmul %58, %1, %cst_52 {dimension_numbers = #tpu.dot_dimension_numbers<[1], [0], [0], [1], [0, 0, 1, 1], [], []>} : vector<8x128xf32>, vector<128x16xf32>, vector<8x16xf32> -> vector<8x16xf32>
    %cst_53 = arith.constant 0.353553385 : f32
    %60 = vector.broadcast %cst_53 : f32 to vector<8x16xf32>
    %61 = arith.mulf %59, %60 : vector<8x16xf32>
    %c2 = arith.constant 2 : index
    %c0_54 = arith.constant 0 : index
    %c0_55 = arith.constant 0 : index
    %62 = vector.load %arg5[%c2, %c0_54, %c0_55] : memref<4x128x128xf32, #tpu.memory_space<vmem>>, vector<1x128x128xf32>
    %63 = vector.shape_cast %62 : vector<1x128x128xf32> to vector<128x128xf32>
    %cst_56 = arith.constant dense<0.000000e+00> : vector<8x128xf32>
    %64 = tpu.matmul %38, %63, %cst_56 {dimension_numbers = #tpu.dot_dimension_numbers<[1], [0], [0], [1], [0, 0, 1, 1], [], []>} : vector<8x128xf32>, vector<128x128xf32>, vector<8x128xf32> -> vector<8x128xf32>
    %cst_57 = arith.constant dense<0.000000e+00> : vector<8x128xf32>
    %65 = tpu.matmul %45, %63, %cst_57 {dimension_numbers = #tpu.dot_dimension_numbers<[1], [0], [0], [1], [0, 0, 1, 1], [], []>} : vector<8x128xf32>, vector<128x128xf32>, vector<8x128xf32> -> vector<8x128xf32>
    %66 = arith.mulf %31, %64 : vector<8x128xf32>
    %cst_58 = arith.constant dense<0.000000e+00> : vector<8x16xf32>
    %67 = tpu.matmul %66, %1, %cst_58 {dimension_numbers = #tpu.dot_dimension_numbers<[1], [0], [0], [1], [0, 0, 1, 1], [], []>} : vector<8x128xf32>, vector<128x16xf32>, vector<8x16xf32> -> vector<8x16xf32>
    %cst_59 = arith.constant 0.353553385 : f32
    %68 = vector.broadcast %cst_59 : f32 to vector<8x16xf32>
    %69 = arith.mulf %67, %68 : vector<8x16xf32>
    %c3 = arith.constant 3 : index
    %c0_60 = arith.constant 0 : index
    %c0_61 = arith.constant 0 : index
    %70 = vector.load %arg5[%c3, %c0_60, %c0_61] : memref<4x128x128xf32, #tpu.memory_space<vmem>>, vector<1x128x128xf32>
    %71 = vector.shape_cast %70 : vector<1x128x128xf32> to vector<128x128xf32>
    %cst_62 = arith.constant dense<0.000000e+00> : vector<8x128xf32>
    %72 = tpu.matmul %38, %71, %cst_62 {dimension_numbers = #tpu.dot_dimension_numbers<[1], [0], [0], [1], [0, 0, 1, 1], [], []>} : vector<8x128xf32>, vector<128x128xf32>, vector<8x128xf32> -> vector<8x128xf32>
    %cst_63 = arith.constant dense<0.000000e+00> : vector<8x128xf32>
    %73 = tpu.matmul %45, %71, %cst_63 {dimension_numbers = #tpu.dot_dimension_numbers<[1], [0], [0], [1], [0, 0, 1, 1], [], []>} : vector<8x128xf32>, vector<128x128xf32>, vector<8x128xf32> -> vector<8x128xf32>
    %74 = arith.mulf %31, %72 : vector<8x128xf32>
    %cst_64 = arith.constant dense<0.000000e+00> : vector<8x16xf32>
    %75 = tpu.matmul %74, %1, %cst_64 {dimension_numbers = #tpu.dot_dimension_numbers<[1], [0], [0], [1], [0, 0, 1, 1], [], []>} : vector<8x128xf32>, vector<128x16xf32>, vector<8x16xf32> -> vector<8x16xf32>
    %cst_65 = arith.constant 0.353553385 : f32
    %76 = vector.broadcast %cst_65 : f32 to vector<8x16xf32>
    %77 = arith.mulf %75, %76 : vector<8x16xf32>
    %78 = arith.maximumf %53, %61 : vector<8x16xf32>
    %79 = arith.maximumf %78, %69 : vector<8x16xf32>
    %80 = arith.maximumf %79, %77 : vector<8x16xf32>
    %81 = arith.subf %53, %80 : vector<8x16xf32>
    %82 = math.exp %81 : vector<8x16xf32>
    %83 = arith.subf %61, %80 : vector<8x16xf32>
    %84 = math.exp %83 : vector<8x16xf32>
    %85 = arith.subf %69, %80 : vector<8x16xf32>
    %86 = math.exp %85 : vector<8x16xf32>
    %87 = arith.subf %77, %80 : vector<8x16xf32>
    %88 = math.exp %87 : vector<8x16xf32>
    %89 = arith.addf %82, %84 : vector<8x16xf32>
    %90 = arith.addf %89, %86 : vector<8x16xf32>
    %91 = arith.addf %90, %88 : vector<8x16xf32>
    %cst_66 = arith.constant 1.000000e+00 : f32
    %92 = vector.broadcast %cst_66 : f32 to vector<8x16xf32>
    %93 = arith.divf %92, %91 : vector<8x16xf32>
    %cst_67 = arith.constant 0.000000e+00 : f32
    %94 = vector.broadcast %cst_67 : f32 to vector<8x128xf32>
    %95 = arith.mulf %82, %93 : vector<8x16xf32>
    %cst_68 = arith.constant dense<0.000000e+00> : vector<8x128xf32>
    %96 = tpu.matmul %95, %2, %cst_68 {dimension_numbers = #tpu.dot_dimension_numbers<[1], [0], [0], [1], [0, 0, 1, 1], [], []>} : vector<8x16xf32>, vector<16x128xf32>, vector<8x128xf32> -> vector<8x128xf32>
    %97 = arith.mulf %96, %49 : vector<8x128xf32>
    %98 = arith.addf %94, %97 : vector<8x128xf32>
    %99 = arith.mulf %84, %93 : vector<8x16xf32>
    %cst_69 = arith.constant dense<0.000000e+00> : vector<8x128xf32>
    %100 = tpu.matmul %99, %2, %cst_69 {dimension_numbers = #tpu.dot_dimension_numbers<[1], [0], [0], [1], [0, 0, 1, 1], [], []>} : vector<8x16xf32>, vector<16x128xf32>, vector<8x128xf32> -> vector<8x128xf32>
    %101 = arith.mulf %100, %57 : vector<8x128xf32>
    %102 = arith.addf %98, %101 : vector<8x128xf32>
    %103 = arith.mulf %86, %93 : vector<8x16xf32>
    %cst_70 = arith.constant dense<0.000000e+00> : vector<8x128xf32>
    %104 = tpu.matmul %103, %2, %cst_70 {dimension_numbers = #tpu.dot_dimension_numbers<[1], [0], [0], [1], [0, 0, 1, 1], [], []>} : vector<8x16xf32>, vector<16x128xf32>, vector<8x128xf32> -> vector<8x128xf32>
    %105 = arith.mulf %104, %65 : vector<8x128xf32>
    %106 = arith.addf %102, %105 : vector<8x128xf32>
    %107 = arith.mulf %88, %93 : vector<8x16xf32>
    %cst_71 = arith.constant dense<0.000000e+00> : vector<8x128xf32>
    %108 = tpu.matmul %107, %2, %cst_71 {dimension_numbers = #tpu.dot_dimension_numbers<[1], [0], [0], [1], [0, 0, 1, 1], [], []>} : vector<8x16xf32>, vector<16x128xf32>, vector<8x128xf32> -> vector<8x128xf32>
    %109 = arith.mulf %108, %73 : vector<8x128xf32>
    %110 = arith.addf %106, %109 : vector<8x128xf32>
    %c0_72 = arith.constant 0 : index
    %c0_73 = arith.constant 0 : index
    %c0_74 = arith.constant 0 : index
    %111 = vector.load %arg16[%c0_72, %c0_73, %c0_74] : memref<2x128x128xf32, #tpu.memory_space<vmem>>, vector<1x128x128xf32>
    %112 = vector.shape_cast %111 : vector<1x128x128xf32> to vector<128x128xf32>
    %cst_75 = arith.constant dense<0.000000e+00> : vector<8x128xf32>
    %113 = tpu.matmul %110, %112, %cst_75 {dimension_numbers = #tpu.dot_dimension_numbers<[1], [0], [0], [1], [0, 0, 1, 1], [], []>} : vector<8x128xf32>, vector<128x128xf32>, vector<8x128xf32> -> vector<8x128xf32>
    %114 = arith.addf %8, %113 : vector<8x128xf32>
    %c0_76 = arith.constant 0 : index
    %c0_77 = arith.constant 0 : index
    %c0_78 = arith.constant 0 : index
    %115 = vector.load %arg17[%c0_76, %c0_77, %c0_78] : memref<2x1x128xf32, #tpu.memory_space<vmem>>, vector<1x1x128xf32>
    %116 = vector.shape_cast %115 : vector<1x1x128xf32> to vector<1x128xf32>
    %117 = vector.broadcast %116 : vector<1x128xf32> to vector<8x128xf32>
    %118 = arith.addf %114, %117 : vector<8x128xf32>
    %c0_79 = arith.constant 0 : index
    %c0_80 = arith.constant 0 : index
    %c0_81 = arith.constant 0 : index
    %119 = vector.load %arg18[%c0_79, %c0_80, %c0_81] : memref<2x1x128xf32, #tpu.memory_space<vmem>>, vector<1x1x128xf32>
    %120 = vector.shape_cast %119 : vector<1x1x128xf32> to vector<1x128xf32>
    %c0_82 = arith.constant 0 : index
    %c0_83 = arith.constant 0 : index
    %c0_84 = arith.constant 0 : index
    %121 = vector.load %arg19[%c0_82, %c0_83, %c0_84] : memref<2x1x128xf32, #tpu.memory_space<vmem>>, vector<1x1x128xf32>
    %122 = vector.shape_cast %121 : vector<1x1x128xf32> to vector<1x128xf32>
    %cst_85 = arith.constant dense<0.000000e+00> : vector<8x128xf32>
    %123 = tpu.matmul %118, %0, %cst_85 {dimension_numbers = #tpu.dot_dimension_numbers<[1], [0], [0], [1], [0, 0, 1, 1], [], []>} : vector<8x128xf32>, vector<128x128xf32>, vector<8x128xf32> -> vector<8x128xf32>
    %124 = arith.subf %118, %123 : vector<8x128xf32>
    %125 = arith.mulf %124, %124 : vector<8x128xf32>
    %cst_86 = arith.constant dense<0.000000e+00> : vector<8x128xf32>
    %126 = tpu.matmul %125, %0, %cst_86 {dimension_numbers = #tpu.dot_dimension_numbers<[1], [0], [0], [1], [0, 0, 1, 1], [], []>} : vector<8x128xf32>, vector<128x128xf32>, vector<8x128xf32> -> vector<8x128xf32>
    %cst_87 = arith.constant 9.99999997E-7 : f32
    %127 = vector.broadcast %cst_87 : f32 to vector<8x128xf32>
    %128 = arith.addf %126, %127 : vector<8x128xf32>
    %129 = math.rsqrt %128 : vector<8x128xf32>
    %130 = arith.mulf %124, %129 : vector<8x128xf32>
    %131 = vector.broadcast %120 : vector<1x128xf32> to vector<8x128xf32>
    %132 = arith.mulf %130, %131 : vector<8x128xf32>
    %133 = vector.broadcast %122 : vector<1x128xf32> to vector<8x128xf32>
    %134 = arith.addf %132, %133 : vector<8x128xf32>
    %c0_88 = arith.constant 0 : index
    %c0_89 = arith.constant 0 : index
    %c0_90 = arith.constant 0 : index
    %135 = vector.load %arg20[%c0_88, %c0_89, %c0_90] : memref<2x128x256xf32, #tpu.memory_space<vmem>>, vector<1x128x256xf32>
    %136 = vector.shape_cast %135 : vector<1x128x256xf32> to vector<128x256xf32>
    %cst_91 = arith.constant dense<0.000000e+00> : vector<8x256xf32>
    %137 = tpu.matmul %134, %136, %cst_91 {dimension_numbers = #tpu.dot_dimension_numbers<[1], [0], [0], [1], [0, 0, 1, 1], [], []>} : vector<8x128xf32>, vector<128x256xf32>, vector<8x256xf32> -> vector<8x256xf32>
    %c0_92 = arith.constant 0 : index
    %c0_93 = arith.constant 0 : index
    %c0_94 = arith.constant 0 : index
    %138 = vector.load %arg21[%c0_92, %c0_93, %c0_94] : memref<2x1x256xf32, #tpu.memory_space<vmem>>, vector<1x1x256xf32>
    %139 = vector.shape_cast %138 : vector<1x1x256xf32> to vector<1x256xf32>
    %140 = vector.broadcast %139 : vector<1x256xf32> to vector<8x256xf32>
    %141 = arith.addf %137, %140 : vector<8x256xf32>
    %cst_95 = arith.constant 0.636619746 : f32
    %142 = math.sqrt %cst_95 : f32
    %cst_96 = arith.constant 5.000000e-01 : f32
    %143 = vector.broadcast %cst_96 : f32 to vector<8x256xf32>
    %144 = arith.mulf %143, %141 : vector<8x256xf32>
    %cst_97 = arith.constant 4.471500e-02 : f32
    %145 = vector.broadcast %cst_97 : f32 to vector<8x256xf32>
    %146 = arith.mulf %145, %141 : vector<8x256xf32>
    %147 = arith.mulf %146, %141 : vector<8x256xf32>
    %148 = arith.mulf %147, %141 : vector<8x256xf32>
    %149 = arith.addf %141, %148 : vector<8x256xf32>
    %150 = vector.broadcast %142 : f32 to vector<8x256xf32>
    %151 = arith.mulf %150, %149 : vector<8x256xf32>
    %152 = math.tanh %151 : vector<8x256xf32>
    %cst_98 = arith.constant 1.000000e+00 : f32
    %153 = vector.broadcast %cst_98 : f32 to vector<8x256xf32>
    %154 = arith.addf %153, %152 : vector<8x256xf32>
    %155 = arith.mulf %144, %154 : vector<8x256xf32>
    %c0_99 = arith.constant 0 : index
    %c0_100 = arith.constant 0 : index
    %c0_101 = arith.constant 0 : index
    %156 = vector.load %arg22[%c0_99, %c0_100, %c0_101] : memref<2x256x128xf32, #tpu.memory_space<vmem>>, vector<1x256x128xf32>
    %157 = vector.shape_cast %156 : vector<1x256x128xf32> to vector<256x128xf32>
    %cst_102 = arith.constant dense<0.000000e+00> : vector<8x128xf32>
    %158 = tpu.matmul %155, %157, %cst_102 {dimension_numbers = #tpu.dot_dimension_numbers<[1], [0], [0], [1], [0, 0, 1, 1], [], []>} : vector<8x256xf32>, vector<256x128xf32>, vector<8x128xf32> -> vector<8x128xf32>
    %159 = arith.addf %118, %158 : vector<8x128xf32>
    %c0_103 = arith.constant 0 : index
    %c0_104 = arith.constant 0 : index
    %c0_105 = arith.constant 0 : index
    %160 = vector.load %arg23[%c0_103, %c0_104, %c0_105] : memref<2x1x128xf32, #tpu.memory_space<vmem>>, vector<1x1x128xf32>
    %161 = vector.shape_cast %160 : vector<1x1x128xf32> to vector<1x128xf32>
    %162 = vector.broadcast %161 : vector<1x128xf32> to vector<8x128xf32>
    %163 = arith.addf %159, %162 : vector<8x128xf32>
    %c1_106 = arith.constant 1 : index
    %c0_107 = arith.constant 0 : index
    %c0_108 = arith.constant 0 : index
    %164 = vector.load %arg8[%c1_106, %c0_107, %c0_108] : memref<2x1x128xf32, #tpu.memory_space<vmem>>, vector<1x1x128xf32>
    %165 = vector.shape_cast %164 : vector<1x1x128xf32> to vector<1x128xf32>
    %c1_109 = arith.constant 1 : index
    %c0_110 = arith.constant 0 : index
    %c0_111 = arith.constant 0 : index
    %166 = vector.load %arg9[%c1_109, %c0_110, %c0_111] : memref<2x1x128xf32, #tpu.memory_space<vmem>>, vector<1x1x128xf32>
    %167 = vector.shape_cast %166 : vector<1x1x128xf32> to vector<1x128xf32>
    %cst_112 = arith.constant dense<0.000000e+00> : vector<8x128xf32>
    %168 = tpu.matmul %163, %0, %cst_112 {dimension_numbers = #tpu.dot_dimension_numbers<[1], [0], [0], [1], [0, 0, 1, 1], [], []>} : vector<8x128xf32>, vector<128x128xf32>, vector<8x128xf32> -> vector<8x128xf32>
    %169 = arith.subf %163, %168 : vector<8x128xf32>
    %170 = arith.mulf %169, %169 : vector<8x128xf32>
    %cst_113 = arith.constant dense<0.000000e+00> : vector<8x128xf32>
    %171 = tpu.matmul %170, %0, %cst_113 {dimension_numbers = #tpu.dot_dimension_numbers<[1], [0], [0], [1], [0, 0, 1, 1], [], []>} : vector<8x128xf32>, vector<128x128xf32>, vector<8x128xf32> -> vector<8x128xf32>
    %cst_114 = arith.constant 9.99999997E-7 : f32
    %172 = vector.broadcast %cst_114 : f32 to vector<8x128xf32>
    %173 = arith.addf %171, %172 : vector<8x128xf32>
    %174 = math.rsqrt %173 : vector<8x128xf32>
    %175 = arith.mulf %169, %174 : vector<8x128xf32>
    %176 = vector.broadcast %165 : vector<1x128xf32> to vector<8x128xf32>
    %177 = arith.mulf %175, %176 : vector<8x128xf32>
    %178 = vector.broadcast %167 : vector<1x128xf32> to vector<8x128xf32>
    %179 = arith.addf %177, %178 : vector<8x128xf32>
    %c1_115 = arith.constant 1 : index
    %c0_116 = arith.constant 0 : index
    %c0_117 = arith.constant 0 : index
    %180 = vector.load %arg10[%c1_115, %c0_116, %c0_117] : memref<2x128x128xf32, #tpu.memory_space<vmem>>, vector<1x128x128xf32>
    %181 = vector.shape_cast %180 : vector<1x128x128xf32> to vector<128x128xf32>
    %cst_118 = arith.constant dense<0.000000e+00> : vector<8x128xf32>
    %182 = tpu.matmul %179, %181, %cst_118 {dimension_numbers = #tpu.dot_dimension_numbers<[1], [0], [0], [1], [0, 0, 1, 1], [], []>} : vector<8x128xf32>, vector<128x128xf32>, vector<8x128xf32> -> vector<8x128xf32>
    %c1_119 = arith.constant 1 : index
    %c0_120 = arith.constant 0 : index
    %c0_121 = arith.constant 0 : index
    %183 = vector.load %arg11[%c1_119, %c0_120, %c0_121] : memref<2x1x128xf32, #tpu.memory_space<vmem>>, vector<1x1x128xf32>
    %184 = vector.shape_cast %183 : vector<1x1x128xf32> to vector<1x128xf32>
    %185 = vector.broadcast %184 : vector<1x128xf32> to vector<8x128xf32>
    %186 = arith.addf %182, %185 : vector<8x128xf32>
    %c1_122 = arith.constant 1 : index
    %c0_123 = arith.constant 0 : index
    %c0_124 = arith.constant 0 : index
    %187 = vector.load %arg12[%c1_122, %c0_123, %c0_124] : memref<2x128x128xf32, #tpu.memory_space<vmem>>, vector<1x128x128xf32>
    %188 = vector.shape_cast %187 : vector<1x128x128xf32> to vector<128x128xf32>
    %cst_125 = arith.constant dense<0.000000e+00> : vector<8x128xf32>
    %189 = tpu.matmul %179, %188, %cst_125 {dimension_numbers = #tpu.dot_dimension_numbers<[1], [0], [0], [1], [0, 0, 1, 1], [], []>} : vector<8x128xf32>, vector<128x128xf32>, vector<8x128xf32> -> vector<8x128xf32>
    %c1_126 = arith.constant 1 : index
    %c0_127 = arith.constant 0 : index
    %c0_128 = arith.constant 0 : index
    %190 = vector.load %arg13[%c1_126, %c0_127, %c0_128] : memref<2x1x128xf32, #tpu.memory_space<vmem>>, vector<1x1x128xf32>
    %191 = vector.shape_cast %190 : vector<1x1x128xf32> to vector<1x128xf32>
    %192 = vector.broadcast %191 : vector<1x128xf32> to vector<8x128xf32>
    %193 = arith.addf %189, %192 : vector<8x128xf32>
    %c1_129 = arith.constant 1 : index
    %c0_130 = arith.constant 0 : index
    %c0_131 = arith.constant 0 : index
    %194 = vector.load %arg14[%c1_129, %c0_130, %c0_131] : memref<2x128x128xf32, #tpu.memory_space<vmem>>, vector<1x128x128xf32>
    %195 = vector.shape_cast %194 : vector<1x128x128xf32> to vector<128x128xf32>
    %cst_132 = arith.constant dense<0.000000e+00> : vector<8x128xf32>
    %196 = tpu.matmul %179, %195, %cst_132 {dimension_numbers = #tpu.dot_dimension_numbers<[1], [0], [0], [1], [0, 0, 1, 1], [], []>} : vector<8x128xf32>, vector<128x128xf32>, vector<8x128xf32> -> vector<8x128xf32>
    %c1_133 = arith.constant 1 : index
    %c0_134 = arith.constant 0 : index
    %c0_135 = arith.constant 0 : index
    %197 = vector.load %arg15[%c1_133, %c0_134, %c0_135] : memref<2x1x128xf32, #tpu.memory_space<vmem>>, vector<1x1x128xf32>
    %198 = vector.shape_cast %197 : vector<1x1x128xf32> to vector<1x128xf32>
    %199 = vector.broadcast %198 : vector<1x128xf32> to vector<8x128xf32>
    %200 = arith.addf %196, %199 : vector<8x128xf32>
    %c0_136 = arith.constant 0 : index
    %c0_137 = arith.constant 0 : index
    %c0_138 = arith.constant 0 : index
    %201 = vector.load %arg5[%c0_136, %c0_137, %c0_138] : memref<4x128x128xf32, #tpu.memory_space<vmem>>, vector<1x128x128xf32>
    %202 = vector.shape_cast %201 : vector<1x128x128xf32> to vector<128x128xf32>
    %cst_139 = arith.constant dense<0.000000e+00> : vector<8x128xf32>
    %203 = tpu.matmul %193, %202, %cst_139 {dimension_numbers = #tpu.dot_dimension_numbers<[1], [0], [0], [1], [0, 0, 1, 1], [], []>} : vector<8x128xf32>, vector<128x128xf32>, vector<8x128xf32> -> vector<8x128xf32>
    %cst_140 = arith.constant dense<0.000000e+00> : vector<8x128xf32>
    %204 = tpu.matmul %200, %202, %cst_140 {dimension_numbers = #tpu.dot_dimension_numbers<[1], [0], [0], [1], [0, 0, 1, 1], [], []>} : vector<8x128xf32>, vector<128x128xf32>, vector<8x128xf32> -> vector<8x128xf32>
    %205 = arith.mulf %186, %203 : vector<8x128xf32>
    %cst_141 = arith.constant dense<0.000000e+00> : vector<8x16xf32>
    %206 = tpu.matmul %205, %1, %cst_141 {dimension_numbers = #tpu.dot_dimension_numbers<[1], [0], [0], [1], [0, 0, 1, 1], [], []>} : vector<8x128xf32>, vector<128x16xf32>, vector<8x16xf32> -> vector<8x16xf32>
    %cst_142 = arith.constant 0.353553385 : f32
    %207 = vector.broadcast %cst_142 : f32 to vector<8x16xf32>
    %208 = arith.mulf %206, %207 : vector<8x16xf32>
    %c1_143 = arith.constant 1 : index
    %c0_144 = arith.constant 0 : index
    %c0_145 = arith.constant 0 : index
    %209 = vector.load %arg5[%c1_143, %c0_144, %c0_145] : memref<4x128x128xf32, #tpu.memory_space<vmem>>, vector<1x128x128xf32>
    %210 = vector.shape_cast %209 : vector<1x128x128xf32> to vector<128x128xf32>
    %cst_146 = arith.constant dense<0.000000e+00> : vector<8x128xf32>
    %211 = tpu.matmul %193, %210, %cst_146 {dimension_numbers = #tpu.dot_dimension_numbers<[1], [0], [0], [1], [0, 0, 1, 1], [], []>} : vector<8x128xf32>, vector<128x128xf32>, vector<8x128xf32> -> vector<8x128xf32>
    %cst_147 = arith.constant dense<0.000000e+00> : vector<8x128xf32>
    %212 = tpu.matmul %200, %210, %cst_147 {dimension_numbers = #tpu.dot_dimension_numbers<[1], [0], [0], [1], [0, 0, 1, 1], [], []>} : vector<8x128xf32>, vector<128x128xf32>, vector<8x128xf32> -> vector<8x128xf32>
    %213 = arith.mulf %186, %211 : vector<8x128xf32>
    %cst_148 = arith.constant dense<0.000000e+00> : vector<8x16xf32>
    %214 = tpu.matmul %213, %1, %cst_148 {dimension_numbers = #tpu.dot_dimension_numbers<[1], [0], [0], [1], [0, 0, 1, 1], [], []>} : vector<8x128xf32>, vector<128x16xf32>, vector<8x16xf32> -> vector<8x16xf32>
    %cst_149 = arith.constant 0.353553385 : f32
    %215 = vector.broadcast %cst_149 : f32 to vector<8x16xf32>
    %216 = arith.mulf %214, %215 : vector<8x16xf32>
    %c2_150 = arith.constant 2 : index
    %c0_151 = arith.constant 0 : index
    %c0_152 = arith.constant 0 : index
    %217 = vector.load %arg5[%c2_150, %c0_151, %c0_152] : memref<4x128x128xf32, #tpu.memory_space<vmem>>, vector<1x128x128xf32>
    %218 = vector.shape_cast %217 : vector<1x128x128xf32> to vector<128x128xf32>
    %cst_153 = arith.constant dense<0.000000e+00> : vector<8x128xf32>
    %219 = tpu.matmul %193, %218, %cst_153 {dimension_numbers = #tpu.dot_dimension_numbers<[1], [0], [0], [1], [0, 0, 1, 1], [], []>} : vector<8x128xf32>, vector<128x128xf32>, vector<8x128xf32> -> vector<8x128xf32>
    %cst_154 = arith.constant dense<0.000000e+00> : vector<8x128xf32>
    %220 = tpu.matmul %200, %218, %cst_154 {dimension_numbers = #tpu.dot_dimension_numbers<[1], [0], [0], [1], [0, 0, 1, 1], [], []>} : vector<8x128xf32>, vector<128x128xf32>, vector<8x128xf32> -> vector<8x128xf32>
    %221 = arith.mulf %186, %219 : vector<8x128xf32>
    %cst_155 = arith.constant dense<0.000000e+00> : vector<8x16xf32>
    %222 = tpu.matmul %221, %1, %cst_155 {dimension_numbers = #tpu.dot_dimension_numbers<[1], [0], [0], [1], [0, 0, 1, 1], [], []>} : vector<8x128xf32>, vector<128x16xf32>, vector<8x16xf32> -> vector<8x16xf32>
    %cst_156 = arith.constant 0.353553385 : f32
    %223 = vector.broadcast %cst_156 : f32 to vector<8x16xf32>
    %224 = arith.mulf %222, %223 : vector<8x16xf32>
    %c3_157 = arith.constant 3 : index
    %c0_158 = arith.constant 0 : index
    %c0_159 = arith.constant 0 : index
    %225 = vector.load %arg5[%c3_157, %c0_158, %c0_159] : memref<4x128x128xf32, #tpu.memory_space<vmem>>, vector<1x128x128xf32>
    %226 = vector.shape_cast %225 : vector<1x128x128xf32> to vector<128x128xf32>
    %cst_160 = arith.constant dense<0.000000e+00> : vector<8x128xf32>
    %227 = tpu.matmul %193, %226, %cst_160 {dimension_numbers = #tpu.dot_dimension_numbers<[1], [0], [0], [1], [0, 0, 1, 1], [], []>} : vector<8x128xf32>, vector<128x128xf32>, vector<8x128xf32> -> vector<8x128xf32>
    %cst_161 = arith.constant dense<0.000000e+00> : vector<8x128xf32>
    %228 = tpu.matmul %200, %226, %cst_161 {dimension_numbers = #tpu.dot_dimension_numbers<[1], [0], [0], [1], [0, 0, 1, 1], [], []>} : vector<8x128xf32>, vector<128x128xf32>, vector<8x128xf32> -> vector<8x128xf32>
    %229 = arith.mulf %186, %227 : vector<8x128xf32>
    %cst_162 = arith.constant dense<0.000000e+00> : vector<8x16xf32>
    %230 = tpu.matmul %229, %1, %cst_162 {dimension_numbers = #tpu.dot_dimension_numbers<[1], [0], [0], [1], [0, 0, 1, 1], [], []>} : vector<8x128xf32>, vector<128x16xf32>, vector<8x16xf32> -> vector<8x16xf32>
    %cst_163 = arith.constant 0.353553385 : f32
    %231 = vector.broadcast %cst_163 : f32 to vector<8x16xf32>
    %232 = arith.mulf %230, %231 : vector<8x16xf32>
    %233 = arith.maximumf %208, %216 : vector<8x16xf32>
    %234 = arith.maximumf %233, %224 : vector<8x16xf32>
    %235 = arith.maximumf %234, %232 : vector<8x16xf32>
    %236 = arith.subf %208, %235 : vector<8x16xf32>
    %237 = math.exp %236 : vector<8x16xf32>
    %238 = arith.subf %216, %235 : vector<8x16xf32>
    %239 = math.exp %238 : vector<8x16xf32>
    %240 = arith.subf %224, %235 : vector<8x16xf32>
    %241 = math.exp %240 : vector<8x16xf32>
    %242 = arith.subf %232, %235 : vector<8x16xf32>
    %243 = math.exp %242 : vector<8x16xf32>
    %244 = arith.addf %237, %239 : vector<8x16xf32>
    %245 = arith.addf %244, %241 : vector<8x16xf32>
    %246 = arith.addf %245, %243 : vector<8x16xf32>
    %cst_164 = arith.constant 1.000000e+00 : f32
    %247 = vector.broadcast %cst_164 : f32 to vector<8x16xf32>
    %248 = arith.divf %247, %246 : vector<8x16xf32>
    %cst_165 = arith.constant 0.000000e+00 : f32
    %249 = vector.broadcast %cst_165 : f32 to vector<8x128xf32>
    %250 = arith.mulf %237, %248 : vector<8x16xf32>
    %cst_166 = arith.constant dense<0.000000e+00> : vector<8x128xf32>
    %251 = tpu.matmul %250, %2, %cst_166 {dimension_numbers = #tpu.dot_dimension_numbers<[1], [0], [0], [1], [0, 0, 1, 1], [], []>} : vector<8x16xf32>, vector<16x128xf32>, vector<8x128xf32> -> vector<8x128xf32>
    %252 = arith.mulf %251, %204 : vector<8x128xf32>
    %253 = arith.addf %249, %252 : vector<8x128xf32>
    %254 = arith.mulf %239, %248 : vector<8x16xf32>
    %cst_167 = arith.constant dense<0.000000e+00> : vector<8x128xf32>
    %255 = tpu.matmul %254, %2, %cst_167 {dimension_numbers = #tpu.dot_dimension_numbers<[1], [0], [0], [1], [0, 0, 1, 1], [], []>} : vector<8x16xf32>, vector<16x128xf32>, vector<8x128xf32> -> vector<8x128xf32>
    %256 = arith.mulf %255, %212 : vector<8x128xf32>
    %257 = arith.addf %253, %256 : vector<8x128xf32>
    %258 = arith.mulf %241, %248 : vector<8x16xf32>
    %cst_168 = arith.constant dense<0.000000e+00> : vector<8x128xf32>
    %259 = tpu.matmul %258, %2, %cst_168 {dimension_numbers = #tpu.dot_dimension_numbers<[1], [0], [0], [1], [0, 0, 1, 1], [], []>} : vector<8x16xf32>, vector<16x128xf32>, vector<8x128xf32> -> vector<8x128xf32>
    %260 = arith.mulf %259, %220 : vector<8x128xf32>
    %261 = arith.addf %257, %260 : vector<8x128xf32>
    %262 = arith.mulf %243, %248 : vector<8x16xf32>
    %cst_169 = arith.constant dense<0.000000e+00> : vector<8x128xf32>
    %263 = tpu.matmul %262, %2, %cst_169 {dimension_numbers = #tpu.dot_dimension_numbers<[1], [0], [0], [1], [0, 0, 1, 1], [], []>} : vector<8x16xf32>, vector<16x128xf32>, vector<8x128xf32> -> vector<8x128xf32>
    %264 = arith.mulf %263, %228 : vector<8x128xf32>
    %265 = arith.addf %261, %264 : vector<8x128xf32>
    %c1_170 = arith.constant 1 : index
    %c0_171 = arith.constant 0 : index
    %c0_172 = arith.constant 0 : index
    %266 = vector.load %arg16[%c1_170, %c0_171, %c0_172] : memref<2x128x128xf32, #tpu.memory_space<vmem>>, vector<1x128x128xf32>
    %267 = vector.shape_cast %266 : vector<1x128x128xf32> to vector<128x128xf32>
    %cst_173 = arith.constant dense<0.000000e+00> : vector<8x128xf32>
    %268 = tpu.matmul %265, %267, %cst_173 {dimension_numbers = #tpu.dot_dimension_numbers<[1], [0], [0], [1], [0, 0, 1, 1], [], []>} : vector<8x128xf32>, vector<128x128xf32>, vector<8x128xf32> -> vector<8x128xf32>
    %269 = arith.addf %163, %268 : vector<8x128xf32>
    %c1_174 = arith.constant 1 : index
    %c0_175 = arith.constant 0 : index
    %c0_176 = arith.constant 0 : index
    %270 = vector.load %arg17[%c1_174, %c0_175, %c0_176] : memref<2x1x128xf32, #tpu.memory_space<vmem>>, vector<1x1x128xf32>
    %271 = vector.shape_cast %270 : vector<1x1x128xf32> to vector<1x128xf32>
    %272 = vector.broadcast %271 : vector<1x128xf32> to vector<8x128xf32>
    %273 = arith.addf %269, %272 : vector<8x128xf32>
    %c1_177 = arith.constant 1 : index
    %c0_178 = arith.constant 0 : index
    %c0_179 = arith.constant 0 : index
    %274 = vector.load %arg18[%c1_177, %c0_178, %c0_179] : memref<2x1x128xf32, #tpu.memory_space<vmem>>, vector<1x1x128xf32>
    %275 = vector.shape_cast %274 : vector<1x1x128xf32> to vector<1x128xf32>
    %c1_180 = arith.constant 1 : index
    %c0_181 = arith.constant 0 : index
    %c0_182 = arith.constant 0 : index
    %276 = vector.load %arg19[%c1_180, %c0_181, %c0_182] : memref<2x1x128xf32, #tpu.memory_space<vmem>>, vector<1x1x128xf32>
    %277 = vector.shape_cast %276 : vector<1x1x128xf32> to vector<1x128xf32>
    %cst_183 = arith.constant dense<0.000000e+00> : vector<8x128xf32>
    %278 = tpu.matmul %273, %0, %cst_183 {dimension_numbers = #tpu.dot_dimension_numbers<[1], [0], [0], [1], [0, 0, 1, 1], [], []>} : vector<8x128xf32>, vector<128x128xf32>, vector<8x128xf32> -> vector<8x128xf32>
    %279 = arith.subf %273, %278 : vector<8x128xf32>
    %280 = arith.mulf %279, %279 : vector<8x128xf32>
    %cst_184 = arith.constant dense<0.000000e+00> : vector<8x128xf32>
    %281 = tpu.matmul %280, %0, %cst_184 {dimension_numbers = #tpu.dot_dimension_numbers<[1], [0], [0], [1], [0, 0, 1, 1], [], []>} : vector<8x128xf32>, vector<128x128xf32>, vector<8x128xf32> -> vector<8x128xf32>
    %cst_185 = arith.constant 9.99999997E-7 : f32
    %282 = vector.broadcast %cst_185 : f32 to vector<8x128xf32>
    %283 = arith.addf %281, %282 : vector<8x128xf32>
    %284 = math.rsqrt %283 : vector<8x128xf32>
    %285 = arith.mulf %279, %284 : vector<8x128xf32>
    %286 = vector.broadcast %275 : vector<1x128xf32> to vector<8x128xf32>
    %287 = arith.mulf %285, %286 : vector<8x128xf32>
    %288 = vector.broadcast %277 : vector<1x128xf32> to vector<8x128xf32>
    %289 = arith.addf %287, %288 : vector<8x128xf32>
    %c1_186 = arith.constant 1 : index
    %c0_187 = arith.constant 0 : index
    %c0_188 = arith.constant 0 : index
    %290 = vector.load %arg20[%c1_186, %c0_187, %c0_188] : memref<2x128x256xf32, #tpu.memory_space<vmem>>, vector<1x128x256xf32>
    %291 = vector.shape_cast %290 : vector<1x128x256xf32> to vector<128x256xf32>
    %cst_189 = arith.constant dense<0.000000e+00> : vector<8x256xf32>
    %292 = tpu.matmul %289, %291, %cst_189 {dimension_numbers = #tpu.dot_dimension_numbers<[1], [0], [0], [1], [0, 0, 1, 1], [], []>} : vector<8x128xf32>, vector<128x256xf32>, vector<8x256xf32> -> vector<8x256xf32>
    %c1_190 = arith.constant 1 : index
    %c0_191 = arith.constant 0 : index
    %c0_192 = arith.constant 0 : index
    %293 = vector.load %arg21[%c1_190, %c0_191, %c0_192] : memref<2x1x256xf32, #tpu.memory_space<vmem>>, vector<1x1x256xf32>
    %294 = vector.shape_cast %293 : vector<1x1x256xf32> to vector<1x256xf32>
    %295 = vector.broadcast %294 : vector<1x256xf32> to vector<8x256xf32>
    %296 = arith.addf %292, %295 : vector<8x256xf32>
    %cst_193 = arith.constant 0.636619746 : f32
    %297 = math.sqrt %cst_193 : f32
    %cst_194 = arith.constant 5.000000e-01 : f32
    %298 = vector.broadcast %cst_194 : f32 to vector<8x256xf32>
    %299 = arith.mulf %298, %296 : vector<8x256xf32>
    %cst_195 = arith.constant 4.471500e-02 : f32
    %300 = vector.broadcast %cst_195 : f32 to vector<8x256xf32>
    %301 = arith.mulf %300, %296 : vector<8x256xf32>
    %302 = arith.mulf %301, %296 : vector<8x256xf32>
    %303 = arith.mulf %302, %296 : vector<8x256xf32>
    %304 = arith.addf %296, %303 : vector<8x256xf32>
    %305 = vector.broadcast %297 : f32 to vector<8x256xf32>
    %306 = arith.mulf %305, %304 : vector<8x256xf32>
    %307 = math.tanh %306 : vector<8x256xf32>
    %cst_196 = arith.constant 1.000000e+00 : f32
    %308 = vector.broadcast %cst_196 : f32 to vector<8x256xf32>
    %309 = arith.addf %308, %307 : vector<8x256xf32>
    %310 = arith.mulf %299, %309 : vector<8x256xf32>
    %c1_197 = arith.constant 1 : index
    %c0_198 = arith.constant 0 : index
    %c0_199 = arith.constant 0 : index
    %311 = vector.load %arg22[%c1_197, %c0_198, %c0_199] : memref<2x256x128xf32, #tpu.memory_space<vmem>>, vector<1x256x128xf32>
    %312 = vector.shape_cast %311 : vector<1x256x128xf32> to vector<256x128xf32>
    %cst_200 = arith.constant dense<0.000000e+00> : vector<8x128xf32>
    %313 = tpu.matmul %310, %312, %cst_200 {dimension_numbers = #tpu.dot_dimension_numbers<[1], [0], [0], [1], [0, 0, 1, 1], [], []>} : vector<8x256xf32>, vector<256x128xf32>, vector<8x128xf32> -> vector<8x128xf32>
    %314 = arith.addf %273, %313 : vector<8x128xf32>
    %c1_201 = arith.constant 1 : index
    %c0_202 = arith.constant 0 : index
    %c0_203 = arith.constant 0 : index
    %315 = vector.load %arg23[%c1_201, %c0_202, %c0_203] : memref<2x1x128xf32, #tpu.memory_space<vmem>>, vector<1x1x128xf32>
    %316 = vector.shape_cast %315 : vector<1x1x128xf32> to vector<1x128xf32>
    %317 = vector.broadcast %316 : vector<1x128xf32> to vector<8x128xf32>
    %318 = arith.addf %314, %317 : vector<8x128xf32>
    %c0_204 = arith.constant 0 : index
    %c0_205 = arith.constant 0 : index
    %319 = vector.load %arg24[%c0_204, %c0_205] : memref<8x128xf32, #tpu.memory_space<vmem>>, vector<8x128xf32>
    tpu.vector_store %arg24[%c0_204, %c0_205], %318 {strides = array<i32>} : memref<8x128xf32, #tpu.memory_space<vmem>>, vector<8x128xf32>,
    return
  }
  func.func @transform_0(%arg0: i32) -> (i32, i32) {
    %c0_i32 = arith.constant 0 : i32
    %c0_i32_0 = arith.constant 0 : i32
    return %arg0, %c0_i32 : i32, i32
  }
  func.func @transform_1(%arg0: i32) -> (i32, i32) {
    %c0_i32 = arith.constant 0 : i32
    %c0_i32_0 = arith.constant 0 : i32
    %c0_i32_1 = arith.constant 0 : i32
    return %c0_i32, %c0_i32_0 : i32, i32
  }
  func.func @transform_2(%arg0: i32) -> (i32, i32) {
    %c0_i32 = arith.constant 0 : i32
    %c0_i32_0 = arith.constant 0 : i32
    %c0_i32_1 = arith.constant 0 : i32
    return %c0_i32, %c0_i32_0 : i32, i32
  }
  func.func @transform_3(%arg0: i32) -> (i32, i32) {
    %c0_i32 = arith.constant 0 : i32
    %c0_i32_0 = arith.constant 0 : i32
    %c0_i32_1 = arith.constant 0 : i32
    return %c0_i32, %c0_i32_0 : i32, i32
  }
  func.func @transform_4(%arg0: i32) -> (i32, i32, i32) {
    %c0_i32 = arith.constant 0 : i32
    %c0_i32_0 = arith.constant 0 : i32
    %c0_i32_1 = arith.constant 0 : i32
    %c0_i32_2 = arith.constant 0 : i32
    return %c0_i32, %c0_i32_0, %c0_i32_1 : i32, i32, i32
  }
  func.func @transform_5(%arg0: i32) -> (i32, i32) {
    %c0_i32 = arith.constant 0 : i32
    %c0_i32_0 = arith.constant 0 : i32
    %c0_i32_1 = arith.constant 0 : i32
    return %c0_i32, %c0_i32_0 : i32, i32
  }
  func.func @transform_6(%arg0: i32) -> (i32, i32) {
    %c0_i32 = arith.constant 0 : i32
    %c0_i32_0 = arith.constant 0 : i32
    %c0_i32_1 = arith.constant 0 : i32
    return %c0_i32, %c0_i32_0 : i32, i32
  }
  func.func @transform_7(%arg0: i32) -> (i32, i32, i32) {
    %c0_i32 = arith.constant 0 : i32
    %c0_i32_0 = arith.constant 0 : i32
    %c0_i32_1 = arith.constant 0 : i32
    %c0_i32_2 = arith.constant 0 : i32
    return %c0_i32, %c0_i32_0, %c0_i32_1 : i32, i32, i32
  }
  func.func @transform_8(%arg0: i32) -> (i32, i32, i32) {
    %c0_i32 = arith.constant 0 : i32
    %c0_i32_0 = arith.constant 0 : i32
    %c0_i32_1 = arith.constant 0 : i32
    %c0_i32_2 = arith.constant 0 : i32
    return %c0_i32, %c0_i32_0, %c0_i32_1 : i32, i32, i32
  }
  func.func @transform_9(%arg0: i32) -> (i32, i32, i32) {
    %c0_i32 = arith.constant 0 : i32
    %c0_i32_0 = arith.constant 0 : i32
    %c0_i32_1 = arith.constant 0 : i32
    %c0_i32_2 = arith.constant 0 : i32
    return %c0_i32, %c0_i32_0, %c0_i32_1 : i32, i32, i32
  }
  func.func @transform_10(%arg0: i32) -> (i32, i32, i32) {
    %c0_i32 = arith.constant 0 : i32
    %c0_i32_0 = arith.constant 0 : i32
    %c0_i32_1 = arith.constant 0 : i32
    %c0_i32_2 = arith.constant 0 : i32
    return %c0_i32, %c0_i32_0, %c0_i32_1 : i32, i32, i32
  }
  func.func @transform_11(%arg0: i32) -> (i32, i32, i32) {
    %c0_i32 = arith.constant 0 : i32
    %c0_i32_0 = arith.constant 0 : i32
    %c0_i32_1 = arith.constant 0 : i32
    %c0_i32_2 = arith.constant 0 : i32
    return %c0_i32, %c0_i32_0, %c0_i32_1 : i32, i32, i32
  }
  func.func @transform_12(%arg0: i32) -> (i32, i32, i32) {
    %c0_i32 = arith.constant 0 : i32
    %c0_i32_0 = arith.constant 0 : i32
    %c0_i32_1 = arith.constant 0 : i32
    %c0_i32_2 = arith.constant 0 : i32
    return %c0_i32, %c0_i32_0, %c0_i32_1 : i32, i32, i32
  }
  func.func @transform_13(%arg0: i32) -> (i32, i32, i32) {
    %c0_i32 = arith.constant 0 : i32
    %c0_i32_0 = arith.constant 0 : i32
    %c0_i32_1 = arith.constant 0 : i32
    %c0_i32_2 = arith.constant 0 : i32
    return %c0_i32, %c0_i32_0, %c0_i32_1 : i32, i32, i32
  }
  func.func @transform_14(%arg0: i32) -> (i32, i32, i32) {
    %c0_i32 = arith.constant 0 : i32
    %c0_i32_0 = arith.constant 0 : i32
    %c0_i32_1 = arith.constant 0 : i32
    %c0_i32_2 = arith.constant 0 : i32
    return %c0_i32, %c0_i32_0, %c0_i32_1 : i32, i32, i32
  }
  func.func @transform_15(%arg0: i32) -> (i32, i32, i32) {
    %c0_i32 = arith.constant 0 : i32
    %c0_i32_0 = arith.constant 0 : i32
    %c0_i32_1 = arith.constant 0 : i32
    %c0_i32_2 = arith.constant 0 : i32
    return %c0_i32, %c0_i32_0, %c0_i32_1 : i32, i32, i32
  }
  func.func @transform_16(%arg0: i32) -> (i32, i32, i32) {
    %c0_i32 = arith.constant 0 : i32
    %c0_i32_0 = arith.constant 0 : i32
    %c0_i32_1 = arith.constant 0 : i32
    %c0_i32_2 = arith.constant 0 : i32
    return %c0_i32, %c0_i32_0, %c0_i32_1 : i32, i32, i32
  }
  func.func @transform_17(%arg0: i32) -> (i32, i32, i32) {
    %c0_i32 = arith.constant 0 : i32
    %c0_i32_0 = arith.constant 0 : i32
    %c0_i32_1 = arith.constant 0 : i32
    %c0_i32_2 = arith.constant 0 : i32
    return %c0_i32, %c0_i32_0, %c0_i32_1 : i32, i32, i32
  }
  func.func @transform_18(%arg0: i32) -> (i32, i32, i32) {
    %c0_i32 = arith.constant 0 : i32
    %c0_i32_0 = arith.constant 0 : i32
    %c0_i32_1 = arith.constant 0 : i32
    %c0_i32_2 = arith.constant 0 : i32
    return %c0_i32, %c0_i32_0, %c0_i32_1 : i32, i32, i32
  }
  func.func @transform_19(%arg0: i32) -> (i32, i32, i32) {
    %c0_i32 = arith.constant 0 : i32
    %c0_i32_0 = arith.constant 0 : i32
    %c0_i32_1 = arith.constant 0 : i32
    %c0_i32_2 = arith.constant 0 : i32
    return %c0_i32, %c0_i32_0, %c0_i32_1 : i32, i32, i32
  }
  func.func @transform_20(%arg0: i32) -> (i32, i32, i32) {
    %c0_i32 = arith.constant 0 : i32
    %c0_i32_0 = arith.constant 0 : i32
    %c0_i32_1 = arith.constant 0 : i32
    %c0_i32_2 = arith.constant 0 : i32
    return %c0_i32, %c0_i32_0, %c0_i32_1 : i32, i32, i32
  }
  func.func @transform_21(%arg0: i32) -> (i32, i32, i32) {
    %c0_i32 = arith.constant 0 : i32
    %c0_i32_0 = arith.constant 0 : i32
    %c0_i32_1 = arith.constant 0 : i32
    %c0_i32_2 = arith.constant 0 : i32
    return %c0_i32, %c0_i32_0, %c0_i32_1 : i32, i32, i32
  }
  func.func @transform_22(%arg0: i32) -> (i32, i32, i32) {
    %c0_i32 = arith.constant 0 : i32
    %c0_i32_0 = arith.constant 0 : i32
    %c0_i32_1 = arith.constant 0 : i32
    %c0_i32_2 = arith.constant 0 : i32
    return %c0_i32, %c0_i32_0, %c0_i32_1 : i32, i32, i32
  }
  func.func @transform_23(%arg0: i32) -> (i32, i32) {
    %c0_i32 = arith.constant 0 : i32
    %c0_i32_0 = arith.constant 0 : i32
    return %arg0, %c0_i32 : i32, i32
  }
}

</mosaic_0001>

<bundles_post_ra>
// kernel: _tower_chunk.1
= control target key start
LH: loop header
LB: loop body
LE: loop exit
PB: predicated region body
PF: predicated region fallthrough
CT: control target
= control target key end

     0   :  { %vm8532_vm0 = vmmov 0   ;;  %vm1802_vm1 = vcmask 130048   ;;  %s11013_s1 = inlined_call_operand.vmem [shape: f32[768,128], index: 1, kind: input, shape index: {}]   ;;  %s11014_s0 = inlined_call_operand.vmem [shape: f32[8,768], index: 0, kind: input, shape index: {}]   ;;  %s11015_s3 = inlined_call_operand.vmem [shape: f32[128,128], index: 3, kind: input, shape index: {}]   ;;  %s11016_s2 = inlined_call_operand.vmem [shape: f32[1,128], index: 2, kind: input, shape index: {}]   ;;  %s11017_s9 = inlined_call_operand.vmem [shape: f32[2,128,128], index: 9, kind: input, shape index: {}]   ;;  %s11018_s11 = inlined_call_operand.vmem [shape: f32[2,128,128], index: 11, kind: input, shape index: {}]   ;;  %s11019_s7 = inlined_call_operand.vmem [shape: f32[2,1,128], index: 7, kind: input, shape index: {}]   ;;  %s11020_s13 = inlined_call_operand.vmem [shape: f32[2,128,128], index: 13, kind: input, shape index: {}]   ;;  %s11021_s8 = inlined_call_operand.vmem [shape: f32[2,1,128], index: 8, kind: input, shape index: {}]   ;;  %s11022_s4 = inlined_call_operand.vmem [shape: f32[4,128,128], index: 4, kind: input, shape index: {}]   ;;  %s11023_s5 = inlined_call_operand.vmem [shape: f32[128,16], index: 5, kind: input, shape index: {}]   ;;  %s11024_s12 = inlined_call_operand.vmem [shape: f32[2,1,128], index: 12, kind: input, shape index: {}]   ;;  %s11025_s14 = inlined_call_operand.vmem [shape: f32[2,1,128], index: 14, kind: input, shape index: {}]   ;;  %s11026_s10 = inlined_call_operand.vmem [shape: f32[2,1,128], index: 10, kind: input, shape index: {}]   ;;  %s11027_s6 = inlined_call_operand.vmem [shape: f32[16,128], index: 6, kind: input, shape index: {}]   ;;  %s11028_s15 = inlined_call_operand.vmem [shape: f32[2,128,128], index: 15, kind: input, shape index: {}]   ;;  %s11029_s16 = inlined_call_operand.vmem [shape: f32[2,1,128], index: 16, kind: input, shape index: {}]   ;;  %s11030_s19 = inlined_call_operand.vmem [shape: f32[2,128,256], index: 19, kind: input, shape index: {}]   ;;  %s11031_s21 = inlined_call_operand.vmem [shape: f32[2,256,128], index: 21, kind: input, shape index: {}]   ;;  %s11032_s17 = inlined_call_operand.vmem [shape: f32[2,1,128], index: 17, kind: input, shape index: {}]   ;;  %s11033_s18 = inlined_call_operand.vmem [shape: f32[2,1,128], index: 18, kind: input, shape index: {}]   ;;  %s11034_s20 = inlined_call_operand.vmem [shape: f32[2,1,256], index: 20, kind: input, shape index: {}]   ;;  %s11035_s22 = inlined_call_operand.vmem [shape: f32[2,1,128], index: 22, kind: input, shape index: {}]   ;;  %s11036_s23 = inlined_call_operand.vmem [shape: f32[8,128], index: 23, kind: output, shape index: {}]  }
   0x1   :  { %11071 = sst [smem:[#allocation13_spill]] %s11013_s1 }
   0x2   :  { %11072 = sst [smem:[#allocation14_spill]] %s11014_s0  ;;  %s11079_s24 = sld [smem:[#allocation13_spill]] }
   0x3   :  { %11073 = sst [smem:[#allocation15_spill]] %s11015_s3  ;;  %s11080_s28 = sld [smem:[#allocation14_spill]] }
   0x4   :  { %11074 = sst [smem:[#allocation16_spill]] %s11016_s2  ;;  %s11081_s0 = sld [smem:[#allocation15_spill]] }
   0x5   :  { %11075 = sst [smem:[#allocation17_spill]] %s11017_s9 }
   0x6   :  { %11076 = sst [smem:[#allocation18_spill]] %s11018_s11 }
   0x7   :  { %11077 = sst [smem:[#allocation19_spill]] %s11019_s7  ;;  %s11082_s7 = sld [smem:[#allocation16_spill]] }
   0x8   :  { %11078 = sst [smem:[#allocation20_spill]] %s11020_s13  ;;  %v130_v0 = vld [vmem:[%s11079_s24 + $0x80] sm:$0xff]  ;;  %v131_v1 = vld [vmem:[%s11079_s24 + $0x88] sm:$0xff]  ;;  %v132_v11 = vld [vmem:[%s11079_s24 + $0x90] sm:$0xff]  ;;  %s11083_s13 = sld [smem:[#allocation17_spill]] }
   0x9   :  { %v114_v2 = vld [vmem:[%s11079_s24] sm:$0xff]  ;;  %v7284_v3 = vpack.c.bf16 %v131_v1, %v130_v0  ;;  %v115_v4 = vld [vmem:[%s11079_s24 + $0x8] sm:$0xff]  ;;  %v133_v13 = vld [vmem:[%s11079_s24 + $0x98] sm:$0xff]  ;;  %s11084_s27 = sld [smem:[#allocation18_spill]]  ;;  %s11086_s1 = sld [smem:[#allocation20_spill]] }
   0xa   :  { %v162_v5 = vld [vmem:[%s11079_s24 + $0x180] sm:$0xff]  ;;  %v163_v6 = vld [vmem:[%s11079_s24 + $0x188] sm:$0xff]  ;;  %v7286_v7 = vpack.c.bf16 %v115_v4, %v114_v2  ;;  %v116_v14 = vld [vmem:[%s11079_s24 + $0x10] sm:$0xff]  ;;  %v7288_v16 = vpack.c.bf16 %v133_v13, %v132_v11 }
   0xb   :  { %v7316_v8 = vpack.c.bf16 %v163_v6, %v162_v5  ;;  %v146_v9 = vld [vmem:[%s11079_s24 + $0x100] sm:$0xff]  ;;  %v147_v10 = vld [vmem:[%s11079_s24 + $0x108] sm:$0xff]  ;;  %7285 = vmatprep.subr.bf16.mxu0 %v7284_v3  ;;  %v117_v15 = vld [vmem:[%s11079_s24 + $0x18] sm:$0xff] }
   0xc   :  { %v7318_v12 = vpack.c.bf16 %v147_v10, %v146_v9  ;;  %7287 = vmatpush3.bf16.msra.mxu0 %v7286_v7  ;;  %v7290_v17 = vpack.c.bf16 %v117_v15, %v116_v14  ;;  %v164_v18 = vld [vmem:[%s11079_s24 + $0x190] sm:$0xff]  ;;  %v165_v19 = vld [vmem:[%s11079_s24 + $0x198] sm:$0xff]  ;;  %v134_v23 = vld [vmem:[%s11079_s24 + $0xa0] sm:$0xff] }
   0xd   :  { %7317 = vmatprep.subr.bf16.mxu1 %v7316_v8  ;;  %v148_v20 = vld [vmem:[%s11079_s24 + $0x110] sm:$0xff]  ;;  %v7320_v21 = vpack.c.bf16 %v165_v19, %v164_v18  ;;  %v149_v22 = vld [vmem:[%s11079_s24 + $0x118] sm:$0xff]  ;;  %v135_v24 = vld [vmem:[%s11079_s24 + $0xa8] sm:$0xff]  ;;  %7289 = vmatprep.subr.bf16.mxu0 %v7288_v16 }
   0xe   :  { %7319 = vmatpush3.bf16.msra.mxu1 %v7318_v12  ;;  %v7322_v25 = vpack.c.bf16 %v149_v22, %v148_v20  ;;  %v7292_v26 = vpack.c.bf16 %v135_v24, %v134_v23  ;;  %v118_v27 = vld [vmem:[%s11079_s24 + $0x20] sm:$0xff]  ;;  %v119_v28 = vld [vmem:[%s11079_s24 + $0x28] sm:$0xff]  ;;  %v136_v35 = vld [vmem:[%s11079_s24 + $0xb0] sm:$0xff] }
   0xf   :  { %v166_v29 = vld [vmem:[%s11079_s24 + $0x1a0] sm:$0xff]  ;;  %7321 = vmatprep.subr.bf16.mxu1 %v7320_v21  ;;  %v167_v30 = vld [vmem:[%s11079_s24 + $0x1a8] sm:$0xff]  ;;  %v7294_v33 = vpack.c.bf16 %v119_v28, %v118_v27  ;;  %v137_v36 = vld [vmem:[%s11079_s24 + $0xb8] sm:$0xff] }
  0x10   :  { %v150_v31 = vld [vmem:[%s11079_s24 + $0x120] sm:$0xff]  ;;  %v151_v32 = vld [vmem:[%s11079_s24 + $0x128] sm:$0xff]  ;;  %7291 = vmatpush3.bf16.msra.mxu0 %v7290_v17  ;;  %v7324_v34 = vpack.c.bf16 %v167_v30, %v166_v29  ;;  %v120_v37 = vld [vmem:[%s11079_s24 + $0x30] sm:$0xff]  ;;  %v7296_v39 = vpack.c.bf16 %v137_v36, %v136_v35 }
  0x11   :  { %7293 = vmatprep.subr.bf16.mxu0 %v7292_v26  ;;  %v7326_v38 = vpack.c.bf16 %v151_v32, %v150_v31  ;;  %v121_v40 = vld [vmem:[%s11079_s24 + $0x38] sm:$0xff]  ;;  %v168_v41 = vld [vmem:[%s11079_s24 + $0x1b0] sm:$0xff]  ;;  %v138_v46 = vld [vmem:[%s11079_s24 + $0xc0] sm:$0xff] }
  0x12   :  { %7323 = vmatpush3.bf16.msra.mxu1 %v7322_v25  ;;  %v169_v42 = vld [vmem:[%s11079_s24 + $0x1b8] sm:$0xff]  ;;  %v152_v44 = vld [vmem:[%s11079_s24 + $0x130] sm:$0xff]  ;;  %v139_v47 = vld [vmem:[%s11079_s24 + $0xc8] sm:$0xff]  ;;  %v7298_v48 = vpack.c.bf16 %v121_v40, %v120_v37 }
  0x13   :  { %7325 = vmatprep.subr.bf16.mxu1 %v7324_v34  ;;  %v7328_v43 = vpack.c.bf16 %v169_v42, %v168_v41  ;;  %v153_v45 = vld [vmem:[%s11079_s24 + $0x138] sm:$0xff]  ;;  %v170_v49 = vld [vmem:[%s11079_s24 + $0x1c0] sm:$0xff]  ;;  %v171_v50 = vld [vmem:[%s11079_s24 + $0x1c8] sm:$0xff]  ;;  %v7300_v52 = vpack.c.bf16 %v139_v47, %v138_v46 }
  0x14   :  { %7295 = vmatpush3.bf16.msra.mxu0 %v7294_v33  ;;  %v7330_v51 = vpack.c.bf16 %v153_v45, %v152_v44  ;;  %v122_v53 = vld [vmem:[%s11079_s24 + $0x40] sm:$0xff]  ;;  %v123_v54 = vld [vmem:[%s11079_s24 + $0x48] sm:$0xff]  ;;  %v7332_v56 = vpack.c.bf16 %v171_v50, %v170_v49  ;;  %v140_v58 = vld [vmem:[%s11079_s24 + $0xd0] sm:$0xff] }
  0x15   :  { %7297 = vmatprep.subr.bf16.mxu0 %v7296_v39  ;;  %v154_v55 = vld [vmem:[%s11079_s24 + $0x140] sm:$0xff]  ;;  %v155_v57 = vld [vmem:[%s11079_s24 + $0x148] sm:$0xff]  ;;  %v141_v59 = vld [vmem:[%s11079_s24 + $0xd8] sm:$0xff]  ;;  %v7302_v62 = vpack.c.bf16 %v123_v54, %v122_v53 }
  0x16   :  { %7327 = vmatpush3.bf16.msra.mxu1 %v7326_v38  ;;  %v172_v60 = vld [vmem:[%s11079_s24 + $0x1d0] sm:$0xff]  ;;  %v173_v61 = vld [vmem:[%s11079_s24 + $0x1d8] sm:$0xff]  ;;  %v7334_v63 = vpack.c.bf16 %v155_v57, %v154_v55  ;;  %v7304_v0 = vpack.c.bf16 %v141_v59, %v140_v58  ;;  %v142_v6 = vld [vmem:[%s11079_s24 + $0xe0] sm:$0xff] }
  0x17   :  { %7329 = vmatprep.subr.bf16.mxu1 %v7328_v43  ;;  %v124_v1 = vld [vmem:[%s11079_s24 + $0x50] sm:$0xff]  ;;  %v125_v2 = vld [vmem:[%s11079_s24 + $0x58] sm:$0xff]  ;;  %v7336_v4 = vpack.c.bf16 %v173_v61, %v172_v60  ;;  %v143_v7 = vld [vmem:[%s11079_s24 + $0xe8] sm:$0xff] }
  0x18   :  { %7299 = vmatpush3.bf16.msra.mxu0 %v7298_v48  ;;  %v156_v3 = vld [vmem:[%s11079_s24 + $0x150] sm:$0xff]  ;;  %v157_v5 = vld [vmem:[%s11079_s24 + $0x158] sm:$0xff]  ;;  %v174_v8 = vld [vmem:[%s11079_s24 + $0x1e0] sm:$0xff]  ;;  %v7306_v10 = vpack.c.bf16 %v125_v2, %v124_v1  ;;  %v7308_v14 = vpack.c.bf16 %v143_v7, %v142_v6 }
  0x19   :  { %7301 = vmatprep.subr.bf16.mxu0 %v7300_v52  ;;  %v175_v9 = vld [vmem:[%s11079_s24 + $0x1e8] sm:$0xff]  ;;  %v126_v11 = vld [vmem:[%s11079_s24 + $0x60] sm:$0xff]  ;;  %v7338_v13 = vpack.c.bf16 %v157_v5, %v156_v3  ;;  %v144_v19 = vld [vmem:[%s11079_s24 + $0xf0] sm:$0xff] }
  0x1a   :  { %7331 = vmatpush3.bf16.msra.mxu1 %v7330_v51  ;;  %v109_v12 = vld [vmem:[%s11080_s28 + $0x8] sm:$0xff]  ;;  %v158_v16 = vld [vmem:[%s11079_s24 + $0x160] sm:$0xff]  ;;  %v7340_v18 = vpack.c.bf16 %v175_v9, %v174_v8  ;;  %v145_v20 = vld [vmem:[%s11079_s24 + $0xf8] sm:$0xff] }
  0x1b   :  { %7333 = vmatprep.subr.bf16.mxu1 %v7332_v56  ;;  %v127_v15 = vld [vmem:[%s11079_s24 + $0x68] sm:$0xff]  ;;  %281 = vmatprep.mubr.f32.mxu0 %v109_v12  ;;  %v111_v21 = vld [vmem:[%s11080_s28 + $0x18] sm:$0xff]  ;;  %v176_v22 = vld [vmem:[%s11079_s24 + $0x1f0] sm:$0xff]  ;;  %v7312_v26 = vpack.c.bf16 %v145_v20, %v144_v19 }
  0x1c   :  { %7303 = vmatpush3.bf16.msra.mxu0 %v7302_v62  ;;  %v159_v17 = vld [vmem:[%s11079_s24 + $0x168] sm:$0xff]  ;;  %v177_v23 = vld [vmem:[%s11079_s24 + $0x1f8] sm:$0xff]  ;;  %351 = vmatprep.mubr.f32.mxu1 %v111_v21  ;;  %v7310_v24 = vpack.c.bf16 %v127_v15, %v126_v11  ;;  %v128_v27 = vld [vmem:[%s11079_s24 + $0x70] sm:$0xff] }
  0x1d   :  { %7305 = vmatprep.subr.bf16.mxu0 %v7304_v0  ;;  %v7342_v25 = vpack.c.bf16 %v159_v17, %v158_v16  ;;  %v129_v28 = vld [vmem:[%s11079_s24 + $0x78] sm:$0xff]  ;;  %v160_v29 = vld [vmem:[%s11079_s24 + $0x170] sm:$0xff]  ;;  %v7344_v30 = vpack.c.bf16 %v177_v23, %v176_v22  ;;  %v194_v32 = vld [vmem:[%s11079_s24 + $0x280] sm:$0xff] }
  0x1e   :  { %7335 = vmatpush3.bf16.msra.mxu1 %v7334_v63  ;;  %v161_v31 = vld [vmem:[%s11079_s24 + $0x178] sm:$0xff]  ;;  %v195_v33 = vld [vmem:[%s11079_s24 + $0x288] sm:$0xff]  ;;  %v7314_v34 = vpack.c.bf16 %v129_v28, %v128_v27  ;;  %v178_v37 = vld [vmem:[%s11079_s24 + $0x200] sm:$0xff] }
  0x1f   :  { %7337 = vmatprep.subr.bf16.mxu1 %v7336_v4  ;;  %v7346_v35 = vpack.c.bf16 %v161_v31, %v160_v29  ;;  %v7348_v36 = vpack.c.bf16 %v195_v33, %v194_v32  ;;  %v179_v38 = vld [vmem:[%s11079_s24 + $0x208] sm:$0xff]  ;;  %v196_v39 = vld [vmem:[%s11079_s24 + $0x290] sm:$0xff]  ;;  %v197_v40 = vld [vmem:[%s11079_s24 + $0x298] sm:$0xff] }
  0x20   :  { %7307 = vmatpush3.bf16.msra.mxu0 %v7306_v10  ;;  %v108_v41 = vld [vmem:[%s11080_s28] sm:$0xff]  ;;  %v7350_v42 = vpack.c.bf16 %v179_v38, %v178_v37  ;;  %v110_v43 = vld [vmem:[%s11080_s28 + $0x10] sm:$0xff]  ;;  %v7352_v44 = vpack.c.bf16 %v197_v40, %v196_v39  ;;  %v181_v46 = vld [vmem:[%s11079_s24 + $0x218] sm:$0xff] }
  0x21   :  { %7309 = vmatprep.subr.bf16.mxu0 %v7308_v14  ;;  %v180_v45 = vld [vmem:[%s11079_s24 + $0x210] sm:$0xff]  ;;  %v198_v47 = vld [vmem:[%s11079_s24 + $0x2a0] sm:$0xff]  ;;  %v199_v48 = vld [vmem:[%s11079_s24 + $0x2a8] sm:$0xff] }
  0x22   :  { %7339 = vmatpush3.bf16.msra.mxu1 %v7338_v13  ;;  %v113_v49 = vld [vmem:[%s11080_s28 + $0x28] sm:$0xff]  ;;  %v7354_v50 = vpack.c.bf16 %v181_v46, %v180_v45  ;;  %v7356_v51 = vpack.c.bf16 %v199_v48, %v198_v47  ;;  %v182_v52 = vld [vmem:[%s11079_s24 + $0x220] sm:$0xff]  ;;  %v200_v54 = vld [vmem:[%s11079_s24 + $0x2b0] sm:$0xff]  ;;  %v11044_v47 = vmov 0.0  }
  0x23   :  { %7341 = vmatprep.subr.bf16.mxu1 %v7340_v18  ;;  %v183_v53 = vld [vmem:[%s11079_s24 + $0x228] sm:$0xff]  ;;  %v201_v55 = vld [vmem:[%s11079_s24 + $0x2b8] sm:$0xff]  ;;  %v184_v58 = vld [vmem:[%s11079_s24 + $0x230] sm:$0xff] }
  0x24   :  { %7311 = vmatpush3.bf16.msra.mxu0 %v7310_v24  ;;  %v7358_v56 = vpack.c.bf16 %v183_v53, %v182_v52  ;;  %v7360_v57 = vpack.c.bf16 %v201_v55, %v200_v54  ;;  %v185_v59 = vld [vmem:[%s11079_s24 + $0x238] sm:$0xff]  ;;  %v202_v60 = vld [vmem:[%s11079_s24 + $0x2c0] sm:$0xff]  ;;  %v203_v61 = vld [vmem:[%s11079_s24 + $0x2c8] sm:$0xff] }
  0x25   :  { %7313 = vmatprep.subr.bf16.mxu0 %v7312_v26  ;;  %v7362_v62 = vpack.c.bf16 %v185_v59, %v184_v58  ;;  %v7364_v63 = vpack.c.bf16 %v203_v61, %v202_v60  ;;  %v186_v0 = vld [vmem:[%s11079_s24 + $0x240] sm:$0xff]  ;;  %v187_v1 = vld [vmem:[%s11079_s24 + $0x248] sm:$0xff]  ;;  %v204_v2 = vld [vmem:[%s11079_s24 + $0x2d0] sm:$0xff] }
  0x26   :  { %7343 = vmatpush3.bf16.msra.mxu1 %v7342_v25  ;;  %v205_v3 = vld [vmem:[%s11079_s24 + $0x2d8] sm:$0xff]  ;;  %v7366_v4 = vpack.c.bf16 %v187_v1, %v186_v0  ;;  %v188_v6 = vld [vmem:[%s11079_s24 + $0x250] sm:$0xff]  ;;  %v206_v8 = vld [vmem:[%s11079_s24 + $0x2e0] sm:$0xff]  ;;  %v11066_v25 = vmov 0.0|0.0  }
  0x27   :  { %7345 = vmatprep.subr.bf16.mxu1 %v7344_v30  ;;  %v7368_v5 = vpack.c.bf16 %v205_v3, %v204_v2  ;;  %v189_v7 = vld [vmem:[%s11079_s24 + $0x258] sm:$0xff]  ;;  %v207_v9 = vld [vmem:[%s11079_s24 + $0x2e8] sm:$0xff]  ;;  %v190_v12 = vld [vmem:[%s11079_s24 + $0x260] sm:$0xff] }
  0x28   :  { %7315 = vmatpush3.bf16.msra.mxu0 %v7314_v34  ;;  %v7370_v10 = vpack.c.bf16 %v189_v7, %v188_v6  ;;  %v7372_v11 = vpack.c.bf16 %v207_v9, %v206_v8  ;;  %v191_v13 = vld [vmem:[%s11079_s24 + $0x268] sm:$0xff]  ;;  %v208_v14 = vld [vmem:[%s11079_s24 + $0x2f0] sm:$0xff]  ;;  %v209_v15 = vld [vmem:[%s11079_s24 + $0x2f8] sm:$0xff] }
  0x29   :  { %7349 = vmatprep.subr.bf16.mxu0 %v7348_v36  ;;  %v7374_v16 = vpack.c.bf16 %v191_v13, %v190_v12  ;;  %v7376_v17 = vpack.c.bf16 %v209_v15, %v208_v14  ;;  %v192_v18 = vld [vmem:[%s11079_s24 + $0x270] sm:$0xff]  ;;  %v193_v19 = vld [vmem:[%s11079_s24 + $0x278] sm:$0xff]  ;;  %v112_v21 = vld [vmem:[%s11080_s28 + $0x20] sm:$0xff]  ;;  %s11085_s28 = sld [smem:[#allocation19_spill]] }
  0x2a   :  { %7347 = vmatpush3.bf16.msra.mxu1 %v7346_v35  ;;  %v7378_v20 = vpack.c.bf16 %v193_v19, %v192_v18  ;;  %v74_v22 = vld [vmem:[%s11081_s0] sm:$0xff]  ;;  %v75_v23 = vld [vmem:[%s11081_s0 + $0x8] sm:$0xff]  ;;  %v76_v26 = vld [vmem:[%s11081_s0 + $0x10] sm:$0xff] }
  0x2b   :  { %282 = vmatmul.mubr.f32.vlgmr.msra.gmra.mrb[0].mxu0 %v108_v41  ;;  %v8966_v24 = vpack.c.bf16 %v75_v23, %v74_v22  ;;  %7380 = vmatprep.subr.bf16.mxu1 %v11066_v25  ;;  %v77_v27 = vld [vmem:[%s11081_s0 + $0x18] sm:$0xff]  ;;  %v78_v29 = vld [vmem:[%s11081_s0 + $0x20] sm:$0xff]  ;;  %v79_v30 = vld [vmem:[%s11081_s0 + $0x28] sm:$0xff] }
  0x2c   :  { %7351 = vmatpush3.bf16.msra.mxu0 %v7350_v42  ;;  %421 = vmatprep.mubr.f32.mxu0 %v113_v49  ;;  %v8977_v28 = vpack.c.bf16 %v77_v27, %v76_v26  ;;  %v8989_v31 = vpack.c.bf16 %v79_v30, %v78_v29  ;;  %v80_v32 = vld [vmem:[%s11081_s0 + $0x30] sm:$0xff]  ;;  %v81_v33 = vld [vmem:[%s11081_s0 + $0x38] sm:$0xff]  ;;  %v82_v35 = vld [vmem:[%s11081_s0 + $0x40] sm:$0xff] }
  0x2d   :  { %352 = vmatmul.mubr.f32.vlgmr.msra.gmra.mrb[0].mxu1 %v110_v43  ;;  %7353 = vmatprep.subr.bf16.mxu0 %v7352_v44  ;;  %v9001_v34 = vpack.c.bf16 %v81_v33, %v80_v32  ;;  %v83_v36 = vld [vmem:[%s11081_s0 + $0x48] sm:$0xff]  ;;  %v84_v38 = vld [vmem:[%s11081_s0 + $0x50] sm:$0xff]  ;;  %v85_v39 = vld [vmem:[%s11081_s0 + $0x58] sm:$0xff] }
  0x2e   :  { %7382 = vmatpush3.bf16.msra.mxu1 %v8966_v24  ;;  %v9013_v37 = vpack.c.bf16 %v83_v36, %v82_v35  ;;  %v9025_v40 = vpack.c.bf16 %v85_v39, %v84_v38  ;;  %v86_v41 = vld [vmem:[%s11081_s0 + $0x60] sm:$0xff]  ;;  %v87_v42 = vld [vmem:[%s11081_s0 + $0x68] sm:$0xff]  ;;  %v88_v44 = vld [vmem:[%s11081_s0 + $0x70] sm:$0xff]  ;;  %5860 = vmatprep.mubr.msk.f32.mxu1 %vm8532_vm0, %v11044_v47 }
  0x2f   :  { %7383 = vmatprep.subr.bf16.mxu1 %v11066_v25  ;;  %v9037_v43 = vpack.c.bf16 %v87_v42, %v86_v41  ;;  %v89_v45 = vld [vmem:[%s11081_s0 + $0x78] sm:$0xff]  ;;  %v4736_v49 = vld [vmem:[%s11082_s7] ss:$0 sm:$0xff]  ;;  %v589_v0 = vld [vmem:[%s11083_s13 + $0x10] sm:$0xff] }
  0x30   :  { %7355 = vmatpush3.bf16.msra.mxu0 %v7354_v50  ;;  %v9052_v46 = vpack.c.bf16 %v89_v45, %v88_v44  ;;  %v587_v61 = vld [vmem:[%s11083_s13] sm:$0xff]  ;;  %v590_v1 = vld [vmem:[%s11083_s13 + $0x18] sm:$0xff]  ;;  %v681_v7 = vld [vmem:[%s11084_s27 + $0x8] sm:$0xff] }
  0x31   :  { %7357 = vmatprep.subr.bf16.mxu0 %v7356_v51  ;;  %v7432_v2 = vpack.c.bf16 %v590_v1, %v589_v0  ;;  %v591_v3 = vld [vmem:[%s11083_s13 + $0x20] sm:$0xff]  ;;  %v682_v13 = vld [vmem:[%s11084_s27 + $0x10] sm:$0xff]  ;;  %v683_v14 = vld [vmem:[%s11084_s27 + $0x18] sm:$0xff] }
  0x32   :  { %7385 = vmatpush3.bf16.msra.mxu1 %v8977_v28  ;;  %v680_v6 = vld [vmem:[%s11084_s27] sm:$0xff]  ;;  %v7456_v15 = vpack.c.bf16 %v683_v14, %v682_v13  ;;  %v593_v19 = vld [vmem:[%s11083_s13 + $0x30] sm:$0xff]  ;;  %v687_v23 = vld [vmem:[%s11084_s27 + $0x38] sm:$0xff] }
  0x33   :  { %7386 = vmatprep.subr.bf16.mxu1 %v11066_v25  ;;  %v686_v22 = vld [vmem:[%s11084_s27 + $0x30] sm:$0xff]  ;;  %v595_v27 = vld [vmem:[%s11083_s13 + $0x40] sm:$0xff]  ;;  %v596_v29 = vld [vmem:[%s11083_s13 + $0x48] sm:$0xff] }
  0x34   :  { %7359 = vmatpush3.bf16.msra.mxu0 %v7358_v56  ;;  %v7462_v26 = vpack.c.bf16 %v687_v23, %v686_v22  ;;  %v7441_v30 = vpack.c.bf16 %v596_v29, %v595_v27  ;;  %v688_v32 = vld [vmem:[%s11084_s27 + $0x40] sm:$0xff]  ;;  %v689_v33 = vld [vmem:[%s11084_s27 + $0x48] sm:$0xff]  ;;  %v597_v36 = vld [vmem:[%s11083_s13 + $0x50] sm:$0xff] }
  0x35   :  { %7361 = vmatprep.subr.bf16.mxu0 %v7360_v57  ;;  %v7465_v35 = vpack.c.bf16 %v689_v33, %v688_v32  ;;  %v598_v38 = vld [vmem:[%s11083_s13 + $0x58] sm:$0xff]  ;;  %v690_v39 = vld [vmem:[%s11084_s27 + $0x50] sm:$0xff]  ;;  %v599_v45 = vld [vmem:[%s11083_s13 + $0x60] sm:$0xff] }
  0x36   :  { %7388 = vmatpush3.bf16.msra.mxu1 %v8989_v31  ;;  %v7444_v41 = vpack.c.bf16 %v598_v38, %v597_v36  ;;  %v691_v42 = vld [vmem:[%s11084_s27 + $0x58] sm:$0xff]  ;;  %v4737_v0 = vld [vmem:[%s11085_s28] ss:$0 sm:$0xff]  ;;  %v868_v13 = vld [vmem:[%s11022_s4 + $0x10] sm:$0xff] }
  0x37   :  { %7389 = vmatprep.subr.bf16.mxu1 %v11066_v25  ;;  %v7468_v44 = vpack.c.bf16 %v691_v42, %v690_v39  ;;  %v869_v14 = vld [vmem:[%s11022_s4 + $0x18] sm:$0xff]  ;;  %v779_v22 = vld [vmem:[%s11086_s1 + $0x30] sm:$0xff]  ;;  %v781_v32 = vld [vmem:[%s11086_s1 + $0x40] sm:$0xff] }
  0x38   :  { %7363 = vmatpush3.bf16.msra.mxu0 %v7362_v62  ;;  %v588_v62 = vld [vmem:[%s11083_s13 + $0x8] sm:$0xff]  ;;  %v780_v23 = vld [vmem:[%s11086_s1 + $0x38] sm:$0xff]  ;;  %v872_v27 = vld [vmem:[%s11022_s4 + $0x30] sm:$0xff] }
  0x39   :  { %7365 = vmatprep.subr.bf16.mxu0 %v7364_v63  ;;  %v7429_v63 = vpack.c.bf16 %v588_v62, %v587_v61  ;;  %v873_v29 = vld [vmem:[%s11022_s4 + $0x38] sm:$0xff]  ;;  %v782_v33 = vld [vmem:[%s11086_s1 + $0x48] sm:$0xff]  ;;  %v874_v36 = vld [vmem:[%s11022_s4 + $0x40] sm:$0xff] }
  0x3a   :  { %7391 = vmatpush3.bf16.msra.mxu1 %v9001_v34  ;;  %v875_v38 = vld [vmem:[%s11022_s4 + $0x48] sm:$0xff]  ;;  %v7489_v39 = vpack.c.bf16 %v782_v33, %v781_v32  ;;  %v784_v42 = vld [vmem:[%s11086_s1 + $0x58] sm:$0xff] }
  0x3b   :  { %7392 = vmatprep.subr.bf16.mxu1 %v11066_v25  ;;  %v103_v32 = vld [vmem:[%s11023_s5 + $0x68] sm:$0xff] }
  0x3c   :  { %7367 = vmatpush3.bf16.msra.mxu0 %v7366_v4  ;;  %v592_v4 = vld [vmem:[%s11083_s13 + $0x28] sm:$0xff] }
  0x3d   :  { %7369 = vmatprep.subr.bf16.mxu0 %v7368_v5  ;;  %v7435_v5 = vpack.c.bf16 %v592_v4, %v591_v3  ;;  %v774_v3 = vld [vmem:[%s11086_s1 + $0x8] sm:$0xff]  ;;  %v4738_v4 = vld [vmem:[%s11021_s8] ss:$0 sm:$0xff] }
  0x3e   :  { %7394 = vmatpush3.bf16.msra.mxu1 %v9013_v37 }
  0x3f   :  { %7395 = vmatprep.subr.bf16.mxu1 %v11066_v25 }
  0x40   :  { %7371 = vmatpush3.bf16.msra.mxu0 %v7370_v10 }
  0x41   :  { %7373 = vmatprep.subr.bf16.mxu0 %v7372_v11  ;;  %v7453_v11 = vpack.c.bf16 %v681_v7, %v680_v6  ;;  %v867_v6 = vld [vmem:[%s11022_s4 + $0x8] sm:$0xff] }
  0x42   :  { %7397 = vmatpush3.bf16.msra.mxu1 %v9025_v40 }
  0x43   :  { %7398 = vmatprep.subr.bf16.mxu1 %v11066_v25 }
  0x44   :  { %7375 = vmatpush3.bf16.msra.mxu0 %v7374_v16  ;;  %v684_v16 = vld [vmem:[%s11084_s27 + $0x20] sm:$0xff] }
  0x45   :  { %7377 = vmatprep.subr.bf16.mxu0 %v7376_v17  ;;  %v685_v17 = vld [vmem:[%s11084_s27 + $0x28] sm:$0xff] }
  0x46   :  { %7400 = vmatpush3.bf16.msra.mxu1 %v9037_v43  ;;  %v7459_v18 = vpack.c.bf16 %v685_v17, %v684_v16  ;;  %v777_v16 = vld [vmem:[%s11086_s1 + $0x20] sm:$0xff]  ;;  %v778_v17 = vld [vmem:[%s11086_s1 + $0x28] sm:$0xff] }
  0x47   :  { %7401 = vmatprep.subr.bf16.mxu1 %v11066_v25 }
  0x48   :  { %7379 = vmatpush3.bf16.msra.mxu0 %v7378_v20  ;;  %v594_v20 = vld [vmem:[%s11083_s13 + $0x38] sm:$0xff] }
  0x49   :  { %7404 = vmatprep.subr.bf16.mxu0 %v11066_v25 }
  0x4a   :  { %7403 = vmatpush3.bf16.msra.mxu1 %v9052_v46 }
  0x4b   :  { %422 = vmatmul.mubr.f32.vlgmr.msra.gmra.mrb[2].mxu0 %v112_v21  ;;  %7428 = vmatprep.subr.bf16.mxu1 %v11066_v25  ;;  %v7438_v21 = vpack.c.bf16 %v594_v20, %v593_v19  ;;  %v870_v19 = vld [vmem:[%s11022_s4 + $0x20] sm:$0xff]  ;;  %v871_v20 = vld [vmem:[%s11022_s4 + $0x28] sm:$0xff] }
  0x4c   :  { %7406 = vmatpush3.bf16.msra.mxu0 %v8966_v24  ;;  %5895 = vmatprep.mubr.msk.f32.mxu0 %vm8532_vm0, %v11044_v47 }
  0x4d   :  { %7407 = vmatprep.subr.bf16.mxu0 %v11066_v25 }
  0x50   :  { %7409 = vmatpush3.bf16.msra.mxu0 %v8977_v28 }
  0x51   :  { %7410 = vmatprep.subr.bf16.mxu0 %v11066_v25 }
  0x54   :  { %7412 = vmatpush3.bf16.msra.mxu0 %v8989_v31 }
  0x55   :  { %7413 = vmatprep.subr.bf16.mxu0 %v11066_v25 }
  0x58   :  { %7415 = vmatpush3.bf16.msra.mxu0 %v9001_v34 }
  0x59   :  { %7416 = vmatprep.subr.bf16.mxu0 %v11066_v25 }
  0x5c   :  { %7418 = vmatpush3.bf16.msra.mxu0 %v9013_v37 }
  0x5d   :  { %7419 = vmatprep.subr.bf16.mxu0 %v11066_v25 }
  0x60   :  { %7421 = vmatpush3.bf16.msra.mxu0 %v9025_v40 }
  0x61   :  { %7422 = vmatprep.subr.bf16.mxu0 %v11066_v25 }
  0x64   :  { %7424 = vmatpush3.bf16.msra.mxu0 %v9037_v43 }
  0x65   :  { %7425 = vmatprep.subr.bf16.mxu0 %v11066_v25 }
  0x68   :  { %7427 = vmatpush3.bf16.msra.mxu0 %v9052_v46 }
  0x69   :  { %7452 = vmatprep.subr.bf16.mxu0 %v11066_v25 }
  0xfe   :  { %v4981_v48 = vpop.f32.mrb[0].mxu0 }
  0xff   :  { %v4982_v50 = vpop.f32.mrb[1].mxu0 }
 0x100   :  { %v5016_v51 = vpop.f32.mrb[0].mxu1  ;;  %v4983_v52 = vadd.f32 %v4982_v50, %v4981_v48  ;;  %v600_v48 = vld [vmem:[%s11083_s13 + $0x68] sm:$0xff] }
 0x101   :  { %v5017_v53 = vpop.f32.mrb[1].mxu1  ;;  %v693_v50 = vld [vmem:[%s11084_s27 + $0x68] sm:$0xff] }
 0x102   :  { %v5018_v54 = vadd.f32 %v5017_v53, %v5016_v51  ;;  %v284_v55 = vadd.f32 %v4983_v52, %v4736_v49  ;;  %v692_v49 = vld [vmem:[%s11084_s27 + $0x60] sm:$0xff]  ;;  %v7447_v51 = vpack.c.bf16 %v600_v48, %v599_v45  ;;  %v601_v53 = vld [vmem:[%s11083_s13 + $0x70] sm:$0xff]  ;;  %v877_v48 = vld [vmem:[%s11022_s4 + $0x58] sm:$0xff] }
 0x103   :  { %v7471_v52 = vpack.c.bf16 %v693_v50, %v692_v49  ;;  %v876_v45 = vld [vmem:[%s11022_s4 + $0x50] sm:$0xff]  ;;  %v785_v50 = vld [vmem:[%s11086_s1 + $0x60] sm:$0xff] }
 0x104   :  { %v354_v56 = vadd.f32 %v5018_v54, %v284_v55  ;;  %v602_v54 = vld [vmem:[%s11083_s13 + $0x78] sm:$0xff]  ;;  %v694_v55 = vld [vmem:[%s11084_s27 + $0x70] sm:$0xff] }
 0x11e   :  { %v5051_v57 = vpop.f32.mrb[2].mxu0 }
 0x11f   :  { %v5052_v58 = vpop.f32.mrb[3].mxu0 }
 0x120   :  { %v5053_v59 = vadd.f32 %v5052_v58, %v5051_v57  ;;  %v7450_v57 = vpack.c.bf16 %v602_v54, %v601_v53  ;;  %v878_v53 = vld [vmem:[%s11022_s4 + $0x60] sm:$0xff]  ;;  %v879_v54 = vld [vmem:[%s11022_s4 + $0x68] sm:$0xff] }
 0x122   :  { %v9065_v60 = vadd.f32 %v5053_v59, %v354_v56  ;;  %v695_v56 = vld [vmem:[%s11084_s27 + $0x78] sm:$0xff] }
 0x123   :  { %v7474_v58 = vpack.c.bf16 %v695_v56, %v694_v55  ;;  %v787_v56 = vld [vmem:[%s11086_s1 + $0x70] sm:$0xff] }
 0x124   :  { %5861 = vmatmul.mubr.f32.vlgmr.msra.gmra.mrb[2].mxu1 %v9065_v60 }
 0x125   :  { %5930 = vmatprep.mubr.msk.f32.mxu1 %vm8532_vm0, %v11044_v47  ;;  %7430 = vmatpush3.bf16.msra.mxu1 %v7429_v63 }
 0x126   :  { %7431 = vmatprep.subr.bf16.mxu1 %v11066_v25 }
 0x129   :  { %7433 = vmatpush3.bf16.msra.mxu1 %v7432_v2  ;;  %v773_v2 = vld [vmem:[%s11086_s1] sm:$0xff] }
 0x12a   :  { %7434 = vmatprep.subr.bf16.mxu1 %v11066_v25 }
 0x12d   :  { %7436 = vmatpush3.bf16.msra.mxu1 %v7435_v5  ;;  %v866_v5 = vld [vmem:[%s11022_s4] sm:$0xff] }
 0x12e   :  { %7437 = vmatprep.subr.bf16.mxu1 %v11066_v25 }
 0x131   :  { %7439 = vmatpush3.bf16.msra.mxu1 %v7438_v21  ;;  %v7483_v21 = vpack.c.bf16 %v778_v17, %v777_v16  ;;  %v96_v16 = vld [vmem:[%s11023_s5 + $0x30] sm:$0xff]  ;;  %v97_v17 = vld [vmem:[%s11023_s5 + $0x38] sm:$0xff] }
 0x132   :  { %7440 = vmatprep.subr.bf16.mxu1 %v11066_v25 }
 0x135   :  { %7442 = vmatpush3.bf16.msra.mxu1 %v7441_v30  ;;  %v7486_v30 = vpack.c.bf16 %v780_v23, %v779_v22  ;;  %v100_v23 = vld [vmem:[%s11023_s5 + $0x50] sm:$0xff] }
 0x136   :  { %7443 = vmatprep.subr.bf16.mxu1 %v11066_v25 }
 0x139   :  { %7445 = vmatpush3.bf16.msra.mxu1 %v7444_v41  ;;  %v783_v41 = vld [vmem:[%s11086_s1 + $0x50] sm:$0xff] }
 0x13a   :  { %7446 = vmatprep.subr.bf16.mxu1 %v11066_v25  ;;  %v7492_v49 = vpack.c.bf16 %v784_v42, %v783_v41  ;;  %v4742_v41 = vld [vmem:[%s11022_s4 + $0x80] sm:$0xff]  ;;  %v4743_v42 = vld [vmem:[%s11022_s4 + $0x88] sm:$0xff] }
 0x13d   :  { %7448 = vmatpush3.bf16.msra.mxu1 %v7447_v51  ;;  %v786_v51 = vld [vmem:[%s11086_s1 + $0x68] sm:$0xff] }
 0x13e   :  { %7449 = vmatprep.subr.bf16.mxu1 %v11066_v25  ;;  %v7495_v55 = vpack.c.bf16 %v786_v51, %v785_v50 }
 0x141   :  { %7451 = vmatpush3.bf16.msra.mxu1 %v7450_v57  ;;  %v788_v57 = vld [vmem:[%s11086_s1 + $0x78] sm:$0xff] }
 0x142   :  { %7476 = vmatprep.subr.bf16.mxu1 %v11066_v25 }
 0x1f7   :  { %v495_v8 = vpop.f32.mrb[2].mxu1 }
 0x1f8   :  { %v9098_v9 = vsub.f32 %v9065_v60, %v495_v8  ;;  %v5862_v10 = vpop.f32.mrb[3].mxu1  ;;  %v7477_v8 = vpack.c.bf16 %v774_v3, %v773_v2  ;;  %v4740_v2 = vld [vmem:[%s11024_s12] ss:$0 sm:$0xff] }
 0x1f9   :  { %v775_v10 = vld [vmem:[%s11086_s1 + $0x10] sm:$0xff] }
 0x1fa   :  { %v500_v12 = vmul.f32 %v9098_v9, %v9098_v9 }
 0x1fc   :  { %5896 = vmatmul.mubr.f32.vlgmr.msra.gmra.mrb[4].mxu0 %v500_v12  ;;  %v9216_v12 = vpack.c.bf16 %v867_v6, %v866_v5 }
 0x1fd   :  { %7454 = vmatpush3.bf16.msra.mxu0 %v7453_v11  ;;  %5965 = vmatprep.mubr.msk.f32.mxu0 %vm8532_vm0, %v11044_v47  ;;  %v776_v11 = vld [vmem:[%s11086_s1 + $0x18] sm:$0xff] }
 0x1fe   :  { %7455 = vmatprep.subr.bf16.mxu0 %v11066_v25 }
 0x201   :  { %7457 = vmatpush3.bf16.msra.mxu0 %v7456_v15  ;;  %v7480_v15 = vpack.c.bf16 %v776_v11, %v775_v10  ;;  %v93_v10 = vld [vmem:[%s11023_s5 + $0x18] sm:$0xff] }
 0x202   :  { %7458 = vmatprep.subr.bf16.mxu0 %v11066_v25 }
 0x205   :  { %7460 = vmatpush3.bf16.msra.mxu0 %v7459_v18  ;;  %v9236_v18 = vpack.c.bf16 %v869_v14, %v868_v13  ;;  %v94_v13 = vld [vmem:[%s11023_s5 + $0x20] sm:$0xff]  ;;  %v95_v14 = vld [vmem:[%s11023_s5 + $0x28] sm:$0xff] }
 0x206   :  { %7461 = vmatprep.subr.bf16.mxu0 %v11066_v25 }
 0x209   :  { %7463 = vmatpush3.bf16.msra.mxu0 %v7462_v26  ;;  %v9255_v26 = vpack.c.bf16 %v871_v20, %v870_v19  ;;  %v9404_v19 = vpack.c.bf16 %v97_v17, %v96_v16  ;;  %v98_v20 = vld [vmem:[%s11023_s5 + $0x40] sm:$0xff]  ;;  %v4756_v16 = vld [vmem:[%s11022_s4 + $0xf0] sm:$0xff]  ;;  %v4757_v17 = vld [vmem:[%s11022_s4 + $0xf8] sm:$0xff] }
 0x20a   :  { %7464 = vmatprep.subr.bf16.mxu0 %v11066_v25 }
 0x20d   :  { %7466 = vmatpush3.bf16.msra.mxu0 %v7465_v35  ;;  %v9272_v35 = vpack.c.bf16 %v873_v29, %v872_v27  ;;  %v101_v27 = vld [vmem:[%s11023_s5 + $0x58] sm:$0xff] }
 0x20e   :  { %7467 = vmatprep.subr.bf16.mxu0 %v11066_v25  ;;  %v9424_v29 = vpack.c.bf16 %v101_v27, %v100_v23 }
 0x211   :  { %7469 = vmatpush3.bf16.msra.mxu0 %v7468_v44  ;;  %v9289_v44 = vpack.c.bf16 %v875_v38, %v874_v36  ;;  %v104_v36 = vld [vmem:[%s11023_s5 + $0x70] sm:$0xff]  ;;  %v105_v38 = vld [vmem:[%s11023_s5 + $0x78] sm:$0xff] }
 0x212   :  { %7470 = vmatprep.subr.bf16.mxu0 %v11066_v25 }
 0x215   :  { %7472 = vmatpush3.bf16.msra.mxu0 %v7471_v52  ;;  %v9306_v52 = vpack.c.bf16 %v877_v48, %v876_v45  ;;  %v4741_v45 = vld [vmem:[%s11025_s14] ss:$0 sm:$0xff] }
 0x216   :  { %7473 = vmatprep.subr.bf16.mxu0 %v11066_v25 }
 0x219   :  { %7475 = vmatpush3.bf16.msra.mxu0 %v7474_v58  ;;  %v9323_v58 = vpack.c.bf16 %v879_v54, %v878_v53  ;;  %v4744_v53 = vld [vmem:[%s11022_s4 + $0x90] sm:$0xff]  ;;  %v4745_v54 = vld [vmem:[%s11022_s4 + $0x98] sm:$0xff] }
 0x21a   :  { %7500 = vmatprep.subr.bf16.mxu0 %v11066_v25 }
 0x2cf   :  { %v567_v59 = vpop.f32.mrb[4].mxu0 }
 0x2d0   :  { %v568_v61 = vadd.f32 1e-06, %v567_v59  ;;  %v5897_v62 = vpop.f32.mrb[5].mxu0  ;;  %v7498_v59 = vpack.c.bf16 %v788_v57, %v787_v56  ;;  %v4746_v56 = vld [vmem:[%s11022_s4 + $0xa0] sm:$0xff]  ;;  %v4747_v57 = vld [vmem:[%s11022_s4 + $0xa8] sm:$0xff] }
 0x2d1   :  { %v881_v62 = vld [vmem:[%s11022_s4 + $0x78] sm:$0xff] }
 0x2d2   :  { %8495 = vrsqrt.f32 %v568_v61  ;;  %v880_v61 = vld [vmem:[%s11022_s4 + $0x70] sm:$0xff] }
 0x2dc   :  { %v8496_v63 = vpop.eup %8495 }
 0x2dd   :  { %v572_v1 = vmul.f32 %v8496_v63, %v9098_v9  ;;  %v9353_v63 = vpack.c.bf16 %v881_v62, %v880_v61  ;;  %v4748_v61 = vld [vmem:[%s11022_s4 + $0xb0] sm:$0xff]  ;;  %v4749_v62 = vld [vmem:[%s11022_s4 + $0xb8] sm:$0xff] }
 0x2df   :  { %v579_v7 = vmul.f32 %v4737_v0, %v572_v1  ;;  %v90_v0 = vld [vmem:[%s11023_s5] sm:$0xff]  ;;  %v91_v1 = vld [vmem:[%s11023_s5 + $0x8] sm:$0xff] }
 0x2e0   :  { %v9370_v5 = vpack.c.bf16 %v91_v1, %v90_v0  ;;  %v9492_v0 = vpack.c.bf16 %v4749_v62, %v4748_v61  ;;  %v4750_v1 = vld [vmem:[%s11022_s4 + $0xc0] sm:$0xff]  ;;  %v4765_v61 = vld [vmem:[%s11022_s4 + $0x138] sm:$0xff] }
 0x2e1   :  { %v9208_v9 = vadd.f32 %v4738_v4, %v579_v7 }
 0x2e3   :  { %5931 = vmatmul.mubr.f32.vlgmr.msra.gmra.mrb[4].mxu1 %v9208_v9  ;;  %5966 = vmatmul.mubr.f32.vlgmr.msra.gmra.mrb[6].mxu0 %v9208_v9 }
 0x2e4   :  { %7478 = vmatpush3.bf16.msra.mxu1 %v7477_v8  ;;  %6000 = vmatprep.mubr.msk.f32.mxu1 %vm8532_vm0, %v11044_v47 }
 0x2e5   :  { %7479 = vmatprep.subr.bf16.mxu1 %v11066_v25  ;;  %7502 = vmatpush3.bf16.msra.mxu0 %v9216_v12 }
 0x2e6   :  { %7503 = vmatprep.subr.bf16.mxu0 %v11066_v25  ;;  %6035 = vmatprep.mubr.msk.f32.mxu0 %vm8532_vm0, %v11044_v47 }
 0x2e8   :  { %7481 = vmatpush3.bf16.msra.mxu1 %v7480_v15  ;;  %v9394_v15 = vpack.c.bf16 %v95_v14, %v94_v13  ;;  %v4755_v13 = vld [vmem:[%s11022_s4 + $0xe8] sm:$0xff] }
 0x2e9   :  { %7482 = vmatprep.subr.bf16.mxu1 %v11066_v25  ;;  %7505 = vmatpush3.bf16.msra.mxu0 %v9236_v18 }
 0x2ea   :  { %7506 = vmatprep.subr.bf16.mxu0 %v11066_v25 }
 0x2ec   :  { %7484 = vmatpush3.bf16.msra.mxu1 %v7483_v21  ;;  %v99_v21 = vld [vmem:[%s11023_s5 + $0x48] sm:$0xff] }
 0x2ed   :  { %7485 = vmatprep.subr.bf16.mxu1 %v11066_v25  ;;  %7508 = vmatpush3.bf16.msra.mxu0 %v9255_v26  ;;  %v9414_v22 = vpack.c.bf16 %v99_v21, %v98_v20  ;;  %v9532_v20 = vpack.c.bf16 %v4757_v17, %v4756_v16  ;;  %v4739_v21 = vld [vmem:[%s11026_s10] ss:$0 sm:$0xff]  ;;  %v4771_v17 = vld [vmem:[%s11022_s4 + $0x168] sm:$0xff] }
 0x2ee   :  { %7509 = vmatprep.subr.bf16.mxu0 %v11066_v25  ;;  %v4770_v16 = vld [vmem:[%s11022_s4 + $0x160] sm:$0xff] }
 0x2f0   :  { %7487 = vmatpush3.bf16.msra.mxu1 %v7486_v30  ;;  %v102_v30 = vld [vmem:[%s11023_s5 + $0x60] sm:$0xff] }
 0x2f1   :  { %7488 = vmatprep.subr.bf16.mxu1 %v11066_v25  ;;  %7511 = vmatpush3.bf16.msra.mxu0 %v9272_v35  ;;  %v9434_v33 = vpack.c.bf16 %v103_v32, %v102_v30 }
 0x2f2   :  { %7512 = vmatprep.subr.bf16.mxu0 %v11066_v25 }
 0x2f4   :  { %7490 = vmatpush3.bf16.msra.mxu1 %v7489_v39  ;;  %v9444_v39 = vpack.c.bf16 %v105_v38, %v104_v36  ;;  %v4759_v36 = vld [vmem:[%s11022_s4 + $0x108] sm:$0xff] }
 0x2f5   :  { %7491 = vmatprep.subr.bf16.mxu1 %v11066_v25  ;;  %7514 = vmatpush3.bf16.msra.mxu0 %v9289_v44 }
 0x2f6   :  { %7515 = vmatprep.subr.bf16.mxu0 %v11066_v25 }
 0x2f8   :  { %7493 = vmatpush3.bf16.msra.mxu1 %v7492_v49  ;;  %v9456_v49 = vpack.c.bf16 %v4743_v42, %v4742_v41 }
 0x2f9   :  { %7494 = vmatprep.subr.bf16.mxu1 %v11066_v25  ;;  %7517 = vmatpush3.bf16.msra.mxu0 %v9306_v52 }
 0x2fa   :  { %7518 = vmatprep.subr.bf16.mxu0 %v11066_v25 }
 0x2fc   :  { %7496 = vmatpush3.bf16.msra.mxu1 %v7495_v55  ;;  %v9470_v55 = vpack.c.bf16 %v4745_v54, %v4744_v53  ;;  %v4762_v53 = vld [vmem:[%s11022_s4 + $0x120] sm:$0xff]  ;;  %v4763_v54 = vld [vmem:[%s11022_s4 + $0x128] sm:$0xff] }
 0x2fd   :  { %7497 = vmatprep.subr.bf16.mxu1 %v11066_v25  ;;  %7520 = vmatpush3.bf16.msra.mxu0 %v9323_v58 }
 0x2fe   :  { %7521 = vmatprep.subr.bf16.mxu0 %v11066_v25 }
 0x300   :  { %7499 = vmatpush3.bf16.msra.mxu1 %v7498_v59  ;;  %v9482_v59 = vpack.c.bf16 %v4747_v57, %v4746_v56  ;;  %v9611_v56 = vpack.c.bf16 %v4763_v54, %v4762_v53  ;;  %v4764_v57 = vld [vmem:[%s11022_s4 + $0x130] sm:$0xff] }
 0x301   :  { %7524 = vmatprep.subr.bf16.mxu1 %v11066_v25  ;;  %7523 = vmatpush3.bf16.msra.mxu0 %v9353_v63  ;;  %v9621_v62 = vpack.c.bf16 %v4765_v61, %v4764_v57  ;;  %v4776_v54 = vld [vmem:[%s11022_s4 + $0x190] sm:$0xff]  ;;  %v4777_v57 = vld [vmem:[%s11022_s4 + $0x198] sm:$0xff] }
 0x302   :  { %7548 = vmatprep.subr.bf16.mxu0 %v11066_v25  ;;  %v9720_v61 = vpack.c.bf16 %v4777_v57, %v4776_v54  ;;  %v4787_v54 = vld [vmem:[%s11022_s4 + $0x1e8] sm:$0xff] }
 0x303   :  { %6001 = vmatmul.mubr.f32.vlgmr.msra.gmra.mrb[6].mxu1 %v9208_v9  ;;  %v92_v9 = vld [vmem:[%s11023_s5 + $0x10] sm:$0xff] }
 0x304   :  { %7526 = vmatpush3.bf16.msra.mxu1 %v9216_v12  ;;  %6070 = vmatprep.mubr.msk.f32.mxu1 %vm8532_vm0, %v11044_v47  ;;  %v9382_v11 = vpack.c.bf16 %v93_v10, %v92_v9  ;;  %v4754_v10 = vld [vmem:[%s11022_s4 + $0xe0] sm:$0xff]  ;;  %11091 = vst [vmem:[#allocation6_spill] sm:$0xff] %v9720_v61 }
 0x305   :  { %7527 = vmatprep.subr.bf16.mxu1 %v11066_v25  ;;  %v9522_v14 = vpack.c.bf16 %v4755_v13, %v4754_v10  ;;  %v4769_v10 = vld [vmem:[%s11022_s4 + $0x158] sm:$0xff] }
 0x308   :  { %7529 = vmatpush3.bf16.msra.mxu1 %v9236_v18 }
 0x309   :  { %7530 = vmatprep.subr.bf16.mxu1 %v11066_v25 }
 0x30c   :  { %7532 = vmatpush3.bf16.msra.mxu1 %v9255_v26 }
 0x30d   :  { %7533 = vmatprep.subr.bf16.mxu1 %v11066_v25 }
 0x310   :  { %7535 = vmatpush3.bf16.msra.mxu1 %v9272_v35 }
 0x311   :  { %7536 = vmatprep.subr.bf16.mxu1 %v11066_v25 }
 0x314   :  { %7538 = vmatpush3.bf16.msra.mxu1 %v9289_v44 }
 0x315   :  { %7539 = vmatprep.subr.bf16.mxu1 %v11066_v25 }
 0x318   :  { %7541 = vmatpush3.bf16.msra.mxu1 %v9306_v52 }
 0x319   :  { %7542 = vmatprep.subr.bf16.mxu1 %v11066_v25 }
 0x31c   :  { %7544 = vmatpush3.bf16.msra.mxu1 %v9323_v58 }
 0x31d   :  { %7545 = vmatprep.subr.bf16.mxu1 %v11066_v25 }
 0x320   :  { %7547 = vmatpush3.bf16.msra.mxu1 %v9353_v63 }
 0x321   :  { %7572 = vmatprep.subr.bf16.mxu1 %v11066_v25 }
 0x3b6   :  { %v9368_v3 = vpop.f32.mrb[4].mxu1  ;;  %v769_v4 = vpop.f32.mrb[6].mxu0 }
 0x3b7   :  { %v9372_v6 = vadd.f32 %v4740_v2, %v769_v4  ;;  %v5932_v7 = vpop.f32.mrb[5].mxu1  ;;  %v5967_v8 = vpop.f32.mrb[7].mxu0  ;;  %v4751_v2 = vld [vmem:[%s11022_s4 + $0xc8] sm:$0xff]  ;;  %v9560_v23 = vadd.f32 %v4739_v21, %v9368_v3  ;;  %v4758_v3 = vld [vmem:[%s11022_s4 + $0x100] sm:$0xff]  ;;  %v9651_v21 = vpack.c.bf16 %v4771_v17, %v4770_v16  ;;  %v4781_v16 = vld [vmem:[%s11022_s4 + $0x1b8] sm:$0xff] }
 0x3b8   :  { %v9502_v4 = vpack.c.bf16 %v4751_v2, %v4750_v1  ;;  %v4752_v7 = vld [vmem:[%s11022_s4 + $0xd0] sm:$0xff]  ;;  %v4753_v8 = vld [vmem:[%s11022_s4 + $0xd8] sm:$0xff]  ;;  %v9588_v41 = vpack.c.bf16 %v4759_v36, %v4758_v3  ;;  %v4766_v1 = vld [vmem:[%s11022_s4 + $0x140] sm:$0xff] }
 0x3b9   :  { %6036 = vmatmul.mubr.f32.vlgmr.msra.gmra.mrb[8].mxu0 %v9372_v6  ;;  %v9512_v9 = vpack.c.bf16 %v4753_v8, %v4752_v7  ;;  %v4767_v2 = vld [vmem:[%s11022_s4 + $0x148] sm:$0xff]  ;;  %v4768_v8 = vld [vmem:[%s11022_s4 + $0x150] sm:$0xff]  ;;  %11088 = vst [vmem:[#allocation3_spill] sm:$0xff] %v9651_v21 }
 0x3ba   :  { %7550 = vmatpush3.bf16.msra.mxu0 %v9370_v5  ;;  %6105 = vmatprep.mubr.msk.f32.mxu0 %vm8532_vm0, %v11044_v47  ;;  %v9631_v7 = vpack.c.bf16 %v4767_v2, %v4766_v1  ;;  %v9641_v13 = vpack.c.bf16 %v4769_v10, %v4768_v8  ;;  %v4778_v1 = vld [vmem:[%s11022_s4 + $0x1a0] sm:$0xff]  ;;  %v4779_v2 = vld [vmem:[%s11022_s4 + $0x1a8] sm:$0xff]  ;;  %v4780_v10 = vld [vmem:[%s11022_s4 + $0x1b0] sm:$0xff] }
 0x3bb   :  { %7551 = vmatprep.subr.bf16.mxu0 %v11066_v25  ;;  %v9732_v8 = vpack.c.bf16 %v4779_v2, %v4778_v1  ;;  %v9742_v17 = vpack.c.bf16 %v4781_v16, %v4780_v10  ;;  %v4788_v1 = vld [vmem:[%s11022_s4 + $0x1f0] sm:$0xff]  ;;  %v4789_v2 = vld [vmem:[%s11022_s4 + $0x1f8] sm:$0xff] }
 0x3bc   :  { %11087 = vst [vmem:[#allocation2_spill] sm:$0xff] %v9641_v13  ;;  %v9782_v10 = vpack.c.bf16 %v4789_v2, %v4788_v1 }
 0x3bd   :  { %11092 = vst [vmem:[#allocation7_spill] sm:$0xff] %v9732_v8  ;;  %11093 = vst [vmem:[#allocation8_spill] sm:$0xff] %v9742_v17 }
 0x3be   :  { %7553 = vmatpush3.bf16.msra.mxu0 %v9382_v11  ;;  %11097 = vst [vmem:[#allocation12_spill] sm:$0xff] %v9782_v10 }
 0x3bf   :  { %7554 = vmatprep.subr.bf16.mxu0 %v11066_v25 }
 0x3c2   :  { %7556 = vmatpush3.bf16.msra.mxu0 %v9394_v15 }
 0x3c3   :  { %7557 = vmatprep.subr.bf16.mxu0 %v11066_v25 }
 0x3c6   :  { %7559 = vmatpush3.bf16.msra.mxu0 %v9404_v19 }
 0x3c7   :  { %7560 = vmatprep.subr.bf16.mxu0 %v11066_v25 }
 0x3ca   :  { %7562 = vmatpush3.bf16.msra.mxu0 %v9414_v22 }
 0x3cb   :  { %7563 = vmatprep.subr.bf16.mxu0 %v11066_v25 }
 0x3ce   :  { %7565 = vmatpush3.bf16.msra.mxu0 %v9424_v29 }
 0x3cf   :  { %7566 = vmatprep.subr.bf16.mxu0 %v11066_v25 }
 0x3d2   :  { %7568 = vmatpush3.bf16.msra.mxu0 %v9434_v33 }
 0x3d3   :  { %7569 = vmatprep.subr.bf16.mxu0 %v11066_v25 }
 0x3d6   :  { %v862_v48 = vpop.f32.mrb[6].mxu1  ;;  %7571 = vmatpush3.bf16.msra.mxu0 %v9444_v39 }
 0x3d7   :  { %v9459_v50 = vadd.f32 %v4741_v45, %v862_v48  ;;  %v6002_v51 = vpop.f32.mrb[7].mxu1  ;;  %7596 = vmatprep.subr.bf16.mxu0 %v11066_v25  ;;  %v4760_v45 = vld [vmem:[%s11022_s4 + $0x110] sm:$0xff]  ;;  %v4761_v48 = vld [vmem:[%s11022_s4 + $0x118] sm:$0xff] }
 0x3d8   :  { %v9599_v51 = vpack.c.bf16 %v4761_v48, %v4760_v45  ;;  %v4774_v45 = vld [vmem:[%s11022_s4 + $0x180] sm:$0xff]  ;;  %v4775_v48 = vld [vmem:[%s11022_s4 + $0x188] sm:$0xff] }
 0x3d9   :  { %6071 = vmatmul.mubr.f32.vlgmr.msra.gmra.mrb[8].mxu1 %v9459_v50  ;;  %v9707_v53 = vpack.c.bf16 %v4775_v48, %v4774_v45  ;;  %v4786_v48 = vld [vmem:[%s11022_s4 + $0x1e0] sm:$0xff] }
 0x3da   :  { %7574 = vmatpush3.bf16.msra.mxu1 %v9456_v49  ;;  %6140 = vmatprep.mubr.msk.f32.mxu1 %vm8532_vm0, %v11044_v47  ;;  %v9772_v57 = vpack.c.bf16 %v4787_v54, %v4786_v48 }
 0x3db   :  { %7575 = vmatprep.subr.bf16.mxu1 %v11066_v25  ;;  %11090 = vst [vmem:[#allocation5_spill] sm:$0xff] %v9707_v53 }
 0x3dc   :  { %11096 = vst [vmem:[#allocation11_spill] sm:$0xff] %v9772_v57 }
 0x3de   :  { %7577 = vmatpush3.bf16.msra.mxu1 %v9470_v55 }
 0x3df   :  { %7578 = vmatprep.subr.bf16.mxu1 %v11066_v25 }
 0x3e2   :  { %7580 = vmatpush3.bf16.msra.mxu1 %v9482_v59 }
 0x3e3   :  { %7581 = vmatprep.subr.bf16.mxu1 %v11066_v25 }
 0x3e6   :  { %7583 = vmatpush3.bf16.msra.mxu1 %v9492_v0 }
 0x3e7   :  { %7584 = vmatprep.subr.bf16.mxu1 %v11066_v25 }
 0x3ea   :  { %7586 = vmatpush3.bf16.msra.mxu1 %v9502_v4 }
 0x3eb   :  { %7587 = vmatprep.subr.bf16.mxu1 %v11066_v25 }
 0x3ee   :  { %7589 = vmatpush3.bf16.msra.mxu1 %v9512_v9 }
 0x3ef   :  { %7590 = vmatprep.subr.bf16.mxu1 %v11066_v25 }
 0x3f2   :  { %7592 = vmatpush3.bf16.msra.mxu1 %v9522_v14 }
 0x3f3   :  { %7593 = vmatprep.subr.bf16.mxu1 %v11066_v25 }
 0x3f6   :  { %7595 = vmatpush3.bf16.msra.mxu1 %v9532_v20 }
 0x3f7   :  { %7620 = vmatprep.subr.bf16.mxu1 %v11066_v25 }
 0x3f9   :  { %6141 = vmatmul.mubr.f32.vlgmr.msra.gmra.mrb[10].mxu1 %v9372_v6 }
 0x3fa   :  { %7622 = vmatpush3.bf16.msra.mxu1 %v9370_v5  ;;  %6210 = vmatprep.mubr.msk.f32.mxu1 %vm8532_vm0, %v11044_v47 }
 0x3fb   :  { %7623 = vmatprep.subr.bf16.mxu1 %v11066_v25 }
 0x3fe   :  { %7625 = vmatpush3.bf16.msra.mxu1 %v9382_v11 }
 0x3ff   :  { %7626 = vmatprep.subr.bf16.mxu1 %v11066_v25 }
 0x402   :  { %7628 = vmatpush3.bf16.msra.mxu1 %v9394_v15 }
 0x403   :  { %7629 = vmatprep.subr.bf16.mxu1 %v11066_v25 }
 0x406   :  { %7631 = vmatpush3.bf16.msra.mxu1 %v9404_v19 }
 0x407   :  { %7632 = vmatprep.subr.bf16.mxu1 %v11066_v25 }
 0x40a   :  { %7634 = vmatpush3.bf16.msra.mxu1 %v9414_v22 }
 0x40b   :  { %7635 = vmatprep.subr.bf16.mxu1 %v11066_v25 }
 0x40e   :  { %7637 = vmatpush3.bf16.msra.mxu1 %v9424_v29 }
 0x40f   :  { %7638 = vmatprep.subr.bf16.mxu1 %v11066_v25 }
 0x412   :  { %7640 = vmatpush3.bf16.msra.mxu1 %v9434_v33 }
 0x413   :  { %7641 = vmatprep.subr.bf16.mxu1 %v11066_v25 }
 0x416   :  { %7643 = vmatpush3.bf16.msra.mxu1 %v9444_v39 }
 0x417   :  { %7668 = vmatprep.subr.bf16.mxu1 %v11066_v25 }
 0x48c   :  { %v948_v27 = vpop.f32.mrb[8].mxu0 }
 0x48d   :  { %v1022_v30 = vmul.f32 %v948_v27, %v9560_v23  ;;  %v6037_v32 = vpop.f32.mrb[9].mxu0  ;;  %v4772_v27 = vld [vmem:[%s11022_s4 + $0x170] sm:$0xff] }
 0x48f   :  { %6106 = vmatmul.mubr.f32.vlgmr.msra.gmra.mrb[10].mxu0 %v1022_v30  ;;  %v4773_v30 = vld [vmem:[%s11022_s4 + $0x178] sm:$0xff] }
 0x490   :  { %7598 = vmatpush3.bf16.msra.mxu0 %v9456_v49  ;;  %6175 = vmatprep.mubr.msk.f32.mxu0 %vm8532_vm0, %v11044_v47  ;;  %v9661_v32 = vpack.c.bf16 %v4773_v30, %v4772_v27  ;;  %v4782_v27 = vld [vmem:[%s11022_s4 + $0x1c0] sm:$0xff]  ;;  %v4783_v30 = vld [vmem:[%s11022_s4 + $0x1c8] sm:$0xff] }
 0x491   :  { %7599 = vmatprep.subr.bf16.mxu0 %v11066_v25 }
 0x492   :  { %11089 = vst [vmem:[#allocation4_spill] sm:$0xff] %v9661_v32 }
 0x494   :  { %7601 = vmatpush3.bf16.msra.mxu0 %v9470_v55 }
 0x495   :  { %7602 = vmatprep.subr.bf16.mxu0 %v11066_v25 }
 0x498   :  { %7604 = vmatpush3.bf16.msra.mxu0 %v9482_v59 }
 0x499   :  { %7605 = vmatprep.subr.bf16.mxu0 %v11066_v25 }
 0x49c   :  { %7607 = vmatpush3.bf16.msra.mxu0 %v9492_v0 }
 0x49d   :  { %7608 = vmatprep.subr.bf16.mxu0 %v11066_v25 }
 0x4a0   :  { %7610 = vmatpush3.bf16.msra.mxu0 %v9502_v4 }
 0x4a1   :  { %7611 = vmatprep.subr.bf16.mxu0 %v11066_v25 }
 0x4a4   :  { %7613 = vmatpush3.bf16.msra.mxu0 %v9512_v9 }
 0x4a5   :  { %7614 = vmatprep.subr.bf16.mxu0 %v11066_v25 }
 0x4a8   :  { %7616 = vmatpush3.bf16.msra.mxu0 %v9522_v14 }
 0x4a9   :  { %7617 = vmatprep.subr.bf16.mxu0 %v11066_v25 }
 0x4ac   :  { %v9585_v38 = vpop.f32.mrb[8].mxu1  ;;  %7619 = vmatpush3.bf16.msra.mxu0 %v9532_v20 }
 0x4ad   :  { %v6072_v42 = vpop.f32.mrb[9].mxu1  ;;  %7644 = vmatprep.subr.bf16.mxu0 %v11066_v25 }
 0x4af   :  { %6176 = vmatmul.mubr.f32.vlgmr.msra.gmra.mrb[12].mxu0 %v9459_v50 }
 0x4b0   :  { %7646 = vmatpush3.bf16.msra.mxu0 %v9588_v41  ;;  %6245 = vmatprep.mubr.msk.f32.mxu0 %vm8532_vm0, %v11044_v47 }
 0x4b1   :  { %7647 = vmatprep.subr.bf16.mxu0 %v11066_v25 }
 0x4b4   :  { %7649 = vmatpush3.bf16.msra.mxu0 %v9599_v51 }
 0x4b5   :  { %7650 = vmatprep.subr.bf16.mxu0 %v11066_v25 }
 0x4b8   :  { %7652 = vmatpush3.bf16.msra.mxu0 %v9611_v56 }
 0x4b9   :  { %7653 = vmatprep.subr.bf16.mxu0 %v11066_v25 }
 0x4bc   :  { %7655 = vmatpush3.bf16.msra.mxu0 %v9621_v62 }
 0x4bd   :  { %7656 = vmatprep.subr.bf16.mxu0 %v11066_v25 }
 0x4c0   :  { %7658 = vmatpush3.bf16.msra.mxu0 %v9631_v7 }
 0x4c1   :  { %7659 = vmatprep.subr.bf16.mxu0 %v11066_v25 }
 0x4c4   :  { %7661 = vmatpush3.bf16.msra.mxu0 %v9641_v13 }
 0x4c5   :  { %7662 = vmatprep.subr.bf16.mxu0 %v11066_v25 }
 0x4c8   :  { %7664 = vmatpush3.bf16.msra.mxu0 %v9651_v21 }
 0x4c9   :  { %7665 = vmatprep.subr.bf16.mxu0 %v11066_v25 }
 0x4cc   :  { %v1177_v3 = vpop.f32.mrb[10].mxu1  ;;  %7667 = vmatpush3.bf16.msra.mxu0 %v9661_v32 }
 0x4cd   :  { %v1251_v36 = vmul.f32 %v1177_v3, %v9560_v23  ;;  %v6142_v42 = vpop.f32.mrb[11].mxu1  ;;  %7692 = vmatprep.subr.bf16.mxu0 %v11066_v25  ;;  %v9752_v3 = vpack.c.bf16 %v4783_v30, %v4782_v27 }
 0x4ce   :  { %v4785_v42 = vld [vmem:[%s11022_s4 + $0x1d8] sm:$0xff] }
 0x4cf   :  { %6211 = vmatmul.mubr.f32.vlgmr.msra.gmra.mrb[12].mxu1 %v1251_v36  ;;  %6246 = vmatmul.mubr.f32.vlgmr.msra.gmra.mrb[14].mxu0 %v9372_v6  ;;  %11094 = vst [vmem:[#allocation9_spill] sm:$0xff] %v9752_v3  ;;  %v4784_v36 = vld [vmem:[%s11022_s4 + $0x1d0] sm:$0xff] }
 0x4d0   :  { %7670 = vmatpush3.bf16.msra.mxu1 %v9588_v41  ;;  %6280 = vmatprep.mubr.msk.f32.mxu1 %vm8532_vm0, %v11044_v47  ;;  %v9762_v45 = vpack.c.bf16 %v4785_v42, %v4784_v36 }
 0x4d1   :  { %7671 = vmatprep.subr.bf16.mxu1 %v11066_v25  ;;  %7694 = vmatpush3.bf16.msra.mxu0 %v9370_v5 }
 0x4d2   :  { %7695 = vmatprep.subr.bf16.mxu0 %v11066_v25  ;;  %6315 = vmatprep.mubr.msk.f32.mxu0 %vm8532_vm0, %v11044_v47  ;;  %11095 = vst [vmem:[#allocation10_spill] sm:$0xff] %v9762_v45 }
 0x4d4   :  { %7673 = vmatpush3.bf16.msra.mxu1 %v9599_v51 }
 0x4d5   :  { %7674 = vmatprep.subr.bf16.mxu1 %v11066_v25  ;;  %7697 = vmatpush3.bf16.msra.mxu0 %v9382_v11 }
 0x4d6   :  { %7698 = vmatprep.subr.bf16.mxu0 %v11066_v25 }
 0x4d8   :  { %7676 = vmatpush3.bf16.msra.mxu1 %v9611_v56 }
 0x4d9   :  { %7677 = vmatprep.subr.bf16.mxu1 %v11066_v25  ;;  %7700 = vmatpush3.bf16.msra.mxu0 %v9394_v15 }
 0x4da   :  { %7701 = vmatprep.subr.bf16.mxu0 %v11066_v25 }
 0x4dc   :  { %7679 = vmatpush3.bf16.msra.mxu1 %v9621_v62 }
 0x4dd   :  { %7680 = vmatprep.subr.bf16.mxu1 %v11066_v25  ;;  %7703 = vmatpush3.bf16.msra.mxu0 %v9404_v19 }
 0x4de   :  { %7704 = vmatprep.subr.bf16.mxu0 %v11066_v25 }
 0x4e0   :  { %7682 = vmatpush3.bf16.msra.mxu1 %v9631_v7 }
 0x4e1   :  { %7683 = vmatprep.subr.bf16.mxu1 %v11066_v25  ;;  %7706 = vmatpush3.bf16.msra.mxu0 %v9414_v22 }
 0x4e2   :  { %7707 = vmatprep.subr.bf16.mxu0 %v11066_v25 }
 0x4e4   :  { %7685 = vmatpush3.bf16.msra.mxu1 %v9641_v13 }
 0x4e5   :  { %7686 = vmatprep.subr.bf16.mxu1 %v11066_v25  ;;  %7709 = vmatpush3.bf16.msra.mxu0 %v9424_v29 }
 0x4e6   :  { %7710 = vmatprep.subr.bf16.mxu0 %v11066_v25 }
 0x4e8   :  { %7688 = vmatpush3.bf16.msra.mxu1 %v9651_v21 }
 0x4e9   :  { %7689 = vmatprep.subr.bf16.mxu1 %v11066_v25  ;;  %7712 = vmatpush3.bf16.msra.mxu0 %v9434_v33 }
 0x4ea   :  { %7713 = vmatprep.subr.bf16.mxu0 %v11066_v25 }
 0x4ec   :  { %7691 = vmatpush3.bf16.msra.mxu1 %v9661_v32 }
 0x4ed   :  { %7716 = vmatprep.subr.bf16.mxu1 %v11066_v25  ;;  %7715 = vmatpush3.bf16.msra.mxu0 %v9444_v39 }
 0x4ee   :  { %7740 = vmatprep.subr.bf16.mxu0 %v11066_v25 }
 0x4ef   :  { %6281 = vmatmul.mubr.f32.vlgmr.msra.gmra.mrb[14].mxu1 %v9459_v50 }
 0x4f0   :  { %7718 = vmatpush3.bf16.msra.mxu1 %v9707_v53  ;;  %6350 = vmatprep.mubr.msk.f32.mxu1 %vm8532_vm0, %v11044_v47 }
 0x4f1   :  { %7719 = vmatprep.subr.bf16.mxu1 %v11066_v25 }
 0x4f4   :  { %7721 = vmatpush3.bf16.msra.mxu1 %v9720_v61 }
 0x4f5   :  { %7722 = vmatprep.subr.bf16.mxu1 %v11066_v25 }
 0x4f8   :  { %7724 = vmatpush3.bf16.msra.mxu1 %v9732_v8 }
 0x4f9   :  { %7725 = vmatprep.subr.bf16.mxu1 %v11066_v25 }
 0x4fc   :  { %7727 = vmatpush3.bf16.msra.mxu1 %v9742_v17 }
 0x4fd   :  { %7728 = vmatprep.subr.bf16.mxu1 %v11066_v25 }
 0x500   :  { %7730 = vmatpush3.bf16.msra.mxu1 %v9752_v3 }
 0x501   :  { %7731 = vmatprep.subr.bf16.mxu1 %v11066_v25 }
 0x504   :  { %7733 = vmatpush3.bf16.msra.mxu1 %v9762_v45 }
 0x505   :  { %7734 = vmatprep.subr.bf16.mxu1 %v11066_v25 }
 0x508   :  { %7736 = vmatpush3.bf16.msra.mxu1 %v9772_v57 }
 0x509   :  { %7737 = vmatprep.subr.bf16.mxu1 %v11066_v25 }
 0x50c   :  { %7739 = vmatpush3.bf16.msra.mxu1 %v9782_v10 }
 0x50d   :  { %7764 = vmatprep.subr.bf16.mxu1 %v11066_v25 }
 0x50f   :  { %6351 = vmatmul.mubr.f32.vlgmr.msra.gmra.mrb[16].mxu1 %v9372_v6 }
 0x510   :  { %7766 = vmatpush3.bf16.msra.mxu1 %v9370_v5  ;;  %6420 = vmatprep.mubr.msk.f32.mxu1 %vm8532_vm0, %v11044_v47 }
 0x511   :  { %7767 = vmatprep.subr.bf16.mxu1 %v11066_v25 }
 0x514   :  { %7769 = vmatpush3.bf16.msra.mxu1 %v9382_v11 }
 0x515   :  { %7770 = vmatprep.subr.bf16.mxu1 %v11066_v25 }
 0x518   :  { %7772 = vmatpush3.bf16.msra.mxu1 %v9394_v15 }
 0x519   :  { %7773 = vmatprep.subr.bf16.mxu1 %v11066_v25 }
 0x51c   :  { %7775 = vmatpush3.bf16.msra.mxu1 %v9404_v19 }
 0x51d   :  { %7776 = vmatprep.subr.bf16.mxu1 %v11066_v25 }
 0x520   :  { %7778 = vmatpush3.bf16.msra.mxu1 %v9414_v22 }
 0x521   :  { %7779 = vmatprep.subr.bf16.mxu1 %v11066_v25 }
 0x524   :  { %7781 = vmatpush3.bf16.msra.mxu1 %v9424_v29 }
 0x525   :  { %7782 = vmatprep.subr.bf16.mxu1 %v11066_v25 }
 0x528   :  { %7784 = vmatpush3.bf16.msra.mxu1 %v9434_v33 }
 0x529   :  { %7785 = vmatprep.subr.bf16.mxu1 %v11066_v25 }
 0x52c   :  { %7787 = vmatpush3.bf16.msra.mxu1 %v9444_v39 }
 0x52d   :  { %7788 = vmatprep.subr.bf16.mxu1 %v11066_v25 }
 0x562   :  { %v1089_v6 = vpop.f32.mrb[10].mxu0 }
 0x563   :  { %v6107_v16 = vpop.f32.mrb[11].mxu0  ;;  %v9808_v48 = vmul.f32 0.35355338, %v1089_v6 }
 0x564   :  { %v11098_v16 = vmov 0.0  }
 0x582   :  { %v9806_v27 = vpop.f32.mrb[12].mxu0 }
 0x583   :  { %v6177_v30 = vpop.f32.mrb[13].mxu0 }
 0x5a2   :  { %v1318_v36 = vpop.f32.mrb[12].mxu1  ;;  %v1406_v42 = vpop.f32.mrb[14].mxu0 }
 0x5a3   :  { %v9810_v54 = vmul.f32 0.35355338, %v1318_v36  ;;  %v6212_v1 = vpop.f32.mrb[13].mxu1  ;;  %v1480_v2 = vmul.f32 %v1406_v42, %v9560_v23  ;;  %v6247_v47 = vpop.f32.mrb[15].mxu0 }
 0x5a4   :  { %v106_v1 = vld [vmem:[%s11027_s6] sm:$0xff] }
 0x5a5   :  { %v1781_v32 = vmax.f32 %v9808_v48, %v9810_v54  ;;  %6316 = vmatmul.mubr.f32.vlgmr.msra.gmra.mrb[16].mxu0 %v1480_v2  ;;  %v107_v2 = vld [vmem:[%s11027_s6 + $0x8] sm:$0xff] }
 0x5a6   :  { %7742 = vmatpush3.bf16.msra.mxu0 %v9707_v53  ;;  %6385 = vmatprep.mubr.msk.f32.mxu0 %vm8532_vm0, %v11098_v16 }
 0x5a7   :  { %7743 = vmatprep.subr.bf16.mxu0 %v11066_v25 }
 0x5aa   :  { %7745 = vmatpush3.bf16.msra.mxu0 %v9720_v61 }
 0x5ab   :  { %7746 = vmatprep.subr.bf16.mxu0 %v11066_v25 }
 0x5ae   :  { %7748 = vmatpush3.bf16.msra.mxu0 %v9732_v8 }
 0x5af   :  { %7749 = vmatprep.subr.bf16.mxu0 %v11066_v25 }
 0x5b2   :  { %7751 = vmatpush3.bf16.msra.mxu0 %v9742_v17 }
 0x5b3   :  { %7752 = vmatprep.subr.bf16.mxu0 %v11066_v25 }
 0x5b6   :  { %7754 = vmatpush3.bf16.msra.mxu0 %v9752_v3 }
 0x5b7   :  { %7755 = vmatprep.subr.bf16.mxu0 %v11066_v25 }
 0x5ba   :  { %7757 = vmatpush3.bf16.msra.mxu0 %v9762_v45 }
 0x5bb   :  { %7758 = vmatprep.subr.bf16.mxu0 %v11066_v25 }
 0x5be   :  { %7760 = vmatpush3.bf16.msra.mxu0 %v9772_v57 }
 0x5bf   :  { %7761 = vmatprep.subr.bf16.mxu0 %v11066_v25 }
 0x5c2   :  { %v9831_v47 = vpop.f32.mrb[14].mxu1  ;;  %7763 = vmatpush3.bf16.msra.mxu0 %v9782_v10  ;;  %v2111_v10 = vld [vmem:[%s11028_s15 + $0x28] sm:$0xff] }
 0x5c3   :  { %v6282_v6 = vpop.f32.mrb[15].mxu1  ;;  %7800 = vmatprep.subr.bf16.mxu0 %v11066_v25 }
 0x5c4   :  { %v2107_v6 = vld [vmem:[%s11028_s15 + $0x8] sm:$0xff] }
 0x5c5   :  { %6386 = vmatmul.mubr.f32.vlgmr.msra.gmra.mrb[18].mxu0 %v9459_v50  ;;  %v9847_v50 = vpack.c.bf16 %v107_v2, %v106_v1  ;;  %v2110_v2 = vld [vmem:[%s11028_s15 + $0x20] sm:$0xff] }
 0x5c6   :  { %6483 = vmatprep.mubr.msk.f32.mxu0 %vm8532_vm0, %v11098_v16  ;;  %v7807_v57 = vpack.c.bf16 %v2111_v10, %v2110_v2 }
 0x5e2   :  { %v1635_v30 = vpop.f32.mrb[16].mxu1 }
 0x5e3   :  { %v1709_v36 = vmul.f32 %v1635_v30, %v9560_v23  ;;  %v6352_v42 = vpop.f32.mrb[17].mxu1  ;;  %v2106_v23 = vld [vmem:[%s11028_s15] sm:$0xff]  ;;  %v2108_v30 = vld [vmem:[%s11028_s15 + $0x10] sm:$0xff] }
 0x5e4   :  { %v2109_v42 = vld [vmem:[%s11028_s15 + $0x18] sm:$0xff] }
 0x5e5   :  { %6421 = vmatmul.mubr.f32.vlgmr.msra.gmra.mrb[18].mxu1 %v1709_v36  ;;  %v7801_v36 = vpack.c.bf16 %v2107_v6, %v2106_v23  ;;  %v7804_v1 = vpack.c.bf16 %v2109_v42, %v2108_v30  ;;  %v2112_v23 = vld [vmem:[%s11028_s15 + $0x30] sm:$0xff]  ;;  %v2113_v6 = vld [vmem:[%s11028_s15 + $0x38] sm:$0xff] }
 0x5e6   :  { %6427 = vmatprep.mubr.msk.f32.mxu1 %vm8532_vm0, %v11098_v16  ;;  %7790 = vmatpush3.bf16.msra.mxu1 %v9847_v50 }
 0x5e7   :  { %7791 = vmatprep.subr.bf16.mxu1 %v11066_v25  ;;  %7802 = vmatpush3.bf16.msra.mxu0 %v7801_v36  ;;  %v7810_v36 = vpack.c.bf16 %v2113_v6, %v2112_v23 }
 0x5e8   :  { %7803 = vmatprep.subr.bf16.mxu0 %v11066_v25 }
 0x5eb   :  { %7805 = vmatpush3.bf16.msra.mxu0 %v7804_v1 }
 0x5ec   :  { %7806 = vmatprep.subr.bf16.mxu0 %v11066_v25 }
 0x5ef   :  { %7808 = vmatpush3.bf16.msra.mxu0 %v7807_v57 }
 0x5f0   :  { %7809 = vmatprep.subr.bf16.mxu0 %v11066_v25 }
 0x5f3   :  { %7811 = vmatpush3.bf16.msra.mxu0 %v7810_v36 }
 0x5f4   :  { %7812 = vmatprep.subr.bf16.mxu0 %v11066_v25 }
 0x678   :  { %v1547_v30 = vpop.f32.mrb[16].mxu0 }
 0x679   :  { %v1551_v42 = vmul.f32 0.35355338, %v1547_v30  ;;  %v6317_v45 = vpop.f32.mrb[17].mxu0 }
 0x67b   :  { %v1782_v3 = vmax.f32 %v1781_v32, %v1551_v42 }
 0x698   :  { %v9879_v10 = vpop.f32.mrb[18].mxu0 }
 0x699   :  { %v6387_v1 = vpop.f32.mrb[19].mxu0 }
 0x6b8   :  { %v1776_v2 = vpop.f32.mrb[18].mxu1 }
 0x6b9   :  { %v1780_v17 = vmul.f32 0.35355338, %v1776_v2  ;;  %v6422_v8 = vpop.f32.mrb[19].mxu1 }
 0x6bb   :  { %v1783_v61 = vmax.f32 %v1782_v3, %v1780_v17 }
 0x6bd   :  { %v1784_v53 = vsub.f32 %v9808_v48, %v1783_v61  ;;  %v1787_v57 = vsub.f32 %v9810_v54, %v1783_v61  ;;  %v1790_v23 = vsub.f32 %v1551_v42, %v1783_v61  ;;  %v1793_v6 = vsub.f32 %v1780_v17, %v1783_v61 }
 0x6bf   :  { %v1785_v45 = vmul.f32 1.442695, %v1784_v53  ;;  %v1788_v30 = vmul.f32 1.442695, %v1787_v57  ;;  %v1791_v21 = vmul.f32 1.442695, %v1790_v23 }
 0x6c0   :  { %v1794_v32 = vmul.f32 1.442695, %v1793_v6  ;;  %v2116_v57 = vld [vmem:[%s11028_s15 + $0x50] sm:$0xff]  ;;  %v2117_v23 = vld [vmem:[%s11028_s15 + $0x58] sm:$0xff] }
 0x6c1   :  { %8497 = vpow2.f32 %v1785_v45  ;;  %v7816_v6 = vpack.c.bf16 %v2117_v23, %v2116_v57  ;;  %v2118_v45 = vld [vmem:[%s11028_s15 + $0x60] sm:$0xff] }
 0x6c2   :  { %8499 = vpow2.f32 %v1788_v30  ;;  %v2119_v30 = vld [vmem:[%s11028_s15 + $0x68] sm:$0xff] }
 0x6c3   :  { %8501 = vpow2.f32 %v1791_v21  ;;  %v11099_v21 = vmov 0.0|0.0  }
 0x6c4   :  { %8503 = vpow2.f32 %v1794_v32  ;;  %v7819_v32 = vpack.c.bf16 %v2119_v30, %v2118_v45 }
 0x6cb   :  { %v8498_v36 = vpop.eup %8497 }
 0x6cc   :  { %v8500_v1 = vpop.eup %8499 }
 0x6cd   :  { %v1796_v25 = vadd.f32 %v8500_v1, %v8498_v36  ;;  %v8502_v2 = vpop.eup %8501 }
 0x6ce   :  { %v8504_v3 = vpop.eup %8503 }
 0x6cf   :  { %v1797_v8 = vadd.f32 %v8502_v2, %v1796_v25  ;;  %v2114_v25 = vld [vmem:[%s11028_s15 + $0x40] sm:$0xff] }
 0x6d1   :  { %v1798_v13 = vadd.f32 %v8504_v3, %v1797_v8 }
 0x6d3   :  { %8505 = vrcp.f32 %v1798_v13  ;;  %v2115_v13 = vld [vmem:[%s11028_s15 + $0x48] sm:$0xff] }
 0x6d4   :  { %v7813_v42 = vpack.c.bf16 %v2115_v13, %v2114_v25 }
 0x6d6   :  { %7814 = vmatpush3.bf16.msra.mxu0 %v7813_v42 }
 0x6d7   :  { %7815 = vmatprep.subr.bf16.mxu0 %v11099_v21 }
 0x6da   :  { %7817 = vmatpush3.bf16.msra.mxu0 %v7816_v6 }
 0x6db   :  { %7818 = vmatprep.subr.bf16.mxu0 %v11099_v21 }
 0x6dd   :  { %v8506_v48 = vpop.eup %8505 }
 0x6de   :  { %v1801_v54 = vmul.f32 %v8506_v48, %v8498_v36  ;;  %v1878_v61 = vmul.f32 %v8506_v48, %v8500_v1  ;;  %v1954_v53 = vmul.f32 %v8506_v48, %v8502_v2  ;;  %v2030_v17 = vmul.f32 %v8506_v48, %v8504_v3  ;;  %7820 = vmatpush3.bf16.msra.mxu0 %v7819_v32  ;;  %v2120_v36 = vld [vmem:[%s11028_s15 + $0x70] sm:$0xff]  ;;  %v2121_v1 = vld [vmem:[%s11028_s15 + $0x78] sm:$0xff] }
 0x6df   :  { %7821 = vmatprep.subr.bf16.mxu0 %v11099_v21  ;;  %v7822_v2 = vpack.c.bf16 %v2121_v1, %v2120_v36  ;;  %v2362_v36 = vld [vmem:[%s11030_s19 + $0x8] sm:$0xff]  ;;  %v2364_v1 = vld [vmem:[%s11030_s19 + $0x18] sm:$0xff] }
 0x6e0   :  { %6428 = vmatmul.mubr.msk.f32.vlgmr.msra.gmra.mrb[20].mxu1 %vm1802_vm1, %v1801_v54 }
 0x6e1   :  { %7793 = vmatpush3.bf16.msra.mxu1 %v9847_v50  ;;  %6434 = vmatprep.mubr.msk.f32.mxu1 %vm8532_vm0, %v11098_v16 }
 0x6e2   :  { %7794 = vmatprep.subr.bf16.mxu1 %v11099_v21  ;;  %7823 = vmatpush3.bf16.msra.mxu0 %v7822_v2  ;;  %v2361_v2 = vld [vmem:[%s11030_s19] sm:$0xff] }
 0x6e3   :  { %7848 = vmatprep.subr.bf16.mxu0 %v11099_v21 }
 0x6e4   :  { %6435 = vmatmul.mubr.msk.f32.vlgmr.msra.gmra.mrb[22].mxu1 %vm1802_vm1, %v1878_v61 }
 0x6e5   :  { %7796 = vmatpush3.bf16.msra.mxu1 %v9847_v50  ;;  %6441 = vmatprep.mubr.msk.f32.mxu1 %vm8532_vm0, %v11098_v16 }
 0x6e6   :  { %7797 = vmatprep.subr.bf16.mxu1 %v11099_v21 }
 0x6e8   :  { %6442 = vmatmul.mubr.msk.f32.vlgmr.msra.gmra.mrb[24].mxu1 %vm1802_vm1, %v1954_v53 }
 0x6e9   :  { %7799 = vmatpush3.bf16.msra.mxu1 %v9847_v50  ;;  %6448 = vmatprep.mubr.msk.f32.mxu1 %vm8532_vm0, %v11098_v16 }
 0x6ea   :  { %7824 = vmatprep.subr.bf16.mxu1 %v11099_v21 }
 0x6ec   :  { %6449 = vmatmul.mubr.msk.f32.vlgmr.msra.gmra.mrb[26].mxu1 %vm1802_vm1, %v2030_v17 }
 0x6ed   :  { %7826 = vmatpush3.bf16.msra.mxu1 %v8966_v24  ;;  %6518 = vmatprep.mubr.msk.f32.mxu1 %vm8532_vm0, %v11098_v16 }
 0x6ee   :  { %7827 = vmatprep.subr.bf16.mxu1 %v11099_v21 }
 0x6f1   :  { %7829 = vmatpush3.bf16.msra.mxu1 %v8977_v28 }
 0x6f2   :  { %7830 = vmatprep.subr.bf16.mxu1 %v11099_v21 }
 0x6f5   :  { %7832 = vmatpush3.bf16.msra.mxu1 %v8989_v31 }
 0x6f6   :  { %7833 = vmatprep.subr.bf16.mxu1 %v11099_v21 }
 0x6f9   :  { %7835 = vmatpush3.bf16.msra.mxu1 %v9001_v34 }
 0x6fa   :  { %7836 = vmatprep.subr.bf16.mxu1 %v11099_v21 }
 0x6fd   :  { %7838 = vmatpush3.bf16.msra.mxu1 %v9013_v37 }
 0x6fe   :  { %7839 = vmatprep.subr.bf16.mxu1 %v11099_v21 }
 0x701   :  { %7841 = vmatpush3.bf16.msra.mxu1 %v9025_v40 }
 0x702   :  { %7842 = vmatprep.subr.bf16.mxu1 %v11099_v21 }
 0x705   :  { %7844 = vmatpush3.bf16.msra.mxu1 %v9037_v43 }
 0x706   :  { %7845 = vmatprep.subr.bf16.mxu1 %v11099_v21 }
 0x709   :  { %7847 = vmatpush3.bf16.msra.mxu1 %v9052_v46 }
 0x7b3   :  { %v1872_v8 = vpop.f32.mrb[20].mxu1 }
 0x7b4   :  { %v1876_v3 = vmul.f32 %v1872_v8, %v9585_v38  ;;  %v6429_v48 = vpop.f32.mrb[21].mxu1  ;;  %v2363_v8 = vld [vmem:[%s11030_s19 + $0x10] sm:$0xff] }
 0x7b5   :  { %v2368_v48 = vld [vmem:[%s11030_s19 + $0x38] sm:$0xff] }
 0x7b7   :  { %v1948_v54 = vpop.f32.mrb[22].mxu1 }
 0x7b8   :  { %v1952_v61 = vmul.f32 %v1948_v54, %v9806_v27  ;;  %v6436_v53 = vpop.f32.mrb[23].mxu1  ;;  %v4794_v27 = vld [vmem:[%s11029_s16] ss:$0 sm:$0xff]  ;;  %v7874_v54 = vpack.c.bf16 %v2363_v8, %v2361_v2 }
 0x7b9   :  { %v2365_v53 = vld [vmem:[%s11030_s19 + $0x20] sm:$0xff] }
 0x7ba   :  { %v1953_v17 = vadd.f32 %v1952_v61, %v1876_v3  ;;  %v2366_v3 = vld [vmem:[%s11030_s19 + $0x28] sm:$0xff]  ;;  %v2373_v2 = vld [vmem:[%s11030_s19 + $0x60] sm:$0xff] }
 0x7bb   :  { %v2024_v25 = vpop.f32.mrb[24].mxu1  ;;  %v7876_v61 = vpack.c.bf16 %v2368_v48, %v2366_v3  ;;  %v2378_v3 = vld [vmem:[%s11030_s19 + $0x88] sm:$0xff]  ;;  %v2380_v48 = vld [vmem:[%s11030_s19 + $0x98] sm:$0xff] }
 0x7bc   :  { %v2028_v13 = vmul.f32 %v2024_v25, %v9831_v47  ;;  %v6443_v42 = vpop.f32.mrb[25].mxu1  ;;  %v2370_v25 = vld [vmem:[%s11030_s19 + $0x48] sm:$0xff] }
 0x7be   :  { %v2029_v57 = vadd.f32 %v2028_v13, %v1953_v17  ;;  %v2367_v17 = vld [vmem:[%s11030_s19 + $0x30] sm:$0xff]  ;;  %v2372_v13 = vld [vmem:[%s11030_s19 + $0x58] sm:$0xff] }
 0x7bf   :  { %v2100_v23 = vpop.f32.mrb[26].mxu1  ;;  %v7878_v42 = vpack.c.bf16 %v2367_v17, %v2365_v53  ;;  %v2379_v53 = vld [vmem:[%s11030_s19 + $0x90] sm:$0xff]  ;;  %v2382_v17 = vld [vmem:[%s11030_s19 + $0xa8] sm:$0xff] }
 0x7c0   :  { %v2104_v6 = vmul.f32 %v2100_v23, %v9879_v10  ;;  %v6450_v45 = vpop.f32.mrb[27].mxu1  ;;  %v2369_v23 = vld [vmem:[%s11030_s19 + $0x40] sm:$0xff] }
 0x7c2   :  { %v2105_v30 = vadd.f32 %v2104_v6, %v2029_v57  ;;  %v7880_v57 = vpack.c.bf16 %v2372_v13, %v2370_v25  ;;  %v2371_v6 = vld [vmem:[%s11030_s19 + $0x50] sm:$0xff]  ;;  %v2384_v25 = vld [vmem:[%s11030_s19 + $0xb8] sm:$0xff] }
 0x7c3   :  { %v7882_v45 = vpack.c.bf16 %v2371_v6, %v2369_v23  ;;  %v2383_v23 = vld [vmem:[%s11030_s19 + $0xb0] sm:$0xff]  ;;  %v2386_v6 = vld [vmem:[%s11030_s19 + $0xc8] sm:$0xff] }
 0x7c4   :  { %6484 = vmatmul.mubr.f32.vlgmr.msra.gmra.mrb[20].mxu0 %v2105_v30 }
 0x7c5   :  { %7850 = vmatpush3.bf16.msra.mxu0 %v8966_v24  ;;  %6553 = vmatprep.mubr.msk.f32.mxu0 %vm8532_vm0, %v11098_v16 }
 0x7c6   :  { %7851 = vmatprep.subr.bf16.mxu0 %v11099_v21 }
 0x7c9   :  { %7853 = vmatpush3.bf16.msra.mxu0 %v8977_v28 }
 0x7ca   :  { %7854 = vmatprep.subr.bf16.mxu0 %v11099_v21 }
 0x7cd   :  { %7856 = vmatpush3.bf16.msra.mxu0 %v8989_v31 }
 0x7ce   :  { %7857 = vmatprep.subr.bf16.mxu0 %v11099_v21 }
 0x7d1   :  { %7859 = vmatpush3.bf16.msra.mxu0 %v9001_v34 }
 0x7d2   :  { %7860 = vmatprep.subr.bf16.mxu0 %v11099_v21 }
 0x7d5   :  { %7862 = vmatpush3.bf16.msra.mxu0 %v9013_v37 }
 0x7d6   :  { %7863 = vmatprep.subr.bf16.mxu0 %v11099_v21 }
 0x7d9   :  { %7865 = vmatpush3.bf16.msra.mxu0 %v9025_v40 }
 0x7da   :  { %7866 = vmatprep.subr.bf16.mxu0 %v11099_v21 }
 0x7dd   :  { %7868 = vmatpush3.bf16.msra.mxu0 %v9037_v43 }
 0x7de   :  { %7869 = vmatprep.subr.bf16.mxu0 %v11099_v21 }
 0x7e1   :  { %7871 = vmatpush3.bf16.msra.mxu0 %v9052_v46 }
 0x897   :  { %v2188_v38 = vpop.f32.mrb[20].mxu0 }
 0x898   :  { %v2192_v47 = vadd.f32 %v2188_v38, %v9065_v60  ;;  %v6485_v10 = vpop.f32.mrb[21].mxu0  ;;  %v7872_v60 = vpack.c.bf16 %v2364_v1, %v2362_v36  ;;  %v2376_v36 = vld [vmem:[%s11030_s19 + $0x78] sm:$0xff] }
 0x899   :  { %v2374_v10 = vld [vmem:[%s11030_s19 + $0x68] sm:$0xff] }
 0x89a   :  { %v9969_v32 = vadd.f32 %v4794_v27, %v2192_v47  ;;  %7873 = vmatprep.subr.bf16.mxu1 %v7872_v60  ;;  %v7884_v1 = vpack.c.bf16 %v2376_v36, %v2374_v10  ;;  %v2375_v60 = vld [vmem:[%s11030_s19 + $0x70] sm:$0xff]  ;;  %v2390_v36 = vld [vmem:[%s11030_s19 + $0xe8] sm:$0xff] }
 0x89b   :  { %v7886_v8 = vpack.c.bf16 %v2375_v60, %v2373_v2  ;;  %v2387_v10 = vld [vmem:[%s11030_s19 + $0xd0] sm:$0xff] }
 0x89c   :  { %6519 = vmatmul.mubr.f32.vlgmr.msra.gmra.mrb[28].mxu1 %v9969_v32 }
 0x89d   :  { %2469 = vmatprep.mubr.f32.mxu1 %v11098_v16  ;;  %7875 = vmatpush1.bf16.msra.mxu1 %v7874_v54  ;;  %v2377_v54 = vld [vmem:[%s11030_s19 + $0x80] sm:$0xff] }
 0x89e   :  { %7877 = vmatprep.subr.bf16.mxu1 %v7876_v61  ;;  %v7888_v61 = vpack.c.bf16 %v2380_v48, %v2378_v3  ;;  %v7890_v13 = vpack.c.bf16 %v2379_v53, %v2377_v54  ;;  %v2391_v3 = vld [vmem:[%s11030_s19 + $0xf0] sm:$0xff]  ;;  %v2510_v54 = vld [vmem:[%s11031_s21 + $0x80] sm:$0xff] }
 0x89f   :  { %v2494_v53 = vld [vmem:[%s11031_s21] sm:$0xff] }
 0x8a1   :  { %7879 = vmatpush1.bf16.msra.mxu1 %v7878_v42  ;;  %v7892_v42 = vpack.c.bf16 %v2384_v25, %v2382_v17  ;;  %v2495_v25 = vld [vmem:[%s11031_s21 + $0x8] sm:$0xff] }
 0x8a2   :  { %7881 = vmatprep.subr.bf16.mxu1 %v7880_v57  ;;  %v2381_v57 = vld [vmem:[%s11030_s19 + $0xa0] sm:$0xff] }
 0x8a5   :  { %7883 = vmatpush1.bf16.msra.mxu1 %v7882_v45  ;;  %v2388_v45 = vld [vmem:[%s11030_s19 + $0xd8] sm:$0xff] }
 0x8a6   :  { %7885 = vmatprep.subr.bf16.mxu1 %v7884_v1  ;;  %v2392_v1 = vld [vmem:[%s11030_s19 + $0xf8] sm:$0xff] }
 0x8a7   :  { %v7900_v60 = vpack.c.bf16 %v2392_v1, %v2390_v36  ;;  %v2513_v36 = vld [vmem:[%s11031_s21 + $0x98] sm:$0xff] }
 0x8a9   :  { %7887 = vmatpush1.bf16.msra.mxu1 %v7886_v8  ;;  %v2389_v8 = vld [vmem:[%s11030_s19 + $0xe0] sm:$0xff] }
 0x8aa   :  { %7889 = vmatprep.subr.bf16.mxu1 %v7888_v61  ;;  %v7902_v48 = vpack.c.bf16 %v2391_v3, %v2389_v8  ;;  %v2511_v61 = vld [vmem:[%s11031_s21 + $0x88] sm:$0xff]  ;;  %v2514_v3 = vld [vmem:[%s11031_s21 + $0xa0] sm:$0xff] }
 0x8ab   :  { %v7904_v17 = vpack.c.bf16 %v2511_v61, %v2510_v54  ;;  %v2498_v61 = vld [vmem:[%s11031_s21 + $0x20] sm:$0xff] }
 0x8ad   :  { %7891 = vmatpush1.bf16.msra.mxu1 %v7890_v13  ;;  %v7906_v13 = vpack.c.bf16 %v2495_v25, %v2494_v53  ;;  %7905 = vmatprep.subr.bf16.mxu0 %v7904_v17  ;;  %v2499_v53 = vld [vmem:[%s11031_s21 + $0x28] sm:$0xff]  ;;  %v2516_v25 = vld [vmem:[%s11031_s21 + $0xb0] sm:$0xff] }
 0x8ae   :  { %7893 = vmatprep.subr.bf16.mxu1 %v7892_v42  ;;  %v7914_v17 = vpack.c.bf16 %v2499_v53, %v2498_v61  ;;  %v2506_v53 = vld [vmem:[%s11031_s21 + $0x60] sm:$0xff] }
 0x96f   :  { %v2269_v30 = vpop.f32.mrb[28].mxu1 }
 0x970   :  { %v2273_v38 = vsub.f32 %v9969_v32, %v2269_v30  ;;  %v6520_v27 = vpop.f32.mrb[29].mxu1  ;;  %v7894_v30 = vpack.c.bf16 %v2383_v23, %v2381_v57 }
 0x971   :  { %v7896_v27 = vpack.c.bf16 %v2388_v45, %v2386_v6  ;;  %v4795_v45 = vld [vmem:[%s11032_s17] ss:$0 sm:$0xff] }
 0x972   :  { %v2274_v47 = vmul.f32 %v2273_v38, %v2273_v38  ;;  %7895 = vmatpush1.bf16.msra.mxu1 %v7894_v30 }
 0x973   :  { %7897 = vmatprep.subr.bf16.mxu1 %v7896_v27  ;;  %v4796_v27 = vld [vmem:[%s11033_s18] ss:$0 sm:$0xff] }
 0x974   :  { %6554 = vmatmul.mubr.f32.vlgmr.msra.gmra.mrb[22].mxu0 %v2274_v47  ;;  %v2385_v47 = vld [vmem:[%s11030_s19 + $0xc0] sm:$0xff] }
 0x975   :  { %v7898_v2 = vpack.c.bf16 %v2387_v10, %v2385_v47  ;;  %7907 = vmatpush3.bf16.msra.mxu0 %v7906_v13  ;;  %v2517_v13 = vld [vmem:[%s11031_s21 + $0xb8] sm:$0xff] }
 0x977   :  { %7899 = vmatpush1.bf16.msra.mxu1 %v7898_v2  ;;  %v2496_v2 = vld [vmem:[%s11031_s21 + $0x10] sm:$0xff] }
 0x978   :  { %7901 = vmatprep.subr.bf16.mxu1 %v7900_v60  ;;  %v2497_v60 = vld [vmem:[%s11031_s21 + $0x18] sm:$0xff] }
 0x979   :  { %v7910_v8 = vpack.c.bf16 %v2497_v60, %v2496_v2  ;;  %v2504_v60 = vld [vmem:[%s11031_s21 + $0x50] sm:$0xff] }
 0x97b   :  { %7903 = vmatpush1.bf16.msra.mxu1 %v7902_v48  ;;  %v2515_v48 = vld [vmem:[%s11031_s21 + $0xa8] sm:$0xff] }
 0x97c   :  { %7936 = vmatprep.subr.bf16.mxu1 %v11099_v21  ;;  %v7912_v54 = vpack.c.bf16 %v2515_v48, %v2514_v3  ;;  %v2522_v3 = vld [vmem:[%s11031_s21 + $0xe0] sm:$0xff]  ;;  %v2523_v48 = vld [vmem:[%s11031_s21 + $0xe8] sm:$0xff] }
 0x97d   :  { %v7928_v61 = vpack.c.bf16 %v2523_v48, %v2522_v3 }
 0xa47   :  { %v2341_v42 = vpop.f32.mrb[22].mxu0 }
 0xa48   :  { %v2342_v57 = vadd.f32 1e-06, %v2341_v42  ;;  %v6555_v23 = vpop.f32.mrb[23].mxu0  ;;  %v2500_v42 = vld [vmem:[%s11031_s21 + $0x30] sm:$0xff] }
 0xa49   :  { %v2501_v23 = vld [vmem:[%s11031_s21 + $0x38] sm:$0xff] }
 0xa4a   :  { %8507 = vrsqrt.f32 %v2342_v57  ;;  %v7916_v57 = vpack.c.bf16 %v2517_v13, %v2516_v25  ;;  %v2524_v25 = vld [vmem:[%s11031_s21 + $0xf0] sm:$0xff]  ;;  %v2525_v13 = vld [vmem:[%s11031_s21 + $0xf8] sm:$0xff] }
 0xa54   :  { %v8508_v6 = vpop.eup %8507 }
 0xa55   :  { %v2346_v30 = vmul.f32 %v8508_v6, %v2273_v38  ;;  %v2512_v38 = vld [vmem:[%s11031_s21 + $0x90] sm:$0xff]  ;;  %v2518_v6 = vld [vmem:[%s11031_s21 + $0xc0] sm:$0xff] }
 0xa56   :  { %v7908_v1 = vpack.c.bf16 %v2513_v36, %v2512_v38  ;;  %v2520_v38 = vld [vmem:[%s11031_s21 + $0xd0] sm:$0xff]  ;;  %v2521_v36 = vld [vmem:[%s11031_s21 + $0xd8] sm:$0xff] }
 0xa57   :  { %v2353_v47 = vmul.f32 %v4795_v45, %v2346_v30  ;;  %v2519_v45 = vld [vmem:[%s11031_s21 + $0xc8] sm:$0xff]  ;;  %v7918_v30 = vpack.c.bf16 %v2501_v23, %v2500_v42  ;;  %v7924_v2 = vpack.c.bf16 %v2521_v36, %v2520_v38  ;;  %v2508_v23 = vld [vmem:[%s11031_s21 + $0x70] sm:$0xff] }
 0xa58   :  { %7909 = vmatprep.subr.bf16.mxu0 %v7908_v1 }
 0xa59   :  { %v2360_v10 = vadd.f32 %v4796_v27, %v2353_v47  ;;  %7911 = vmatpush3.bf16.msra.mxu0 %v7910_v8  ;;  %v7920_v27 = vpack.c.bf16 %v2519_v45, %v2518_v6  ;;  %v2502_v47 = vld [vmem:[%s11031_s21 + $0x40] sm:$0xff]  ;;  %v2505_v8 = vld [vmem:[%s11031_s21 + $0x58] sm:$0xff] }
 0xa5a   :  { %7913 = vmatprep.subr.bf16.mxu0 %v7912_v54  ;;  %v7926_v54 = vpack.c.bf16 %v2505_v8, %v2504_v60  ;;  %v2509_v6 = vld [vmem:[%s11031_s21 + $0x78] sm:$0xff] }
 0xa5b   :  { %2470 = vmatmul.mubr.f32.vlgmr.msra.gmra.mrb[30].mxu1 %v2360_v10  ;;  %v2503_v10 = vld [vmem:[%s11031_s21 + $0x48] sm:$0xff]  ;;  %v7934_v45 = vpack.c.bf16 %v2509_v6, %v2508_v23 }
 0xa5c   :  { %7938 = vmatpush3.bf16.msra.mxu1 %v8966_v24  ;;  %6588 = vmatprep.mubr.msk.f32.mxu1 %vm8532_vm0, %v11098_v16  ;;  %v7922_v1 = vpack.c.bf16 %v2503_v10, %v2502_v47  ;;  %v2393_v10 = vld [vmem:[%s11034_s20] sm:$0x3] }
 0xa5d   :  { %7939 = vmatprep.subr.bf16.mxu1 %v11099_v21  ;;  %7915 = vmatpush3.bf16.msra.mxu0 %v7914_v17  ;;  %v2507_v17 = vld [vmem:[%s11031_s21 + $0x68] sm:$0xff] }
 0xa5e   :  { %7917 = vmatprep.subr.bf16.mxu0 %v7916_v57  ;;  %v7930_v42 = vpack.c.bf16 %v2507_v17, %v2506_v53  ;;  %v7932_v57 = vpack.c.bf16 %v2525_v13, %v2524_v25 }
 0xa60   :  { %7941 = vmatpush3.bf16.msra.mxu1 %v8977_v28 }
 0xa61   :  { %7942 = vmatprep.subr.bf16.mxu1 %v11099_v21  ;;  %7919 = vmatpush3.bf16.msra.mxu0 %v7918_v30  ;;  %v2395_v30 = vlaneseq }
 0xa62   :  { %7921 = vmatprep.subr.bf16.mxu0 %v7920_v27 }
 0xa63   :  { %v10192_v27 = vshrl.u32 %v2395_v30, 7 }
 0xa64   :  { %7944 = vmatpush3.bf16.msra.mxu1 %v8989_v31 }
 0xa65   :  { %7945 = vmatprep.subr.bf16.mxu1 %v11099_v21  ;;  %7923 = vmatpush3.bf16.msra.mxu0 %v7922_v1  ;;  %v2397_v47 = vsub.s32 0, %v10192_v27  ;;  %v11070_v38 = vsub.s32 1, %v10192_v27 }
 0xa66   :  { %7925 = vmatprep.subr.bf16.mxu0 %v7924_v2 }
 0xa67   :  { %v2398_v36 = vrot.slane %v2393_v10, %v2397_v47  ;;  %v2402_v1 = vrot.slane %v2393_v10, %v11070_v38 }
 0xa68   :  { %7947 = vmatpush3.bf16.msra.mxu1 %v9001_v34 }
 0xa69   :  { %7948 = vmatprep.subr.bf16.mxu1 %v11099_v21  ;;  %7927 = vmatpush3.bf16.msra.mxu0 %v7926_v54 }
 0xa6a   :  { %7929 = vmatprep.subr.bf16.mxu0 %v7928_v61 }
 0xa6c   :  { %7950 = vmatpush3.bf16.msra.mxu1 %v9013_v37 }
 0xa6d   :  { %7951 = vmatprep.subr.bf16.mxu1 %v11099_v21  ;;  %7931 = vmatpush3.bf16.msra.mxu0 %v7930_v42 }
 0xa6e   :  { %7933 = vmatprep.subr.bf16.mxu0 %v7932_v57 }
 0xa70   :  { %7953 = vmatpush3.bf16.msra.mxu1 %v9025_v40 }
 0xa71   :  { %7954 = vmatprep.subr.bf16.mxu1 %v11099_v21  ;;  %7935 = vmatpush3.bf16.msra.mxu0 %v7934_v45 }
 0xa72   :  { %7960 = vmatprep.subr.bf16.mxu0 %v11099_v21 }
 0xa74   :  { %7956 = vmatpush3.bf16.msra.mxu1 %v9037_v43 }
 0xa75   :  { %7957 = vmatprep.subr.bf16.mxu1 %v11099_v21 }
 0xa78   :  { %7959 = vmatpush3.bf16.msra.mxu1 %v9052_v46 }
 0xa79   :  { %7984 = vmatprep.subr.bf16.mxu1 %v11099_v21 }
 0xb2e   :  { %v2471_v2 = vpop.f32.mrb[30].mxu1 }
 0xb2f   :  { %v2472_v60 = vadd.f32 %v2471_v2, %v2398_v36  ;;  %v2473_v8 = vpop.f32.mrb[31].mxu1 }
 0xb30   :  { %v2474_v3 = vadd.f32 %v2473_v8, %v2402_v1 }
 0xb31   :  { %v2478_v48 = vmul.f32 0.044715, %v2472_v60  ;;  %v2476_v36 = vmul.f32 0.5, %v2472_v60 }
 0xb32   :  { %v2479_v54 = vmul.f32 0.044715, %v2474_v3  ;;  %v2477_v10 = vmul.f32 0.5, %v2474_v3 }
 0xb33   :  { %v2480_v61 = vmul.f32 %v2478_v48, %v2472_v60 }
 0xb34   :  { %v2481_v53 = vmul.f32 %v2479_v54, %v2474_v3 }
 0xb35   :  { %v2482_v17 = vmul.f32 %v2480_v61, %v2472_v60  ;;  %v4802_v61 = vld [vmem:[%s11083_s13 + $0x80] sm:$0xff] }
 0xb36   :  { %v2483_v25 = vmul.f32 %v2481_v53, %v2474_v3  ;;  %v4803_v53 = vld [vmem:[%s11083_s13 + $0x88] sm:$0xff] }
 0xb37   :  { %v2484_v13 = vadd.f32 %v2482_v17, %v2472_v60  ;;  %v7985_v17 = vpack.c.bf16 %v4803_v53, %v4802_v61  ;;  %v4808_v53 = vld [vmem:[%s11083_s13 + $0xb0] sm:$0xff] }
 0xb38   :  { %v2485_v42 = vadd.f32 %v2483_v25, %v2474_v3  ;;  %v4797_v3 = vld [vmem:[%s11035_s22] ss:$0 sm:$0xff]  ;;  %v4805_v25 = vld [vmem:[%s11083_s13 + $0x98] sm:$0xff] }
 0xb39   :  { %v2486_v57 = vmul.f32 0.7978845, %v2484_v13 }
 0xb3a   :  { %v2487_v23 = vmul.f32 0.7978845, %v2485_v42  ;;  %v4806_v42 = vld [vmem:[%s11083_s13 + $0xa0] sm:$0xff] }
 0xb3b   :  { %8509 = vtanh.f32 %v2486_v57  ;;  %v4807_v57 = vld [vmem:[%s11083_s13 + $0xa8] sm:$0xff] }
 0xb3c   :  { %8511 = vtanh.f32 %v2487_v23  ;;  %v7991_v23 = vpack.c.bf16 %v4807_v57, %v4806_v42  ;;  %v4810_v57 = vld [vmem:[%s11083_s13 + $0xc0] sm:$0xff] }
 0xb45   :  { %v8510_v6 = vpop.eup %8509 }
 0xb46   :  { %v8512_v45 = vpop.eup %8511  ;;  %v2490_v30 = vadd.f32 1.0, %v8510_v6  ;;  %v4820_v6 = vld [vmem:[%s11084_s27 + $0x80] sm:$0xff] }
 0xb47   :  { %v2491_v38 = vadd.f32 1.0, %v8512_v45  ;;  %v4821_v45 = vld [vmem:[%s11084_s27 + $0x88] sm:$0xff] }
 0xb48   :  { %v2492_v1 = vmul.f32 %v2490_v30, %v2476_v36 }
 0xb49   :  { %v2493_v2 = vmul.f32 %v2491_v38, %v2477_v10 }
 0xb4b   :  { %2590 = vmatprep.mubr.f32.mxu0 %v2493_v2  ;;  %v8009_v2 = vpack.c.bf16 %v4821_v45, %v4820_v6  ;;  %v4828_v6 = vld [vmem:[%s11084_s27 + $0xc0] sm:$0xff] }
 0xb4c   :  { %2591 = vmatmul.mubr.f32.vlgmr.msra.gmra.mrb[24].mxu0 %v2492_v1 }
 0xb4d   :  { %7962 = vmatpush3.bf16.msra.mxu0 %v8966_v24  ;;  %6623 = vmatprep.mubr.msk.f32.mxu0 %vm8532_vm0, %v11098_v16 }
 0xb4e   :  { %7963 = vmatprep.subr.bf16.mxu0 %v11099_v21 }
 0xb51   :  { %7965 = vmatpush3.bf16.msra.mxu0 %v8977_v28 }
 0xb52   :  { %7966 = vmatprep.subr.bf16.mxu0 %v11099_v21 }
 0xb55   :  { %7968 = vmatpush3.bf16.msra.mxu0 %v8989_v31 }
 0xb56   :  { %7969 = vmatprep.subr.bf16.mxu0 %v11099_v21 }
 0xb59   :  { %7971 = vmatpush3.bf16.msra.mxu0 %v9001_v34 }
 0xb5a   :  { %7972 = vmatprep.subr.bf16.mxu0 %v11099_v21 }
 0xb5d   :  { %7974 = vmatpush3.bf16.msra.mxu0 %v9013_v37 }
 0xb5e   :  { %7975 = vmatprep.subr.bf16.mxu0 %v11099_v21 }
 0xb61   :  { %7977 = vmatpush3.bf16.msra.mxu0 %v9025_v40 }
 0xb62   :  { %7978 = vmatprep.subr.bf16.mxu0 %v11099_v21 }
 0xb65   :  { %7980 = vmatpush3.bf16.msra.mxu0 %v9037_v43 }
 0xb66   :  { %7981 = vmatprep.subr.bf16.mxu0 %v11099_v21 }
 0xb69   :  { %7983 = vmatpush3.bf16.msra.mxu0 %v9052_v46 }
 0xb6a   :  { %8008 = vmatprep.subr.bf16.mxu0 %v11099_v21 }
 0xc1f   :  { %v5438_v38 = vpop.f32.mrb[24].mxu0 }
 0xc20   :  { %v5439_v60 = vpop.f32.mrb[25].mxu0 }
 0xc21   :  { %v5440_v8 = vadd.f32 %v5439_v60, %v5438_v38  ;;  %v4822_v38 = vld [vmem:[%s11084_s27 + $0x90] sm:$0xff]  ;;  %v4823_v60 = vld [vmem:[%s11084_s27 + $0x98] sm:$0xff] }
 0xc23   :  { %v2596_v48 = vadd.f32 %v5440_v8, %v9969_v32  ;;  %v4804_v32 = vld [vmem:[%s11083_s13 + $0x90] sm:$0xff]  ;;  %v8012_v8 = vpack.c.bf16 %v4823_v60, %v4822_v38  ;;  %v4831_v60 = vld [vmem:[%s11084_s27 + $0xd8] sm:$0xff] }
 0xc24   :  { %v7988_v13 = vpack.c.bf16 %v4805_v25, %v4804_v32  ;;  %v4826_v25 = vld [vmem:[%s11084_s27 + $0xb0] sm:$0xff] }
 0xc25   :  { %v10225_v54 = vadd.f32 %v4797_v3, %v2596_v48  ;;  %v4824_v3 = vld [vmem:[%s11084_s27 + $0xa0] sm:$0xff]  ;;  %v4825_v48 = vld [vmem:[%s11084_s27 + $0xa8] sm:$0xff]  ;;  %v4830_v38 = vld [vmem:[%s11084_s27 + $0xd0] sm:$0xff] }
 0xc26   :  { %v8015_v61 = vpack.c.bf16 %v4825_v48, %v4824_v3  ;;  %v8024_v3 = vpack.c.bf16 %v4831_v60, %v4830_v38  ;;  %v4814_v48 = vld [vmem:[%s11083_s13 + $0xe0] sm:$0xff] }
 0xc27   :  { %6589 = vmatmul.mubr.f32.vlgmr.msra.gmra.mrb[32].mxu1 %v10225_v54  ;;  %v4800_v38 = vld [vmem:[%s11085_s28 + $0x1] ss:$0 sm:$0xff] }
 0xc28   :  { %6658 = vmatprep.mubr.msk.f32.mxu1 %vm8532_vm0, %v11098_v16  ;;  %7986 = vmatpush3.bf16.msra.mxu1 %v7985_v17  ;;  %v4809_v17 = vld [vmem:[%s11083_s13 + $0xb8] sm:$0xff] }
 0xc29   :  { %7987 = vmatprep.subr.bf16.mxu1 %v11099_v21  ;;  %v7994_v32 = vpack.c.bf16 %v4809_v17, %v4808_v53  ;;  %v4832_v53 = vld [vmem:[%s11084_s27 + $0xe0] sm:$0xff]  ;;  %v4833_v17 = vld [vmem:[%s11084_s27 + $0xe8] sm:$0xff] }
 0xc2c   :  { %7989 = vmatpush3.bf16.msra.mxu1 %v7988_v13  ;;  %v4827_v13 = vld [vmem:[%s11084_s27 + $0xb8] sm:$0xff] }
 0xc2d   :  { %7990 = vmatprep.subr.bf16.mxu1 %v11099_v21  ;;  %v8018_v42 = vpack.c.bf16 %v4827_v13, %v4826_v25  ;;  %v8027_v25 = vpack.c.bf16 %v4833_v17, %v4832_v53  ;;  %v4816_v13 = vld [vmem:[%s11083_s13 + $0xf0] sm:$0xff] }
 0xc30   :  { %7992 = vmatpush3.bf16.msra.mxu1 %v7991_v23  ;;  %v4811_v23 = vld [vmem:[%s11083_s13 + $0xc8] sm:$0xff] }
 0xc31   :  { %7993 = vmatprep.subr.bf16.mxu1 %v11099_v21  ;;  %v7997_v45 = vpack.c.bf16 %v4811_v23, %v4810_v57  ;;  %v4834_v57 = vld [vmem:[%s11084_s27 + $0xf0] sm:$0xff]  ;;  %v4835_v23 = vld [vmem:[%s11084_s27 + $0xf8] sm:$0xff] }
 0xc34   :  { %7995 = vmatpush3.bf16.msra.mxu1 %v7994_v32 }
 0xc35   :  { %7996 = vmatprep.subr.bf16.mxu1 %v11099_v21 }
 0xc38   :  { %7998 = vmatpush3.bf16.msra.mxu1 %v7997_v45  ;;  %v8030_v45 = vpack.c.bf16 %v4835_v23, %v4834_v57  ;;  %v4844_v23 = vld [vmem:[%s11086_s1 + $0xb0] sm:$0xff] }
 0xc39   :  { %7999 = vmatprep.subr.bf16.mxu1 %v11099_v21 }
 0xcfa   :  { %v2675_v30 = vpop.f32.mrb[32].mxu1 }
 0xcfb   :  { %v10258_v10 = vsub.f32 %v10225_v54, %v2675_v30  ;;  %v6590_v36 = vpop.f32.mrb[33].mxu1  ;;  %v4829_v30 = vld [vmem:[%s11084_s27 + $0xc8] sm:$0xff] }
 0xcfc   :  { %v4812_v36 = vld [vmem:[%s11083_s13 + $0xd0] sm:$0xff] }
 0xcfd   :  { %v2680_v1 = vmul.f32 %v10258_v10, %v10258_v10 }
 0xcff   :  { %6624 = vmatmul.mubr.f32.vlgmr.msra.gmra.mrb[26].mxu0 %v2680_v1  ;;  %v8021_v1 = vpack.c.bf16 %v4829_v30, %v4828_v6 }
 0xd00   :  { %8010 = vmatpush3.bf16.msra.mxu0 %v8009_v2  ;;  %6693 = vmatprep.mubr.msk.f32.mxu0 %vm8532_vm0, %v11098_v16  ;;  %v4813_v2 = vld [vmem:[%s11083_s13 + $0xd8] sm:$0xff] }
 0xd01   :  { %8011 = vmatprep.subr.bf16.mxu0 %v11099_v21 }
 0xd04   :  { %8013 = vmatpush3.bf16.msra.mxu0 %v8012_v8  ;;  %v8000_v8 = vpack.c.bf16 %v4813_v2, %v4812_v36 }
 0xd05   :  { %8014 = vmatprep.subr.bf16.mxu0 %v11099_v21 }
 0xd06   :  { %8001 = vmatpush3.bf16.msra.mxu1 %v8000_v8  ;;  %v4838_v8 = vld [vmem:[%s11086_s1 + $0x80] sm:$0xff] }
 0xd07   :  { %8002 = vmatprep.subr.bf16.mxu1 %v11099_v21 }
 0xd08   :  { %8016 = vmatpush3.bf16.msra.mxu0 %v8015_v61  ;;  %v4815_v61 = vld [vmem:[%s11083_s13 + $0xe8] sm:$0xff] }
 0xd09   :  { %8017 = vmatprep.subr.bf16.mxu0 %v11099_v21  ;;  %v8003_v32 = vpack.c.bf16 %v4815_v61, %v4814_v48  ;;  %v4801_v48 = vld [vmem:[%s11021_s8 + $0x1] ss:$0 sm:$0xff] }
 0xd0b   :  { %8004 = vmatpush3.bf16.msra.mxu1 %v8003_v32  ;;  %v4840_v32 = vld [vmem:[%s11086_s1 + $0x90] sm:$0xff] }
 0xd0c   :  { %8019 = vmatpush3.bf16.msra.mxu0 %v8018_v42  ;;  %v4817_v42 = vld [vmem:[%s11083_s13 + $0xf8] sm:$0xff]  ;;  %8005 = vmatprep.subr.bf16.mxu1 %v11099_v21 }
 0xd0d   :  { %8020 = vmatprep.subr.bf16.mxu0 %v11099_v21  ;;  %v8006_v6 = vpack.c.bf16 %v4817_v42, %v4816_v13  ;;  %v4842_v13 = vld [vmem:[%s11086_s1 + $0xa0] sm:$0xff]  ;;  %v4843_v42 = vld [vmem:[%s11086_s1 + $0xa8] sm:$0xff] }
 0xd0e   :  { %v8039_v57 = vpack.c.bf16 %v4843_v42, %v4842_v13 }
 0xd0f   :  { %8007 = vmatpush3.bf16.msra.mxu1 %v8006_v6  ;;  %v4845_v6 = vld [vmem:[%s11086_s1 + $0xb8] sm:$0xff] }
 0xd10   :  { %8022 = vmatpush3.bf16.msra.mxu0 %v8021_v1  ;;  %8032 = vmatprep.subr.bf16.mxu1 %v11099_v21 }
 0xd11   :  { %8023 = vmatprep.subr.bf16.mxu0 %v11099_v21 }
 0xd14   :  { %8025 = vmatpush3.bf16.msra.mxu0 %v8024_v3  ;;  %v4839_v3 = vld [vmem:[%s11086_s1 + $0x88] sm:$0xff] }
 0xd15   :  { %8026 = vmatprep.subr.bf16.mxu0 %v11099_v21  ;;  %v8033_v53 = vpack.c.bf16 %v4839_v3, %v4838_v8  ;;  %v4850_v8 = vld [vmem:[%s11086_s1 + $0xe0] sm:$0xff]  ;;  %v4851_v3 = vld [vmem:[%s11086_s1 + $0xe8] sm:$0xff] }
 0xd18   :  { %8028 = vmatpush3.bf16.msra.mxu0 %v8027_v25 }
 0xd19   :  { %8029 = vmatprep.subr.bf16.mxu0 %v11099_v21 }
 0xd1c   :  { %8031 = vmatpush3.bf16.msra.mxu0 %v8030_v45  ;;  %v8042_v45 = vpack.c.bf16 %v4845_v6, %v4844_v23  ;;  %v11108_v6 = vld [vmem:[#allocation10_spill] sm:$0xff] }
 0xd1d   :  { %8056 = vmatprep.subr.bf16.mxu0 %v11099_v21 }
 0xdd2   :  { %v2747_v30 = vpop.f32.mrb[26].mxu0 }
 0xdd3   :  { %v2748_v36 = vadd.f32 1e-06, %v2747_v30  ;;  %v6625_v2 = vpop.f32.mrb[27].mxu0  ;;  %v4846_v30 = vld [vmem:[%s11086_s1 + $0xc0] sm:$0xff] }
 0xdd5   :  { %8513 = vrsqrt.f32 %v2748_v36  ;;  %v4847_v36 = vld [vmem:[%s11086_s1 + $0xc8] sm:$0xff] }
 0xdd6   :  { %v8045_v2 = vpack.c.bf16 %v4847_v36, %v4846_v30  ;;  %v11110_v30 = vld [vmem:[#allocation12_spill] sm:$0xff] }
 0xddf   :  { %v8514_v1 = vpop.eup %8513 }
 0xde0   :  { %v2752_v60 = vmul.f32 %v8514_v1, %v10258_v10  ;;  %v4841_v10 = vld [vmem:[%s11086_s1 + $0x98] sm:$0xff]  ;;  %v4848_v1 = vld [vmem:[%s11086_s1 + $0xd0] sm:$0xff] }
 0xde1   :  { %v8036_v25 = vpack.c.bf16 %v4841_v10, %v4840_v32 }
 0xde2   :  { %v2759_v61 = vmul.f32 %v4800_v38, %v2752_v60  ;;  %v4849_v38 = vld [vmem:[%s11086_s1 + $0xd8] sm:$0xff] }
 0xde3   :  { %v8048_v60 = vpack.c.bf16 %v4849_v38, %v4848_v1 }
 0xde4   :  { %v2766_v17 = vadd.f32 %v4801_v48, %v2759_v61  ;;  %v8051_v48 = vpack.c.bf16 %v4851_v3, %v4850_v8  ;;  %v4852_v61 = vld [vmem:[%s11086_s1 + $0xf0] sm:$0xff] }
 0xde6   :  { %6659 = vmatmul.mubr.f32.vlgmr.msra.gmra.mrb[34].mxu1 %v2766_v17  ;;  %6694 = vmatmul.mubr.f32.vlgmr.msra.gmra.mrb[28].mxu0 %v2766_v17 }
 0xde7   :  { %8034 = vmatpush3.bf16.msra.mxu1 %v8033_v53  ;;  %6728 = vmatprep.mubr.msk.f32.mxu1 %vm8532_vm0, %v11098_v16  ;;  %v4853_v53 = vld [vmem:[%s11086_s1 + $0xf8] sm:$0xff] }
 0xde8   :  { %8035 = vmatprep.subr.bf16.mxu1 %v11099_v21  ;;  %8058 = vmatpush3.bf16.msra.mxu0 %v9216_v12  ;;  %v8054_v32 = vpack.c.bf16 %v4853_v53, %v4852_v61  ;;  %v4860_v53 = vld [vmem:[%s11028_s15 + $0x80] sm:$0xff] }
 0xde9   :  { %8059 = vmatprep.subr.bf16.mxu0 %v11099_v21  ;;  %6763 = vmatprep.mubr.msk.f32.mxu0 %vm8532_vm0, %v11098_v16 }
 0xdeb   :  { %8037 = vmatpush3.bf16.msra.mxu1 %v8036_v25  ;;  %v4819_v25 = vld [vmem:[%s11026_s10 + $0x1] ss:$0 sm:$0xff] }
 0xdec   :  { %8038 = vmatprep.subr.bf16.mxu1 %v11099_v21  ;;  %8061 = vmatpush3.bf16.msra.mxu0 %v9236_v18 }
 0xded   :  { %8062 = vmatprep.subr.bf16.mxu0 %v11099_v21 }
 0xdef   :  { %8040 = vmatpush3.bf16.msra.mxu1 %v8039_v57 }
 0xdf0   :  { %8041 = vmatprep.subr.bf16.mxu1 %v11099_v21  ;;  %8064 = vmatpush3.bf16.msra.mxu0 %v9255_v26 }
 0xdf1   :  { %8065 = vmatprep.subr.bf16.mxu0 %v11099_v21 }
 0xdf3   :  { %8043 = vmatpush3.bf16.msra.mxu1 %v8042_v45  ;;  %v11109_v45 = vld [vmem:[#allocation11_spill] sm:$0xff] }
 0xdf4   :  { %8044 = vmatprep.subr.bf16.mxu1 %v11099_v21  ;;  %8067 = vmatpush3.bf16.msra.mxu0 %v9272_v35 }
 0xdf5   :  { %8068 = vmatprep.subr.bf16.mxu0 %v11099_v21 }
 0xdf7   :  { %8046 = vmatpush3.bf16.msra.mxu1 %v8045_v2 }
 0xdf8   :  { %8047 = vmatprep.subr.bf16.mxu1 %v11099_v21  ;;  %8070 = vmatpush3.bf16.msra.mxu0 %v9289_v44 }
 0xdf9   :  { %8071 = vmatprep.subr.bf16.mxu0 %v11099_v21 }
 0xdfb   :  { %8049 = vmatpush3.bf16.msra.mxu1 %v8048_v60 }
 0xdfc   :  { %8050 = vmatprep.subr.bf16.mxu1 %v11099_v21  ;;  %8073 = vmatpush3.bf16.msra.mxu0 %v9306_v52 }
 0xdfd   :  { %8074 = vmatprep.subr.bf16.mxu0 %v11099_v21 }
 0xdff   :  { %8052 = vmatpush3.bf16.msra.mxu1 %v8051_v48 }
 0xe00   :  { %8053 = vmatprep.subr.bf16.mxu1 %v11099_v21  ;;  %8076 = vmatpush3.bf16.msra.mxu0 %v9323_v58 }
 0xe01   :  { %8077 = vmatprep.subr.bf16.mxu0 %v11099_v21 }
 0xe03   :  { %8055 = vmatpush3.bf16.msra.mxu1 %v8054_v32  ;;  %v4861_v32 = vld [vmem:[%s11028_s15 + $0x88] sm:$0xff] }
 0xe04   :  { %8079 = vmatpush3.bf16.msra.mxu0 %v9353_v63  ;;  %8080 = vmatprep.subr.bf16.mxu1 %v11099_v21 }
 0xe05   :  { %8104 = vmatprep.subr.bf16.mxu0 %v11099_v21 }
 0xe06   :  { %6729 = vmatmul.mubr.f32.vlgmr.msra.gmra.mrb[36].mxu1 %v2766_v17 }
 0xe07   :  { %8082 = vmatpush3.bf16.msra.mxu1 %v9216_v12  ;;  %6798 = vmatprep.mubr.msk.f32.mxu1 %vm8532_vm0, %v11098_v16  ;;  %v4837_v12 = vld [vmem:[%s11024_s12 + $0x1] ss:$0 sm:$0xff] }
 0xe08   :  { %8083 = vmatprep.subr.bf16.mxu1 %v11099_v21 }
 0xe0b   :  { %8085 = vmatpush3.bf16.msra.mxu1 %v9236_v18 }
 0xe0c   :  { %8086 = vmatprep.subr.bf16.mxu1 %v11099_v21 }
 0xe0f   :  { %8088 = vmatpush3.bf16.msra.mxu1 %v9255_v26 }
 0xe10   :  { %8089 = vmatprep.subr.bf16.mxu1 %v11099_v21 }
 0xe13   :  { %8091 = vmatpush3.bf16.msra.mxu1 %v9272_v35 }
 0xe14   :  { %8092 = vmatprep.subr.bf16.mxu1 %v11099_v21 }
 0xe17   :  { %8094 = vmatpush3.bf16.msra.mxu1 %v9289_v44 }
 0xe18   :  { %8095 = vmatprep.subr.bf16.mxu1 %v11099_v21 }
 0xe1b   :  { %8097 = vmatpush3.bf16.msra.mxu1 %v9306_v52 }
 0xe1c   :  { %8098 = vmatprep.subr.bf16.mxu1 %v11099_v21 }
 0xe1f   :  { %8100 = vmatpush3.bf16.msra.mxu1 %v9323_v58  ;;  %v4855_v58 = vld [vmem:[%s11025_s14 + $0x1] ss:$0 sm:$0xff] }
 0xe20   :  { %8101 = vmatprep.subr.bf16.mxu1 %v11099_v21 }
 0xe23   :  { %8103 = vmatpush3.bf16.msra.mxu1 %v9353_v63 }
 0xe24   :  { %8128 = vmatprep.subr.bf16.mxu1 %v11099_v21 }
 0xeb9   :  { %v10453_v18 = vpop.f32.mrb[34].mxu1  ;;  %v2953_v26 = vpop.f32.mrb[28].mxu0 }
 0xeba   :  { %v10455_v35 = vadd.f32 %v4837_v12, %v2953_v26  ;;  %v6660_v44 = vpop.f32.mrb[35].mxu1  ;;  %v6695_v52 = vpop.f32.mrb[29].mxu0  ;;  %v10523_v13 = vadd.f32 %v4819_v25, %v10453_v18  ;;  %v4862_v12 = vld [vmem:[%s11028_s15 + $0x90] sm:$0xff]  ;;  %v8357_v18 = vpack.c.bf16 %v4861_v32, %v4860_v53  ;;  %v4863_v26 = vld [vmem:[%s11028_s15 + $0x98] sm:$0xff]  ;;  %v4872_v53 = vld [vmem:[%s11028_s15 + $0xe0] sm:$0xff] }
 0xebb   :  { %v4864_v44 = vld [vmem:[%s11028_s15 + $0xa0] sm:$0xff]  ;;  %v4865_v52 = vld [vmem:[%s11028_s15 + $0xa8] sm:$0xff] }
 0xebc   :  { %6764 = vmatmul.mubr.f32.vlgmr.msra.gmra.mrb[30].mxu0 %v10455_v35  ;;  %v4873_v32 = vld [vmem:[%s11028_s15 + $0xe8] sm:$0xff] }
 0xebd   :  { %8106 = vmatpush3.bf16.msra.mxu0 %v9370_v5  ;;  %6833 = vmatprep.mubr.msk.f32.mxu0 %vm8532_vm0, %v11098_v16 }
 0xebe   :  { %8107 = vmatprep.subr.bf16.mxu0 %v11099_v21 }
 0xec1   :  { %8109 = vmatpush3.bf16.msra.mxu0 %v9382_v11 }
 0xec2   :  { %8110 = vmatprep.subr.bf16.mxu0 %v11099_v21 }
 0xec5   :  { %8112 = vmatpush3.bf16.msra.mxu0 %v9394_v15 }
 0xec6   :  { %8113 = vmatprep.subr.bf16.mxu0 %v11099_v21 }
 0xec9   :  { %8115 = vmatpush3.bf16.msra.mxu0 %v9404_v19 }
 0xeca   :  { %8116 = vmatprep.subr.bf16.mxu0 %v11099_v21 }
 0xecd   :  { %8118 = vmatpush3.bf16.msra.mxu0 %v9414_v22 }
 0xece   :  { %8119 = vmatprep.subr.bf16.mxu0 %v11099_v21 }
 0xed1   :  { %8121 = vmatpush3.bf16.msra.mxu0 %v9424_v29 }
 0xed2   :  { %8122 = vmatprep.subr.bf16.mxu0 %v11099_v21 }
 0xed5   :  { %8124 = vmatpush3.bf16.msra.mxu0 %v9434_v33 }
 0xed6   :  { %8125 = vmatprep.subr.bf16.mxu0 %v11099_v21 }
 0xed9   :  { %v3048_v63 = vpop.f32.mrb[36].mxu1  ;;  %8127 = vmatpush3.bf16.msra.mxu0 %v9444_v39 }
 0xeda   :  { %v10478_v17 = vadd.f32 %v4855_v58, %v3048_v63  ;;  %v6730_v10 = vpop.f32.mrb[37].mxu1  ;;  %8152 = vmatprep.subr.bf16.mxu0 %v11099_v21  ;;  %v8363_v58 = vpack.c.bf16 %v4865_v52, %v4864_v44  ;;  %v4866_v63 = vld [vmem:[%s11028_s15 + $0xb0] sm:$0xff] }
 0xedc   :  { %6799 = vmatmul.mubr.f32.vlgmr.msra.gmra.mrb[38].mxu1 %v10478_v17 }
 0xedd   :  { %8130 = vmatpush3.bf16.msra.mxu1 %v9456_v49  ;;  %6868 = vmatprep.mubr.msk.f32.mxu1 %vm8532_vm0, %v11098_v16 }
 0xede   :  { %8131 = vmatprep.subr.bf16.mxu1 %v11099_v21 }
 0xee1   :  { %8133 = vmatpush3.bf16.msra.mxu1 %v9470_v55 }
 0xee2   :  { %8134 = vmatprep.subr.bf16.mxu1 %v11099_v21 }
 0xee5   :  { %8136 = vmatpush3.bf16.msra.mxu1 %v9482_v59 }
 0xee6   :  { %8137 = vmatprep.subr.bf16.mxu1 %v11099_v21 }
 0xee9   :  { %8139 = vmatpush3.bf16.msra.mxu1 %v9492_v0 }
 0xeea   :  { %8140 = vmatprep.subr.bf16.mxu1 %v11099_v21 }
 0xeed   :  { %8142 = vmatpush3.bf16.msra.mxu1 %v9502_v4 }
 0xeee   :  { %8143 = vmatprep.subr.bf16.mxu1 %v11099_v21 }
 0xef1   :  { %8145 = vmatpush3.bf16.msra.mxu1 %v9512_v9 }
 0xef2   :  { %8146 = vmatprep.subr.bf16.mxu1 %v11099_v21 }
 0xef5   :  { %8148 = vmatpush3.bf16.msra.mxu1 %v9522_v14 }
 0xef6   :  { %8149 = vmatprep.subr.bf16.mxu1 %v11099_v21 }
 0xef9   :  { %8151 = vmatpush3.bf16.msra.mxu1 %v9532_v20 }
 0xefa   :  { %8176 = vmatprep.subr.bf16.mxu1 %v11099_v21 }
 0xefc   :  { %6869 = vmatmul.mubr.f32.vlgmr.msra.gmra.mrb[40].mxu1 %v10455_v35 }
 0xefd   :  { %8178 = vmatpush3.bf16.msra.mxu1 %v9370_v5  ;;  %6938 = vmatprep.mubr.msk.f32.mxu1 %vm8532_vm0, %v11098_v16 }
 0xefe   :  { %8179 = vmatprep.subr.bf16.mxu1 %v11099_v21 }
 0xf01   :  { %8181 = vmatpush3.bf16.msra.mxu1 %v9382_v11 }
 0xf02   :  { %8182 = vmatprep.subr.bf16.mxu1 %v11099_v21 }
 0xf05   :  { %8184 = vmatpush3.bf16.msra.mxu1 %v9394_v15 }
 0xf06   :  { %8185 = vmatprep.subr.bf16.mxu1 %v11099_v21 }
 0xf09   :  { %8187 = vmatpush3.bf16.msra.mxu1 %v9404_v19 }
 0xf0a   :  { %8188 = vmatprep.subr.bf16.mxu1 %v11099_v21 }
 0xf0d   :  { %8190 = vmatpush3.bf16.msra.mxu1 %v9414_v22 }
 0xf0e   :  { %8191 = vmatprep.subr.bf16.mxu1 %v11099_v21 }
 0xf11   :  { %8193 = vmatpush3.bf16.msra.mxu1 %v9424_v29 }
 0xf12   :  { %8194 = vmatprep.subr.bf16.mxu1 %v11099_v21 }
 0xf15   :  { %8196 = vmatpush3.bf16.msra.mxu1 %v9434_v33 }
 0xf16   :  { %8197 = vmatprep.subr.bf16.mxu1 %v11099_v21 }
 0xf19   :  { %8199 = vmatpush3.bf16.msra.mxu1 %v9444_v39 }
 0xf1a   :  { %8224 = vmatprep.subr.bf16.mxu1 %v11099_v21 }
 0xf8f   :  { %v3118_v42 = vpop.f32.mrb[30].mxu0 }
 0xf90   :  { %v3192_v57 = vmul.f32 %v3118_v42, %v10523_v13  ;;  %v6765_v23 = vpop.f32.mrb[31].mxu0 }
 0xf92   :  { %6834 = vmatmul.mubr.f32.vlgmr.msra.gmra.mrb[32].mxu0 %v3192_v57 }
 0xf93   :  { %8154 = vmatpush3.bf16.msra.mxu0 %v9456_v49  ;;  %6903 = vmatprep.mubr.msk.f32.mxu0 %vm8532_vm0, %v11098_v16 }
 0xf94   :  { %8155 = vmatprep.subr.bf16.mxu0 %v11099_v21 }
 0xf97   :  { %8157 = vmatpush3.bf16.msra.mxu0 %v9470_v55 }
 0xf98   :  { %8158 = vmatprep.subr.bf16.mxu0 %v11099_v21 }
 0xf9b   :  { %8160 = vmatpush3.bf16.msra.mxu0 %v9482_v59  ;;  %v11100_v59 = vld [vmem:[#allocation2_spill] sm:$0xff] }
 0xf9c   :  { %8161 = vmatprep.subr.bf16.mxu0 %v11099_v21 }
 0xf9f   :  { %8163 = vmatpush3.bf16.msra.mxu0 %v9492_v0  ;;  %v11101_v0 = vld [vmem:[#allocation3_spill] sm:$0xff] }
 0xfa0   :  { %8164 = vmatprep.subr.bf16.mxu0 %v11099_v21 }
 0xfa3   :  { %8166 = vmatpush3.bf16.msra.mxu0 %v9502_v4 }
 0xfa4   :  { %8167 = vmatprep.subr.bf16.mxu0 %v11099_v21 }
 0xfa7   :  { %8169 = vmatpush3.bf16.msra.mxu0 %v9512_v9  ;;  %v11102_v9 = vld [vmem:[#allocation4_spill] sm:$0xff] }
 0xfa8   :  { %8170 = vmatprep.subr.bf16.mxu0 %v11099_v21 }
 0xfab   :  { %8172 = vmatpush3.bf16.msra.mxu0 %v9522_v14 }
 0xfac   :  { %8173 = vmatprep.subr.bf16.mxu0 %v11099_v21 }
 0xfaf   :  { %v10542_v49 = vpop.f32.mrb[38].mxu1  ;;  %8175 = vmatpush3.bf16.msra.mxu0 %v9532_v20 }
 0xfb0   :  { %v6800_v55 = vpop.f32.mrb[39].mxu1  ;;  %8200 = vmatprep.subr.bf16.mxu0 %v11099_v21 }
 0xfb2   :  { %6904 = vmatmul.mubr.f32.vlgmr.msra.gmra.mrb[34].mxu0 %v10478_v17 }
 0xfb3   :  { %8202 = vmatpush3.bf16.msra.mxu0 %v9588_v41  ;;  %6973 = vmatprep.mubr.msk.f32.mxu0 %vm8532_vm0, %v11098_v16 }
 0xfb4   :  { %8203 = vmatprep.subr.bf16.mxu0 %v11099_v21 }
 0xfb7   :  { %8205 = vmatpush3.bf16.msra.mxu0 %v9599_v51 }
 0xfb8   :  { %8206 = vmatprep.subr.bf16.mxu0 %v11099_v21 }
 0xfbb   :  { %8208 = vmatpush3.bf16.msra.mxu0 %v9611_v56 }
 0xfbc   :  { %8209 = vmatprep.subr.bf16.mxu0 %v11099_v21 }
 0xfbf   :  { %8211 = vmatpush3.bf16.msra.mxu0 %v9621_v62 }
 0xfc0   :  { %8212 = vmatprep.subr.bf16.mxu0 %v11099_v21 }
 0xfc3   :  { %8214 = vmatpush3.bf16.msra.mxu0 %v9631_v7 }
 0xfc4   :  { %8215 = vmatprep.subr.bf16.mxu0 %v11099_v21 }
 0xfc7   :  { %8217 = vmatpush3.bf16.msra.mxu0 %v11100_v59 }
 0xfc8   :  { %8218 = vmatprep.subr.bf16.mxu0 %v11099_v21 }
 0xfcb   :  { %8220 = vmatpush3.bf16.msra.mxu0 %v11101_v0 }
 0xfcc   :  { %8221 = vmatprep.subr.bf16.mxu0 %v11099_v21 }
 0xfcf   :  { %v3330_v4 = vpop.f32.mrb[40].mxu1  ;;  %8223 = vmatpush3.bf16.msra.mxu0 %v11102_v9 }
 0xfd0   :  { %v3404_v14 = vmul.f32 %v3330_v4, %v10523_v13  ;;  %v6870_v20 = vpop.f32.mrb[41].mxu1  ;;  %8248 = vmatprep.subr.bf16.mxu0 %v11099_v21 }
 0xfd2   :  { %6939 = vmatmul.mubr.f32.vlgmr.msra.gmra.mrb[42].mxu1 %v3404_v14  ;;  %6974 = vmatmul.mubr.f32.vlgmr.msra.gmra.mrb[36].mxu0 %v10455_v35 }
 0xfd3   :  { %8226 = vmatpush3.bf16.msra.mxu1 %v9588_v41  ;;  %7008 = vmatprep.mubr.msk.f32.mxu1 %vm8532_vm0, %v11098_v16  ;;  %v11103_v41 = vld [vmem:[#allocation5_spill] sm:$0xff] }
 0xfd4   :  { %8227 = vmatprep.subr.bf16.mxu1 %v11099_v21  ;;  %8250 = vmatpush3.bf16.msra.mxu0 %v9370_v5 }
 0xfd5   :  { %8251 = vmatprep.subr.bf16.mxu0 %v11099_v21  ;;  %7043 = vmatprep.mubr.msk.f32.mxu0 %vm8532_vm0, %v11098_v16 }
 0xfd7   :  { %8229 = vmatpush3.bf16.msra.mxu1 %v9599_v51  ;;  %v11104_v51 = vld [vmem:[#allocation6_spill] sm:$0xff] }
 0xfd8   :  { %8230 = vmatprep.subr.bf16.mxu1 %v11099_v21  ;;  %8253 = vmatpush3.bf16.msra.mxu0 %v9382_v11 }
 0xfd9   :  { %8254 = vmatprep.subr.bf16.mxu0 %v11099_v21 }
 0xfdb   :  { %8232 = vmatpush3.bf16.msra.mxu1 %v9611_v56  ;;  %v11105_v56 = vld [vmem:[#allocation7_spill] sm:$0xff] }
 0xfdc   :  { %8233 = vmatprep.subr.bf16.mxu1 %v11099_v21  ;;  %8256 = vmatpush3.bf16.msra.mxu0 %v9394_v15 }
 0xfdd   :  { %8257 = vmatprep.subr.bf16.mxu0 %v11099_v21 }
 0xfdf   :  { %8235 = vmatpush3.bf16.msra.mxu1 %v9621_v62  ;;  %v11106_v62 = vld [vmem:[#allocation8_spill] sm:$0xff] }
 0xfe0   :  { %8236 = vmatprep.subr.bf16.mxu1 %v11099_v21  ;;  %8259 = vmatpush3.bf16.msra.mxu0 %v9404_v19 }
 0xfe1   :  { %8260 = vmatprep.subr.bf16.mxu0 %v11099_v21 }
 0xfe3   :  { %8238 = vmatpush3.bf16.msra.mxu1 %v9631_v7  ;;  %v11107_v7 = vld [vmem:[#allocation9_spill] sm:$0xff] }
 0xfe4   :  { %8239 = vmatprep.subr.bf16.mxu1 %v11099_v21  ;;  %8262 = vmatpush3.bf16.msra.mxu0 %v9414_v22 }
 0xfe5   :  { %8263 = vmatprep.subr.bf16.mxu0 %v11099_v21 }
 0xfe7   :  { %8241 = vmatpush3.bf16.msra.mxu1 %v11100_v59 }
 0xfe8   :  { %8242 = vmatprep.subr.bf16.mxu1 %v11099_v21  ;;  %8265 = vmatpush3.bf16.msra.mxu0 %v9424_v29 }
 0xfe9   :  { %8266 = vmatprep.subr.bf16.mxu0 %v11099_v21 }
 0xfeb   :  { %8244 = vmatpush3.bf16.msra.mxu1 %v11101_v0 }
 0xfec   :  { %8245 = vmatprep.subr.bf16.mxu1 %v11099_v21  ;;  %8268 = vmatpush3.bf16.msra.mxu0 %v9434_v33 }
 0xfed   :  { %8269 = vmatprep.subr.bf16.mxu0 %v11099_v21 }
 0xfef   :  { %8247 = vmatpush3.bf16.msra.mxu1 %v11102_v9 }
 0xff0   :  { %8272 = vmatprep.subr.bf16.mxu1 %v11099_v21  ;;  %8271 = vmatpush3.bf16.msra.mxu0 %v9444_v39 }
 0xff1   :  { %8296 = vmatprep.subr.bf16.mxu0 %v11099_v21 }
 0xff2   :  { %7009 = vmatmul.mubr.f32.vlgmr.msra.gmra.mrb[44].mxu1 %v10478_v17 }
 0xff3   :  { %8274 = vmatpush3.bf16.msra.mxu1 %v11103_v41  ;;  %7078 = vmatprep.mubr.msk.f32.mxu1 %vm8532_vm0, %v11098_v16 }
 0xff4   :  { %8275 = vmatprep.subr.bf16.mxu1 %v11099_v21 }
 0xff7   :  { %8277 = vmatpush3.bf16.msra.mxu1 %v11104_v51 }
 0xff8   :  { %8278 = vmatprep.subr.bf16.mxu1 %v11099_v21 }
 0xffb   :  { %8280 = vmatpush3.bf16.msra.mxu1 %v11105_v56 }
 0xffc   :  { %8281 = vmatprep.subr.bf16.mxu1 %v11099_v21 }
 0xfff   :  { %8283 = vmatpush3.bf16.msra.mxu1 %v11106_v62 }
0x1000   :  { %8284 = vmatprep.subr.bf16.mxu1 %v11099_v21 }
0x1003   :  { %8286 = vmatpush3.bf16.msra.mxu1 %v11107_v7 }
0x1004   :  { %8287 = vmatprep.subr.bf16.mxu1 %v11099_v21 }
0x1007   :  { %8289 = vmatpush3.bf16.msra.mxu1 %v11108_v6 }
0x1008   :  { %8290 = vmatprep.subr.bf16.mxu1 %v11099_v21 }
0x100b   :  { %8292 = vmatpush3.bf16.msra.mxu1 %v11109_v45 }
0x100c   :  { %8293 = vmatprep.subr.bf16.mxu1 %v11099_v21 }
0x100f   :  { %8295 = vmatpush3.bf16.msra.mxu1 %v11110_v30 }
0x1010   :  { %8320 = vmatprep.subr.bf16.mxu1 %v11099_v21 }
0x1012   :  { %7079 = vmatmul.mubr.f32.vlgmr.msra.gmra.mrb[46].mxu1 %v10455_v35  ;;  %v8360_v35 = vpack.c.bf16 %v4863_v26, %v4862_v12  ;;  %v8375_v12 = vpack.c.bf16 %v4873_v32, %v4872_v53  ;;  %v4875_v26 = vld [vmem:[%s11028_s15 + $0xf8] sm:$0xff]  ;;  %v4902_v32 = vld [vmem:[%s11030_s19 + $0x1a0] sm:$0xff] }
0x1013   :  { %8322 = vmatpush3.bf16.msra.mxu1 %v9370_v5  ;;  %7148 = vmatprep.mubr.msk.f32.mxu1 %vm8532_vm0, %v11098_v16 }
0x1014   :  { %8323 = vmatprep.subr.bf16.mxu1 %v11099_v21 }
0x1017   :  { %8325 = vmatpush3.bf16.msra.mxu1 %v9382_v11 }
0x1018   :  { %8326 = vmatprep.subr.bf16.mxu1 %v11099_v21 }
0x101b   :  { %8328 = vmatpush3.bf16.msra.mxu1 %v9394_v15 }
0x101c   :  { %8329 = vmatprep.subr.bf16.mxu1 %v11099_v21 }
0x101f   :  { %8331 = vmatpush3.bf16.msra.mxu1 %v9404_v19 }
0x1020   :  { %8332 = vmatprep.subr.bf16.mxu1 %v11099_v21 }
0x1023   :  { %8334 = vmatpush3.bf16.msra.mxu1 %v9414_v22 }
0x1024   :  { %8335 = vmatprep.subr.bf16.mxu1 %v11099_v21 }
0x1027   :  { %8337 = vmatpush3.bf16.msra.mxu1 %v9424_v29 }
0x1028   :  { %8338 = vmatprep.subr.bf16.mxu1 %v11099_v21 }
0x102b   :  { %8340 = vmatpush3.bf16.msra.mxu1 %v9434_v33 }
0x102c   :  { %8341 = vmatprep.subr.bf16.mxu1 %v11099_v21 }
0x102f   :  { %8343 = vmatpush3.bf16.msra.mxu1 %v9444_v39 }
0x1030   :  { %8344 = vmatprep.subr.bf16.mxu1 %v11099_v21 }
0x1065   :  { %v3259_v5 = vpop.f32.mrb[32].mxu0 }
0x1066   :  { %v6835_v11 = vpop.f32.mrb[33].mxu0  ;;  %v10643_v2 = vmul.f32 0.35355338, %v3259_v5 }
0x1085   :  { %v10641_v15 = vpop.f32.mrb[34].mxu0 }
0x1086   :  { %v6905_v19 = vpop.f32.mrb[35].mxu0 }
0x10a5   :  { %v3471_v22 = vpop.f32.mrb[42].mxu1  ;;  %v3542_v36 = vpop.f32.mrb[36].mxu0 }
0x10a6   :  { %v10645_v29 = vmul.f32 0.35355338, %v3471_v22  ;;  %v6940_v1 = vpop.f32.mrb[43].mxu1  ;;  %v3616_v33 = vmul.f32 %v3542_v36, %v10523_v13  ;;  %v6975_v38 = vpop.f32.mrb[37].mxu0 }
0x10a8   :  { %v3900_v39 = vmax.f32 %v10643_v2, %v10645_v29  ;;  %7044 = vmatmul.mubr.f32.vlgmr.msra.gmra.mrb[38].mxu0 %v3616_v33 }
0x10a9   :  { %8298 = vmatpush3.bf16.msra.mxu0 %v11103_v41  ;;  %7113 = vmatprep.mubr.msk.f32.mxu0 %vm8532_vm0, %v11098_v16 }
0x10aa   :  { %8299 = vmatprep.subr.bf16.mxu0 %v11099_v21 }
0x10ad   :  { %8301 = vmatpush3.bf16.msra.mxu0 %v11104_v51 }
0x10ae   :  { %8302 = vmatprep.subr.bf16.mxu0 %v11099_v21 }
0x10b1   :  { %8304 = vmatpush3.bf16.msra.mxu0 %v11105_v56 }
0x10b2   :  { %8305 = vmatprep.subr.bf16.mxu0 %v11099_v21 }
0x10b5   :  { %8307 = vmatpush3.bf16.msra.mxu0 %v11106_v62 }
0x10b6   :  { %8308 = vmatprep.subr.bf16.mxu0 %v11099_v21 }
0x10b9   :  { %8310 = vmatpush3.bf16.msra.mxu0 %v11107_v7 }
0x10ba   :  { %8311 = vmatprep.subr.bf16.mxu0 %v11099_v21 }
0x10bd   :  { %8313 = vmatpush3.bf16.msra.mxu0 %v11108_v6 }
0x10be   :  { %8314 = vmatprep.subr.bf16.mxu0 %v11099_v21 }
0x10c1   :  { %8316 = vmatpush3.bf16.msra.mxu0 %v11109_v45 }
0x10c2   :  { %8317 = vmatprep.subr.bf16.mxu0 %v11099_v21 }
0x10c5   :  { %v10666_v60 = vpop.f32.mrb[44].mxu1  ;;  %8319 = vmatpush3.bf16.msra.mxu0 %v11110_v30 }
0x10c6   :  { %v7010_v8 = vpop.f32.mrb[45].mxu1  ;;  %8356 = vmatprep.subr.bf16.mxu0 %v11099_v21 }
0x10c8   :  { %7114 = vmatmul.mubr.f32.vlgmr.msra.gmra.mrb[40].mxu0 %v10478_v17  ;;  %v4867_v17 = vld [vmem:[%s11028_s15 + $0xb8] sm:$0xff] }
0x10c9   :  { %7211 = vmatprep.mubr.msk.f32.mxu0 %vm8532_vm0, %v11098_v16  ;;  %8358 = vmatpush3.bf16.msra.mxu0 %v8357_v18  ;;  %v8366_v10 = vpack.c.bf16 %v4867_v17, %v4866_v63  ;;  %v4874_v18 = vld [vmem:[%s11028_s15 + $0xf0] sm:$0xff] }
0x10ca   :  { %8359 = vmatprep.subr.bf16.mxu0 %v11099_v21 }
0x10cd   :  { %8361 = vmatpush3.bf16.msra.mxu0 %v8360_v35  ;;  %v8378_v35 = vpack.c.bf16 %v4875_v26, %v4874_v18  ;;  %v4907_v18 = vld [vmem:[%s11030_s19 + $0x1c8] sm:$0xff]  ;;  %v4909_v26 = vld [vmem:[%s11030_s19 + $0x1d8] sm:$0xff] }
0x10ce   :  { %8362 = vmatprep.subr.bf16.mxu0 %v11099_v21 }
0x10d1   :  { %8364 = vmatpush3.bf16.msra.mxu0 %v8363_v58 }
0x10d2   :  { %8365 = vmatprep.subr.bf16.mxu0 %v11099_v21 }
0x10d5   :  { %8367 = vmatpush3.bf16.msra.mxu0 %v8366_v10 }
0x10d6   :  { %8368 = vmatprep.subr.bf16.mxu0 %v11099_v21 }
0x10e5   :  { %v3754_v3 = vpop.f32.mrb[46].mxu1 }
0x10e6   :  { %v3828_v48 = vmul.f32 %v3754_v3, %v10523_v13  ;;  %v7080_v61 = vpop.f32.mrb[47].mxu1  ;;  %v4870_v3 = vld [vmem:[%s11028_s15 + $0xd0] sm:$0xff] }
0x10e8   :  { %7149 = vmatmul.mubr.f32.vlgmr.msra.gmra.mrb[48].mxu1 %v3828_v48  ;;  %v4871_v48 = vld [vmem:[%s11028_s15 + $0xd8] sm:$0xff] }
0x10e9   :  { %8346 = vmatpush3.bf16.msra.mxu1 %v9847_v50  ;;  %7155 = vmatprep.mubr.msk.f32.mxu1 %vm8532_vm0, %v11098_v16  ;;  %v8372_v61 = vpack.c.bf16 %v4871_v48, %v4870_v3  ;;  %v4903_v3 = vld [vmem:[%s11030_s19 + $0x1a8] sm:$0xff]  ;;  %v4905_v48 = vld [vmem:[%s11030_s19 + $0x1b8] sm:$0xff] }
0x10ea   :  { %8347 = vmatprep.subr.bf16.mxu1 %v11099_v21  ;;  %v8448_v53 = vpack.c.bf16 %v4905_v48, %v4903_v3  ;;  %v4925_v3 = vld [vmem:[%s11031_s21 + $0x150] sm:$0xff]  ;;  %v4926_v48 = vld [vmem:[%s11031_s21 + $0x158] sm:$0xff] }
0x117b   :  { %v3683_v25 = vpop.f32.mrb[38].mxu0 }
0x117c   :  { %v3687_v13 = vmul.f32 0.35355338, %v3683_v25  ;;  %v7045_v42 = vpop.f32.mrb[39].mxu0 }
0x117e   :  { %v3901_v57 = vmax.f32 %v3900_v39, %v3687_v13  ;;  %v4869_v39 = vld [vmem:[%s11028_s15 + $0xc8] sm:$0xff] }
0x119b   :  { %v10706_v23 = vpop.f32.mrb[40].mxu0 }
0x119c   :  { %v7115_v55 = vpop.f32.mrb[41].mxu0 }
0x11bb   :  { %v3895_v59 = vpop.f32.mrb[48].mxu1 }
0x11bc   :  { %v3899_v0 = vmul.f32 0.35355338, %v3895_v59  ;;  %v7150_v4 = vpop.f32.mrb[49].mxu1 }
0x11be   :  { %v3902_v9 = vmax.f32 %v3901_v57, %v3899_v0 }
0x11c0   :  { %v3903_v14 = vsub.f32 %v10643_v2, %v3902_v9  ;;  %v3906_v20 = vsub.f32 %v10645_v29, %v3902_v9  ;;  %v3909_v41 = vsub.f32 %v3687_v13, %v3902_v9  ;;  %v3912_v51 = vsub.f32 %v3899_v0, %v3902_v9 }
0x11c2   :  { %v3904_v56 = vmul.f32 1.442695, %v3903_v14  ;;  %v3907_v62 = vmul.f32 1.442695, %v3906_v20  ;;  %v3910_v7 = vmul.f32 1.442695, %v3909_v41 }
0x11c3   :  { %v3913_v6 = vmul.f32 1.442695, %v3912_v51  ;;  %v4888_v14 = vld [vmem:[%s11030_s19 + $0x130] sm:$0xff]  ;;  %v4891_v20 = vld [vmem:[%s11030_s19 + $0x148] sm:$0xff]  ;;  %v4893_v41 = vld [vmem:[%s11030_s19 + $0x158] sm:$0xff] }
0x11c4   :  { %8515 = vpow2.f32 %v3904_v56  ;;  %v8436_v56 = vpack.c.bf16 %v4893_v41, %v4891_v20  ;;  %v4935_v41 = vld [vmem:[%s11031_s21 + $0x1a0] sm:$0xff] }
0x11c5   :  { %8517 = vpow2.f32 %v3907_v62  ;;  %v4890_v62 = vld [vmem:[%s11030_s19 + $0x140] sm:$0xff] }
0x11c6   :  { %8519 = vpow2.f32 %v3910_v7  ;;  %v4892_v7 = vld [vmem:[%s11030_s19 + $0x150] sm:$0xff] }
0x11c7   :  { %8521 = vpow2.f32 %v3913_v6  ;;  %v8438_v6 = vpack.c.bf16 %v4892_v7, %v4890_v62  ;;  %v4919_v62 = vld [vmem:[%s11031_s21 + $0x120] sm:$0xff]  ;;  %v4920_v7 = vld [vmem:[%s11031_s21 + $0x128] sm:$0xff] }
0x11ce   :  { %v8516_v45 = vpop.eup %8515 }
0x11cf   :  { %v8518_v30 = vpop.eup %8517 }
0x11d0   :  { %v3915_v5 = vadd.f32 %v8518_v30, %v8516_v45  ;;  %v8520_v11 = vpop.eup %8519 }
0x11d1   :  { %v8522_v22 = vpop.eup %8521 }
0x11d2   :  { %v3916_v19 = vadd.f32 %v8520_v11, %v3915_v5 }
0x11d4   :  { %v3917_v36 = vadd.f32 %v8522_v22, %v3916_v19  ;;  %v4895_v19 = vld [vmem:[%s11030_s19 + $0x168] sm:$0xff] }
0x11d6   :  { %8523 = vrcp.f32 %v3917_v36 }
0x11e0   :  { %v8524_v2 = vpop.eup %8523 }
0x11e1   :  { %v3920_v29 = vmul.f32 %v8524_v2, %v8516_v45  ;;  %v3996_v1 = vmul.f32 %v8524_v2, %v8518_v30  ;;  %v4072_v33 = vmul.f32 %v8524_v2, %v8520_v11  ;;  %v4148_v38 = vmul.f32 %v8524_v2, %v8522_v22  ;;  %v4897_v22 = vld [vmem:[%s11030_s19 + $0x178] sm:$0xff]  ;;  %v4894_v2 = vld [vmem:[%s11030_s19 + $0x160] sm:$0xff] }
0x11e2   :  { %v8440_v36 = vpack.c.bf16 %v4897_v22, %v4895_v19  ;;  %v4922_v19 = vld [vmem:[%s11031_s21 + $0x138] sm:$0xff]  ;;  %v4939_v22 = vld [vmem:[%s11031_s21 + $0x1c0] sm:$0xff] }
0x11e3   :  { %7156 = vmatmul.mubr.msk.f32.vlgmr.msra.gmra.mrb[50].mxu1 %vm1802_vm1, %v3920_v29  ;;  %v4896_v29 = vld [vmem:[%s11030_s19 + $0x170] sm:$0xff] }
0x11e4   :  { %8349 = vmatpush3.bf16.msra.mxu1 %v9847_v50  ;;  %7162 = vmatprep.mubr.msk.f32.mxu1 %vm8532_vm0, %v11098_v16 }
0x11e5   :  { %8350 = vmatprep.subr.bf16.mxu1 %v11099_v21 }
0x11e7   :  { %7163 = vmatmul.mubr.msk.f32.vlgmr.msra.gmra.mrb[52].mxu1 %vm1802_vm1, %v3996_v1  ;;  %v8442_v1 = vpack.c.bf16 %v4896_v29, %v4894_v2 }
0x11e8   :  { %8352 = vmatpush3.bf16.msra.mxu1 %v9847_v50  ;;  %7169 = vmatprep.mubr.msk.f32.mxu1 %vm8532_vm0, %v11098_v16 }
0x11e9   :  { %8353 = vmatprep.subr.bf16.mxu1 %v11099_v21 }
0x11eb   :  { %7170 = vmatmul.mubr.msk.f32.vlgmr.msra.gmra.mrb[54].mxu1 %vm1802_vm1, %v4072_v33  ;;  %v4899_v33 = vld [vmem:[%s11030_s19 + $0x188] sm:$0xff] }
0x11ec   :  { %8355 = vmatpush3.bf16.msra.mxu1 %v9847_v50  ;;  %7176 = vmatprep.mubr.msk.f32.mxu1 %vm8532_vm0, %v11098_v16  ;;  %v4868_v50 = vld [vmem:[%s11028_s15 + $0xc0] sm:$0xff] }
0x11ed   :  { %8380 = vmatprep.subr.bf16.mxu1 %v11099_v21  ;;  %v8369_v8 = vpack.c.bf16 %v4869_v39, %v4868_v50  ;;  %v4898_v50 = vld [vmem:[%s11030_s19 + $0x180] sm:$0xff] }
0x11ef   :  { %7177 = vmatmul.mubr.msk.f32.vlgmr.msra.gmra.mrb[56].mxu1 %vm1802_vm1, %v4148_v38  ;;  %8370 = vmatpush3.bf16.msra.mxu0 %v8369_v8  ;;  %v4901_v38 = vld [vmem:[%s11030_s19 + $0x198] sm:$0xff]  ;;  %v4900_v8 = vld [vmem:[%s11030_s19 + $0x190] sm:$0xff] }
0x11f0   :  { %8382 = vmatpush3.bf16.msra.mxu1 %v8966_v24  ;;  %7246 = vmatprep.mubr.msk.f32.mxu1 %vm8532_vm0, %v11098_v16  ;;  %v8444_v39 = vpack.c.bf16 %v4901_v38, %v4899_v33  ;;  %v4924_v33 = vld [vmem:[%s11031_s21 + $0x148] sm:$0xff]  ;;  %v4941_v38 = vld [vmem:[%s11031_s21 + $0x1d0] sm:$0xff] }
0x11f1   :  { %8383 = vmatprep.subr.bf16.mxu1 %v11099_v21  ;;  %8371 = vmatprep.subr.bf16.mxu0 %v11099_v21 }
0x11f3   :  { %8373 = vmatpush3.bf16.msra.mxu0 %v8372_v61  ;;  %v8446_v61 = vpack.c.bf16 %v4900_v8, %v4898_v50  ;;  %v4942_v50 = vld [vmem:[%s11031_s21 + $0x1d8] sm:$0xff] }
0x11f4   :  { %8385 = vmatpush3.bf16.msra.mxu1 %v8977_v28  ;;  %8374 = vmatprep.subr.bf16.mxu0 %v11099_v21  ;;  %v8480_v8 = vpack.c.bf16 %v4942_v50, %v4941_v38 }
0x11f5   :  { %8386 = vmatprep.subr.bf16.mxu1 %v11099_v21 }
0x11f7   :  { %8376 = vmatpush3.bf16.msra.mxu0 %v8375_v12  ;;  %v4904_v12 = vld [vmem:[%s11030_s19 + $0x1b0] sm:$0xff] }
0x11f8   :  { %8388 = vmatpush3.bf16.msra.mxu1 %v8989_v31  ;;  %8377 = vmatprep.subr.bf16.mxu0 %v11099_v21 }
0x11f9   :  { %8389 = vmatprep.subr.bf16.mxu1 %v11099_v21 }
0x11fb   :  { %8379 = vmatpush3.bf16.msra.mxu0 %v8378_v35  ;;  %v8450_v35 = vpack.c.bf16 %v4904_v12, %v4902_v32  ;;  %v8482_v32 = vpack.c.bf16 %v4926_v48, %v4925_v3 }
0x11fc   :  { %8391 = vmatpush3.bf16.msra.mxu1 %v9001_v34  ;;  %8404 = vmatprep.subr.bf16.mxu0 %v11099_v21 }
0x11fd   :  { %8392 = vmatprep.subr.bf16.mxu1 %v11099_v21 }
0x1200   :  { %8394 = vmatpush3.bf16.msra.mxu1 %v9013_v37 }
0x1201   :  { %8395 = vmatprep.subr.bf16.mxu1 %v11099_v21 }
0x1204   :  { %8397 = vmatpush3.bf16.msra.mxu1 %v9025_v40 }
0x1205   :  { %8398 = vmatprep.subr.bf16.mxu1 %v11099_v21 }
0x1208   :  { %8400 = vmatpush3.bf16.msra.mxu1 %v9037_v43 }
0x1209   :  { %8401 = vmatprep.subr.bf16.mxu1 %v11099_v21 }
0x120c   :  { %8403 = vmatpush3.bf16.msra.mxu1 %v9052_v46 }
0x12b6   :  { %v3990_v44 = vpop.f32.mrb[50].mxu1 }
0x12b7   :  { %v3994_v52 = vmul.f32 %v3990_v44, %v10542_v49  ;;  %v7157_v58 = vpop.f32.mrb[51].mxu1  ;;  %v4889_v49 = vld [vmem:[%s11030_s19 + $0x138] sm:$0xff]  ;;  %v8452_v44 = vpack.c.bf16 %v4909_v26, %v4907_v18  ;;  %v4927_v18 = vld [vmem:[%s11031_s21 + $0x160] sm:$0xff]  ;;  %v4928_v26 = vld [vmem:[%s11031_s21 + $0x168] sm:$0xff] }
0x12b8   :  { %v4908_v58 = vld [vmem:[%s11030_s19 + $0x1d0] sm:$0xff] }
0x12ba   :  { %v4066_v63 = vpop.f32.mrb[52].mxu1 }
0x12bb   :  { %v4070_v17 = vmul.f32 %v4066_v63, %v10641_v15  ;;  %v7164_v10 = vpop.f32.mrb[53].mxu1  ;;  %v4911_v63 = vld [vmem:[%s11030_s19 + $0x1e8] sm:$0xff] }
0x12bd   :  { %v4071_v25 = vadd.f32 %v4070_v17, %v3994_v52  ;;  %v4906_v52 = vld [vmem:[%s11030_s19 + $0x1c0] sm:$0xff]  ;;  %v4913_v17 = vld [vmem:[%s11030_s19 + $0x1f8] sm:$0xff] }
0x12be   :  { %v4142_v13 = vpop.f32.mrb[54].mxu1  ;;  %v8454_v10 = vpack.c.bf16 %v4908_v58, %v4906_v52  ;;  %v8486_v52 = vpack.c.bf16 %v4928_v26, %v4927_v18 }
0x12bf   :  { %v4146_v42 = vmul.f32 %v4142_v13, %v10666_v60  ;;  %v7171_v57 = vpop.f32.mrb[55].mxu1  ;;  %v4910_v13 = vld [vmem:[%s11030_s19 + $0x1e0] sm:$0xff] }
0x12c1   :  { %v4147_v55 = vadd.f32 %v4146_v42, %v4071_v25  ;;  %v8456_v25 = vpack.c.bf16 %v4913_v17, %v4911_v63  ;;  %v4912_v42 = vld [vmem:[%s11030_s19 + $0x1f0] sm:$0xff]  ;;  %v4930_v17 = vld [vmem:[%s11031_s21 + $0x178] sm:$0xff] }
0x12c2   :  { %v4218_v59 = vpop.f32.mrb[56].mxu1  ;;  %v8458_v57 = vpack.c.bf16 %v4912_v42, %v4910_v13  ;;  %v4929_v63 = vld [vmem:[%s11031_s21 + $0x170] sm:$0xff]  ;;  %v11111_v42 = vsub.s32 1, %v10192_v27 }
0x12c3   :  { %v4222_v0 = vmul.f32 %v4218_v59, %v10706_v23  ;;  %v7178_v4 = vpop.f32.mrb[57].mxu1  ;;  %v4886_v23 = vld [vmem:[%s11030_s19 + $0x120] sm:$0xff]  ;;  %v4932_v59 = vld [vmem:[%s11031_s21 + $0x188] sm:$0xff] }
0x12c4   :  { %v8434_v51 = vpack.c.bf16 %v4888_v14, %v4886_v23  ;;  %v4917_v23 = vld [vmem:[%s11031_s21 + $0x110] sm:$0xff]  ;;  %v4918_v14 = vld [vmem:[%s11031_s21 + $0x118] sm:$0xff] }
0x12c5   :  { %v4223_v9 = vadd.f32 %v4222_v0, %v4147_v55  ;;  %v4931_v55 = vld [vmem:[%s11031_s21 + $0x180] sm:$0xff]  ;;  %v8466_v20 = vpack.c.bf16 %v4918_v14, %v4917_v23 }
0x12c6   :  { %v4915_v0 = vld [vmem:[%s11031_s21 + $0x100] sm:$0xff]  ;;  %v8460_v4 = vpack.c.bf16 %v4932_v59, %v4931_v55 }
0x12c7   :  { %7212 = vmatmul.mubr.f32.vlgmr.msra.gmra.mrb[42].mxu0 %v4223_v9  ;;  %v4916_v9 = vld [vmem:[%s11031_s21 + $0x108] sm:$0xff] }
0x12c8   :  { %8406 = vmatpush3.bf16.msra.mxu0 %v8966_v24  ;;  %7281 = vmatprep.mubr.msk.f32.mxu0 %vm8532_vm0, %v11098_v16 }
0x12c9   :  { %8407 = vmatprep.subr.bf16.mxu0 %v11099_v21 }
0x12cc   :  { %8409 = vmatpush3.bf16.msra.mxu0 %v8977_v28  ;;  %v4877_v28 = vld [vmem:[%s11029_s16 + $0x1] ss:$0 sm:$0xff] }
0x12cd   :  { %8410 = vmatprep.subr.bf16.mxu0 %v11099_v21 }
0x12d0   :  { %8412 = vmatpush3.bf16.msra.mxu0 %v8989_v31 }
0x12d1   :  { %8413 = vmatprep.subr.bf16.mxu0 %v11099_v21 }
0x12d4   :  { %8415 = vmatpush3.bf16.msra.mxu0 %v9001_v34 }
0x12d5   :  { %8416 = vmatprep.subr.bf16.mxu0 %v11099_v21 }
0x12d8   :  { %8418 = vmatpush3.bf16.msra.mxu0 %v9013_v37 }
0x12d9   :  { %8419 = vmatprep.subr.bf16.mxu0 %v11099_v21 }
0x12dc   :  { %8421 = vmatpush3.bf16.msra.mxu0 %v9025_v40  ;;  %v4883_v40 = vld [vmem:[%s11030_s19 + $0x108] sm:$0xff] }
0x12dd   :  { %8422 = vmatprep.subr.bf16.mxu0 %v11099_v21 }
0x12e0   :  { %8424 = vmatpush3.bf16.msra.mxu0 %v9037_v43  ;;  %v4885_v43 = vld [vmem:[%s11030_s19 + $0x118] sm:$0xff] }
0x12e1   :  { %8425 = vmatprep.subr.bf16.mxu0 %v11099_v21  ;;  %v8428_v21 = vpack.c.bf16 %v4885_v43, %v4883_v40  ;;  %v4880_v43 = vld [vmem:[%s11032_s17 + $0x1] ss:$0 sm:$0xff] }
0x12e3   :  { %8429 = vmatprep.subr.bf16.mxu1 %v8428_v21  ;;  %v4881_v21 = vld [vmem:[%s11033_s18 + $0x1] ss:$0 sm:$0xff] }
0x12e4   :  { %8427 = vmatpush3.bf16.msra.mxu0 %v9052_v46  ;;  %v4882_v46 = vld [vmem:[%s11030_s19 + $0x100] sm:$0xff] }
0x12e5   :  { %8461 = vmatprep.subr.bf16.mxu0 %v8460_v4 }
0x139a   :  { %v4307_v24 = vpop.f32.mrb[42].mxu0 }
0x139b   :  { %v4311_v31 = vadd.f32 %v4307_v24, %v10225_v54  ;;  %v7213_v34 = vpop.f32.mrb[43].mxu0  ;;  %v4884_v54 = vld [vmem:[%s11030_s19 + $0x110] sm:$0xff]  ;;  %v8462_v24 = vpack.c.bf16 %v4916_v9, %v4915_v0 }
0x139c   :  { %v8430_v15 = vpack.c.bf16 %v4884_v54, %v4882_v46 }
0x139d   :  { %v10796_v37 = vadd.f32 %v4877_v28, %v4311_v31 }
0x139f   :  { %7247 = vmatmul.mubr.f32.vlgmr.msra.gmra.mrb[58].mxu1 %v10796_v37 }
0x13a0   :  { %4593 = vmatprep.mubr.f32.mxu1 %v11098_v16  ;;  %v4887_v16 = vld [vmem:[%s11030_s19 + $0x128] sm:$0xff]  ;;  %8431 = vmatpush1.bf16.msra.mxu1 %v8430_v15  ;;  %v4934_v15 = vld [vmem:[%s11031_s21 + $0x198] sm:$0xff] }
0x13a1   :  { %v8432_v60 = vpack.c.bf16 %v4889_v49, %v4887_v16  ;;  %v4933_v49 = vld [vmem:[%s11031_s21 + $0x190] sm:$0xff] }
0x13a3   :  { %8433 = vmatprep.subr.bf16.mxu1 %v8432_v60  ;;  %v8464_v60 = vpack.c.bf16 %v4934_v15, %v4933_v49 }
0x13a4   :  { %8435 = vmatpush1.bf16.msra.mxu1 %v8434_v51  ;;  %v4936_v51 = vld [vmem:[%s11031_s21 + $0x1a8] sm:$0xff] }
0x13a5   :  { %8437 = vmatprep.subr.bf16.mxu1 %v8436_v56  ;;  %v8468_v56 = vpack.c.bf16 %v4936_v51, %v4935_v41 }
0x13a8   :  { %8439 = vmatpush1.bf16.msra.mxu1 %v8438_v6  ;;  %v8470_v6 = vpack.c.bf16 %v4920_v7, %v4919_v62 }
0x13a9   :  { %8441 = vmatprep.subr.bf16.mxu1 %v8440_v36  ;;  %v4940_v36 = vld [vmem:[%s11031_s21 + $0x1c8] sm:$0xff] }
0x13aa   :  { %v8476_v29 = vpack.c.bf16 %v4940_v36, %v4939_v22 }
0x13ac   :  { %8443 = vmatpush1.bf16.msra.mxu1 %v8442_v1  ;;  %v4923_v1 = vld [vmem:[%s11031_s21 + $0x140] sm:$0xff] }
0x13ad   :  { %8445 = vmatprep.subr.bf16.mxu1 %v8444_v39  ;;  %v8478_v39 = vpack.c.bf16 %v4924_v33, %v4923_v1 }
0x13b0   :  { %8447 = vmatpush1.bf16.msra.mxu1 %v8446_v61  ;;  %v4943_v61 = vld [vmem:[%s11031_s21 + $0x1e0] sm:$0xff] }
0x13b1   :  { %8449 = vmatprep.subr.bf16.mxu1 %v8448_v53  ;;  %v4944_v53 = vld [vmem:[%s11031_s21 + $0x1e8] sm:$0xff] }
0x13b2   :  { %v8484_v12 = vpack.c.bf16 %v4944_v53, %v4943_v61 }
0x13b4   :  { %8451 = vmatpush1.bf16.msra.mxu1 %v8450_v35  ;;  %v4945_v35 = vld [vmem:[%s11031_s21 + $0x1f0] sm:$0xff] }
0x13b5   :  { %8453 = vmatprep.subr.bf16.mxu1 %v8452_v44  ;;  %v4946_v44 = vld [vmem:[%s11031_s21 + $0x1f8] sm:$0xff] }
0x13b6   :  { %v8488_v58 = vpack.c.bf16 %v4946_v44, %v4945_v35 }
0x13b8   :  { %8455 = vmatpush1.bf16.msra.mxu1 %v8454_v10  ;;  %v8490_v10 = vpack.c.bf16 %v4930_v17, %v4929_v63 }
0x13b9   :  { %8457 = vmatprep.subr.bf16.mxu1 %v8456_v25  ;;  %v4914_v25 = vld [vmem:[%s11034_s20 + $0x2] sm:$0x3] }
0x13ba   :  { %v4522_v13 = vrot.slane %v4914_v25, %v2397_v47 }
0x13bc   :  { %8459 = vmatpush1.bf16.msra.mxu1 %v8458_v57  ;;  %v4526_v57 = vrot.slane %v4914_v25, %v11111_v42 }
0x1472   :  { %v4391_v45 = vpop.f32.mrb[58].mxu1 }
0x1473   :  { %v4395_v30 = vsub.f32 %v10796_v37, %v4391_v45  ;;  %v7248_v5 = vpop.f32.mrb[59].mxu1  ;;  %v4937_v45 = vld [vmem:[%s11031_s21 + $0x1b0] sm:$0xff] }
0x1474   :  { %v4921_v5 = vld [vmem:[%s11031_s21 + $0x130] sm:$0xff] }
0x1475   :  { %v4396_v11 = vmul.f32 %v4395_v30, %v4395_v30  ;;  %v8474_v2 = vpack.c.bf16 %v4922_v19, %v4921_v5 }
0x1477   :  { %7282 = vmatmul.mubr.f32.vlgmr.msra.gmra.mrb[44].mxu0 %v4396_v11 }
0x1478   :  { %8463 = vmatpush3.bf16.msra.mxu0 %v8462_v24 }
0x1479   :  { %8465 = vmatprep.subr.bf16.mxu0 %v8464_v60 }
0x147c   :  { %8467 = vmatpush3.bf16.msra.mxu0 %v8466_v20 }
0x147d   :  { %8469 = vmatprep.subr.bf16.mxu0 %v8468_v56  ;;  %v4948_v56 = vld [vmem:[%s11035_s22 + $0x1] ss:$0 sm:$0xff] }
0x1480   :  { %8471 = vmatpush3.bf16.msra.mxu0 %v8470_v6 }
0x154a   :  { %v4463_v28 = vpop.f32.mrb[44].mxu0 }
0x154b   :  { %v4464_v31 = vadd.f32 1e-06, %v4463_v28  ;;  %v7283_v34 = vpop.f32.mrb[45].mxu0 }
0x154d   :  { %8525 = vrsqrt.f32 %v4464_v31 }
0x1557   :  { %v8526_v40 = vpop.eup %8525 }
0x1558   :  { %v4468_v46 = vmul.f32 %v8526_v40, %v4395_v30  ;;  %v4938_v30 = vld [vmem:[%s11031_s21 + $0x1b8] sm:$0xff] }
0x1559   :  { %v8472_v11 = vpack.c.bf16 %v4938_v30, %v4937_v45 }
0x155a   :  { %v4475_v54 = vmul.f32 %v4880_v43, %v4468_v46 }
0x155b   :  { %8473 = vmatprep.subr.bf16.mxu0 %v8472_v11 }
0x155c   :  { %v4482_v16 = vadd.f32 %v4881_v21, %v4475_v54  ;;  %8475 = vmatpush3.bf16.msra.mxu0 %v8474_v2 }
0x155d   :  { %8477 = vmatprep.subr.bf16.mxu0 %v8476_v29 }
0x155e   :  { %4594 = vmatmul.mubr.f32.vlgmr.msra.gmra.mrb[60].mxu1 %v4482_v16 }
0x1560   :  { %8479 = vmatpush3.bf16.msra.mxu0 %v8478_v39 }
0x1561   :  { %8481 = vmatprep.subr.bf16.mxu0 %v8480_v8 }
0x1564   :  { %8483 = vmatpush3.bf16.msra.mxu0 %v8482_v32 }
0x1565   :  { %8485 = vmatprep.subr.bf16.mxu0 %v8484_v12 }
0x1568   :  { %8487 = vmatpush3.bf16.msra.mxu0 %v8486_v52 }
0x1569   :  { %8489 = vmatprep.subr.bf16.mxu0 %v8488_v58 }
0x156c   :  { %8491 = vmatpush3.bf16.msra.mxu0 %v8490_v10 }
0x1631   :  { %v4595_v55 = vpop.f32.mrb[60].mxu1 }
0x1632   :  { %v4596_v59 = vadd.f32 %v4595_v55, %v4522_v13  ;;  %v4597_v0 = vpop.f32.mrb[61].mxu1 }
0x1633   :  { %v4598_v4 = vadd.f32 %v4597_v0, %v4526_v57 }
0x1634   :  { %v4602_v9 = vmul.f32 0.044715, %v4596_v59  ;;  %v4600_v60 = vmul.f32 0.5, %v4596_v59 }
0x1635   :  { %v4603_v24 = vmul.f32 0.044715, %v4598_v4  ;;  %v4601_v49 = vmul.f32 0.5, %v4598_v4 }
0x1636   :  { %v4604_v28 = vmul.f32 %v4602_v9, %v4596_v59 }
0x1637   :  { %v4605_v31 = vmul.f32 %v4603_v24, %v4598_v4 }
0x1638   :  { %v4606_v34 = vmul.f32 %v4604_v28, %v4596_v59 }
0x1639   :  { %v4607_v40 = vmul.f32 %v4605_v31, %v4598_v4 }
0x163a   :  { %v4608_v43 = vadd.f32 %v4606_v34, %v4596_v59 }
0x163b   :  { %v4609_v46 = vadd.f32 %v4607_v40, %v4598_v4 }
0x163c   :  { %v4610_v21 = vmul.f32 0.7978845, %v4608_v43 }
0x163d   :  { %v4611_v54 = vmul.f32 0.7978845, %v4609_v46 }
0x163e   :  { %8527 = vtanh.f32 %v4610_v21 }
0x163f   :  { %8529 = vtanh.f32 %v4611_v54 }
0x1648   :  { %v8528_v47 = vpop.eup %8527 }
0x1649   :  { %v8530_v16 = vpop.eup %8529  ;;  %v4614_v27 = vadd.f32 1.0, %v8528_v47 }
0x164a   :  { %v4615_v15 = vadd.f32 1.0, %v8530_v16 }
0x164b   :  { %v4616_v14 = vmul.f32 %v4614_v27, %v4600_v60 }
0x164c   :  { %v4617_v23 = vmul.f32 %v4615_v15, %v4601_v49 }
0x164e   :  { %4715 = vmatprep.mubr.f32.mxu0 %v4617_v23 }
0x164f   :  { %4716 = vmatmul.mubr.f32.vlgmr.msra.gmra.mrb[46].mxu0 %v4616_v14 }
0x1722   :  { %v5825_v20 = vpop.f32.mrb[46].mxu0 }
0x1723   :  { %v5826_v41 = vpop.f32.mrb[47].mxu0 }
0x1724   :  { %v5827_v51 = vadd.f32 %v5826_v41, %v5825_v20 }
0x1726   :  { %v4721_v62 = vadd.f32 %v5827_v51, %v10796_v37 }
0x1728   :  { %v4730_v7 = vadd.f32 %v4948_v56, %v4721_v62 }
0x172a   :  { %4731 = vst [vmem:[%s11036_s23] sm:$0xff] %v4730_v7 }

</bundles_post_ra>
